<compile_context>
chip_gen: v7x
topology: tpu7x:2x2x1
jax: 0.10.0
libtpu: 0.0.40
codegen_flags: <defaults>
</compile_context>

<pallas_src>
import math

import numpy as np

import jax
import jax.numpy as jnp
from jax import lax
from jax.experimental import pallas as pl
from jax.experimental.pallas import tpu as pltpu

NEG_SLOPE = 0.01  # nn.LeakyReLU default


def _leaky(v):
    return jnp.where(v >= 0, v, NEG_SLOPE * v)


def res_block_forward(x_nchw, w1, b1, w2, b2):
    """Fused res_block forward.

    x: (N, Cin, H, W) float32 (torch layout); w: (Cout, Cin, 3, 3); b: (Cout,).
    Returns (N, Cout, (H-2)//3, (W-2)//3) float32.
    """
    N, Cin, H, W = x_nchw.shape
    Cout = w1.shape[0]
    Ho1, Wo1 = H - 2, W - 2                      # conv1 (pad=0) output size
    Hp, Wp = Ho1 // 3, Wo1 // 3                  # pooled output size (floor)
    assert Hp >= 1 and Wp >= 1, "image too small for this block"

    # Flat "pixel matrix" bookkeeping (flat row index p = i*W + j).
    P1 = (Ho1 - 1) * W + Wo1                     # rows of the conv output slabs
    CR = (Ho1 + 2) * W                           # rows of zero-padded canvas (== H*W)
    L = P1 - (2 * W + 2)                         # rows of the 3x3 rolling-max slab
    Cin_p = max(8, ((Cin + 7) // 8) * 8)         # pad contraction dim for the MXU

    # ---------------- host-side layout prep (tiny arrays) ----------------
    x = jnp.transpose(x_nchw, (0, 2, 3, 1))                   # NHWC
    if Cin_p != Cin:
        x = jnp.pad(x, ((0, 0), (0, 0), (0, 0), (0, Cin_p - Cin)))
    x = x.reshape(N, H * W, Cin_p).astype(jnp.bfloat16)       # flat pixel matrix

    w1m = jnp.transpose(w1, (2, 3, 1, 0)).reshape(9, Cin, Cout)
    if Cin_p != Cin:
        w1m = jnp.pad(w1m, ((0, 0), (0, Cin_p - Cin), (0, 0)))
    w1m = w1m.astype(jnp.bfloat16)
    w2m = jnp.transpose(w2, (2, 3, 1, 0)).reshape(9, Cout, Cout).astype(jnp.bfloat16)
    b1m = b1.reshape(1, Cout).astype(jnp.float32)
    b2m = b2.reshape(1, Cout).astype(jnp.float32)

    # 1.0 where the flat row is a real output column (j < Wo1).  The masked-out
    # rows land exactly on the canvas' left/right zero-padding positions.
    colmask = jnp.asarray(
        ((np.arange(P1) % W) < Wo1).astype(np.float32).reshape(P1, 1))

    # Pool-origin selection matrix: row k = (hp, wp) picks flat index 3*hp*W+3*wp.
    psel_np = np.zeros((Hp * Wp, L), np.float32)
    hp_i = np.repeat(np.arange(Hp), Wp)
    wp_i = np.tile(np.arange(Wp), Hp)
    psel_np[np.arange(Hp * Wp), 3 * hp_i * W + 3 * wp_i] = 1.0
    psel = jnp.asarray(psel_np)

    def kernel(x_ref, w1_ref, b1_ref, w2_ref, b2_ref, mask_ref, psel_ref,
               o_ref, canvas_ref, y2_ref):
        # x_ref    : (1, H*W, Cin_p) bf16     canvas_ref: (CR, Cout) f32
        # w1_ref   : (9, Cin_p, Cout) bf16    y2_ref    : (P1, Cout) f32
        # w2_ref   : (9, Cout, Cout) bf16     o_ref     : (1, Hp*Wp, Cout) f32
        # b*_ref   : (1, Cout) f32            mask_ref  : (P1, 1) f32
        # psel_ref : (Hp*Wp, L) f32
        mask = mask_ref[...]                                        # (P1, 1)

        # ---- conv1 (3x3, pad 0): 9 big-M taps, K = Cin_p ----
        acc1 = jnp.zeros((P1, Cout), jnp.float32)
        for di in range(3):
            for dj in range(3):
                s = di * W + dj
                xs = x_ref[0, s:s + P1, :]                          # (P1, Cin_p) bf16
                acc1 = acc1 + jnp.dot(xs, w1_ref[3 * di + dj],
                                      preferred_element_type=jnp.float32)
        y1 = _leaky(acc1 + b1_ref[...]) * mask                      # (P1, Cout) f32

        # Zero-padded f32 canvas for conv2; interior = exact f32 residual.
        canvas_ref[0:W + 1, :] = jnp.zeros((W + 1, Cout), jnp.float32)
        canvas_ref[W + 1 + P1:CR, :] = jnp.zeros((CR - (W + 1 + P1), Cout),
                                                 jnp.float32)
        canvas_ref[W + 1:W + 1 + P1, :] = y1

        # ---- conv2 (3x3, pad 1): 9 big-M taps, K = Cout ----
        acc2 = jnp.zeros((P1, Cout), jnp.float32)
        for di in range(3):
            for dj in range(3):
                s = di * W + dj
                ys = canvas_ref[s:s + P1, :].astype(jnp.bfloat16)   # (P1, Cout)
                acc2 = acc2 + jnp.dot(ys, w2_ref[3 * di + dj],
                                      preferred_element_type=jnp.float32)
        identity = canvas_ref[W + 1:W + 1 + P1, :]                  # relu1 output
        y2_ref[...] = _leaky(acc2 + b2_ref[...] + identity)

        # ---- 3x3 / stride-3 max pool: 9-shift rolling max + selection matmul
        cand = y2_ref[0:L, :]
        for s in (1, 2, W, W + 1, W + 2, 2 * W, 2 * W + 1, 2 * W + 2):
            cand = jnp.maximum(cand, y2_ref[s:s + L, :])
        pooled = jnp.dot(psel_ref[...], cand,
                         preferred_element_type=jnp.float32)        # (Hp*Wp, Cout)
        o_ref[0, :, :] = pooled                                      # single store

    out = pl.pallas_call(
        kernel,
        out_shape=jax.ShapeDtypeStruct((N, Hp * Wp, Cout), jnp.float32),
        grid=(N,),
        in_specs=[
            pl.BlockSpec((1, H * W, Cin_p), lambda n: (n, 0, 0)),
            pl.BlockSpec((9, Cin_p, Cout), lambda n: (0, 0, 0)),
            pl.BlockSpec((1, Cout), lambda n: (0, 0)),
            pl.BlockSpec((9, Cout, Cout), lambda n: (0, 0, 0)),
            pl.BlockSpec((1, Cout), lambda n: (0, 0)),
            pl.BlockSpec((P1, 1), lambda n: (0, 0)),
            pl.BlockSpec((Hp * Wp, L), lambda n: (0, 0)),
        ],
        out_specs=pl.BlockSpec((1, Hp * Wp, Cout), lambda n: (n, 0, 0)),
        scratch_shapes=[
            pltpu.VMEM((CR, Cout), jnp.float32),   # zero-padded relu1 canvas
            pltpu.VMEM((P1, Cout), jnp.float32),   # pre-pool activation
        ],
        compiler_params=pltpu.CompilerParams(dimension_semantics=("parallel",)),
    )(x, w1m, b1m, w2m, b2m, colmask, psel)

    return jnp.transpose(out.reshape(N, Hp, Wp, Cout), (0, 3, 1, 2))  # NCHW


def _reference_res_block(x, w1, b1, w2, b2):
    """Pure-XLA f32 reference matching the PyTorch module (for validation)."""
    dn = ("NCHW", "OIHW", "NCHW")
    y = lax.conv_general_dilated(x, w1, (1, 1), "VALID", dimension_numbers=dn)
    y = y + b1[None, :, None, None]
    y = jnp.where(y >= 0, y, NEG_SLOPE * y)
    z = lax.conv_general_dilated(y, w2, (1, 1), ((1, 1), (1, 1)),
                                 dimension_numbers=dn)
    z = z + b2[None, :, None, None] + y
    z = jnp.where(z >= 0, z, NEG_SLOPE * z)
    return lax.reduce_window(z, -jnp.inf, lax.max,
                             (1, 1, 3, 3), (1, 1, 3, 3), "VALID")


if __name__ == "__main__":
    key = jax.random.PRNGKey(0)
    kx, kw1, kb1, kw2, kb2 = jax.random.split(key, 5)

    N, in_c, out_c, H, W = 2, 4, 32, 16, 16
    x = jax.random.normal(kx, (N, in_c, H, W), dtype=jnp.float32)

    bound1 = 1.0 / math.sqrt(in_c * 9)
    w1 = jax.random.uniform(kw1, (out_c, in_c, 3, 3), jnp.float32, -bound1, bound1)
    b1 = jax.random.uniform(kb1, (out_c,), jnp.float32, -bound1, bound1)
    bound2 = 1.0 / math.sqrt(out_c * 9)
    w2 = jax.random.uniform(kw2, (out_c, out_c, 3, 3), jnp.float32, -bound2, bound2)
    b2 = jax.random.uniform(kb2, (out_c,), jnp.float32, -bound2, bound2)

    fwd = jax.jit(res_block_forward)
    out = jax.block_until_ready(fwd(x, w1, b1, w2, b2))

    Hp, Wp = (H - 2) // 3, (W - 2) // 3
    assert out.shape == (N, out_c, Hp, Wp), out.shape
    assert bool(jnp.all(jnp.isfinite(out)))

    ref = jax.block_until_ready(_reference_res_block(x, w1, b1, w2, b2))
    max_err = float(jnp.max(jnp.abs(out - ref)))
    assert max_err < 0.1, f"max abs error vs f32 reference: {max_err}"

    print("KERNEL_OK")
</pallas_src>

<mosaic_0001>
module attributes {stable_mosaic.version = 11 : i64} {
  func.func @kernel(%arg0: i32, %arg1: memref<1x256x8xbf16, #tpu.memory_space<vmem>>, %arg2: memref<9x8x32xbf16, #tpu.memory_space<vmem>>, %arg3: memref<1x32xf32, #tpu.memory_space<vmem>>, %arg4: memref<9x32x32xbf16, #tpu.memory_space<vmem>>, %arg5: memref<1x32xf32, #tpu.memory_space<vmem>>, %arg6: memref<222x1xf32, #tpu.memory_space<vmem>>, %arg7: memref<16x188xf32, #tpu.memory_space<vmem>>, %arg8: memref<1x16x32xf32, #tpu.memory_space<vmem>>, %arg9: memref<256x32xf32, #tpu.memory_space<vmem>>, %arg10: memref<222x32xf32, #tpu.memory_space<vmem>>) attributes {dimension_semantics = [#tpu.dimension_semantics<parallel>], iteration_bounds = array<i64: 2>, scalar_prefetch = 0 : i64, scratch_operands = 2 : i64, tpu.core_type = #tpu.core_type<tc>, window_params = [{transform_indices = @transform_0, window_bounds = array<i64: 1, 256, 8>}, {pipeline_mode = #tpu.pipeline_mode<synchronous>, transform_indices = @transform_1, window_bounds = array<i64: 9, 8, 32>}, {pipeline_mode = #tpu.pipeline_mode<synchronous>, transform_indices = @transform_2, window_bounds = array<i64: 1, 32>}, {pipeline_mode = #tpu.pipeline_mode<synchronous>, transform_indices = @transform_3, window_bounds = array<i64: 9, 32, 32>}, {pipeline_mode = #tpu.pipeline_mode<synchronous>, transform_indices = @transform_4, window_bounds = array<i64: 1, 32>}, {pipeline_mode = #tpu.pipeline_mode<synchronous>, transform_indices = @transform_5, window_bounds = array<i64: 222, 1>}, {pipeline_mode = #tpu.pipeline_mode<synchronous>, transform_indices = @transform_6, window_bounds = array<i64: 16, 188>}, {transform_indices = @transform_7, window_bounds = array<i64: 1, 16, 32>}]} {
    %c0 = arith.constant 0 : index
    %c0_0 = arith.constant 0 : index
    %0 = vector.load %arg6[%c0, %c0_0] : memref<222x1xf32, #tpu.memory_space<vmem>>, vector<222x1xf32>
    %cst = arith.constant 0.000000e+00 : f32
    %1 = vector.broadcast %cst : f32 to vector<222x32xf32>
    %c0_1 = arith.constant 0 : index
    %c0_2 = arith.constant 0 : index
    %c0_3 = arith.constant 0 : index
    %2 = vector.load %arg1[%c0_1, %c0_2, %c0_3] : memref<1x256x8xbf16, #tpu.memory_space<vmem>>, vector<1x222x8xbf16>
    %3 = vector.shape_cast %2 : vector<1x222x8xbf16> to vector<222x8xbf16>
    %c0_4 = arith.constant 0 : index
    %c0_5 = arith.constant 0 : index
    %c0_6 = arith.constant 0 : index
    %4 = vector.load %arg2[%c0_4, %c0_5, %c0_6] : memref<9x8x32xbf16, #tpu.memory_space<vmem>>, vector<1x8x32xbf16>
    %5 = vector.shape_cast %4 : vector<1x8x32xbf16> to vector<8x32xbf16>
    %cst_7 = arith.constant dense<0.000000e+00> : vector<222x32xf32>
    %6 = tpu.matmul %3, %5, %cst_7 {dimension_numbers = #tpu.dot_dimension_numbers<[1], [0], [0], [1], [0, 0, 1, 1], [], []>} : vector<222x8xbf16>, vector<8x32xbf16>, vector<222x32xf32> -> vector<222x32xf32>
    %7 = arith.addf %1, %6 : vector<222x32xf32>
    %c0_8 = arith.constant 0 : index
    %c1 = arith.constant 1 : index
    %c0_9 = arith.constant 0 : index
    %8 = vector.load %arg1[%c0_8, %c1, %c0_9] : memref<1x256x8xbf16, #tpu.memory_space<vmem>>, vector<1x222x8xbf16>
    %9 = vector.shape_cast %8 : vector<1x222x8xbf16> to vector<222x8xbf16>
    %c1_10 = arith.constant 1 : index
    %c0_11 = arith.constant 0 : index
    %c0_12 = arith.constant 0 : index
    %10 = vector.load %arg2[%c1_10, %c0_11, %c0_12] : memref<9x8x32xbf16, #tpu.memory_space<vmem>>, vector<1x8x32xbf16>
    %11 = vector.shape_cast %10 : vector<1x8x32xbf16> to vector<8x32xbf16>
    %cst_13 = arith.constant dense<0.000000e+00> : vector<222x32xf32>
    %12 = tpu.matmul %9, %11, %cst_13 {dimension_numbers = #tpu.dot_dimension_numbers<[1], [0], [0], [1], [0, 0, 1, 1], [], []>} : vector<222x8xbf16>, vector<8x32xbf16>, vector<222x32xf32> -> vector<222x32xf32>
    %13 = arith.addf %7, %12 : vector<222x32xf32>
    %c0_14 = arith.constant 0 : index
    %c2 = arith.constant 2 : index
    %c0_15 = arith.constant 0 : index
    %14 = vector.load %arg1[%c0_14, %c2, %c0_15] : memref<1x256x8xbf16, #tpu.memory_space<vmem>>, vector<1x222x8xbf16>
    %15 = vector.shape_cast %14 : vector<1x222x8xbf16> to vector<222x8xbf16>
    %c2_16 = arith.constant 2 : index
    %c0_17 = arith.constant 0 : index
    %c0_18 = arith.constant 0 : index
    %16 = vector.load %arg2[%c2_16, %c0_17, %c0_18] : memref<9x8x32xbf16, #tpu.memory_space<vmem>>, vector<1x8x32xbf16>
    %17 = vector.shape_cast %16 : vector<1x8x32xbf16> to vector<8x32xbf16>
    %cst_19 = arith.constant dense<0.000000e+00> : vector<222x32xf32>
    %18 = tpu.matmul %15, %17, %cst_19 {dimension_numbers = #tpu.dot_dimension_numbers<[1], [0], [0], [1], [0, 0, 1, 1], [], []>} : vector<222x8xbf16>, vector<8x32xbf16>, vector<222x32xf32> -> vector<222x32xf32>
    %19 = arith.addf %13, %18 : vector<222x32xf32>
    %c0_20 = arith.constant 0 : index
    %c16 = arith.constant 16 : index
    %c0_21 = arith.constant 0 : index
    %20 = vector.load %arg1[%c0_20, %c16, %c0_21] : memref<1x256x8xbf16, #tpu.memory_space<vmem>>, vector<1x222x8xbf16>
    %21 = vector.shape_cast %20 : vector<1x222x8xbf16> to vector<222x8xbf16>
    %c3 = arith.constant 3 : index
    %c0_22 = arith.constant 0 : index
    %c0_23 = arith.constant 0 : index
    %22 = vector.load %arg2[%c3, %c0_22, %c0_23] : memref<9x8x32xbf16, #tpu.memory_space<vmem>>, vector<1x8x32xbf16>
    %23 = vector.shape_cast %22 : vector<1x8x32xbf16> to vector<8x32xbf16>
    %cst_24 = arith.constant dense<0.000000e+00> : vector<222x32xf32>
    %24 = tpu.matmul %21, %23, %cst_24 {dimension_numbers = #tpu.dot_dimension_numbers<[1], [0], [0], [1], [0, 0, 1, 1], [], []>} : vector<222x8xbf16>, vector<8x32xbf16>, vector<222x32xf32> -> vector<222x32xf32>
    %25 = arith.addf %19, %24 : vector<222x32xf32>
    %c0_25 = arith.constant 0 : index
    %c17 = arith.constant 17 : index
    %c0_26 = arith.constant 0 : index
    %26 = vector.load %arg1[%c0_25, %c17, %c0_26] : memref<1x256x8xbf16, #tpu.memory_space<vmem>>, vector<1x222x8xbf16>
    %27 = vector.shape_cast %26 : vector<1x222x8xbf16> to vector<222x8xbf16>
    %c4 = arith.constant 4 : index
    %c0_27 = arith.constant 0 : index
    %c0_28 = arith.constant 0 : index
    %28 = vector.load %arg2[%c4, %c0_27, %c0_28] : memref<9x8x32xbf16, #tpu.memory_space<vmem>>, vector<1x8x32xbf16>
    %29 = vector.shape_cast %28 : vector<1x8x32xbf16> to vector<8x32xbf16>
    %cst_29 = arith.constant dense<0.000000e+00> : vector<222x32xf32>
    %30 = tpu.matmul %27, %29, %cst_29 {dimension_numbers = #tpu.dot_dimension_numbers<[1], [0], [0], [1], [0, 0, 1, 1], [], []>} : vector<222x8xbf16>, vector<8x32xbf16>, vector<222x32xf32> -> vector<222x32xf32>
    %31 = arith.addf %25, %30 : vector<222x32xf32>
    %c0_30 = arith.constant 0 : index
    %c18 = arith.constant 18 : index
    %c0_31 = arith.constant 0 : index
    %32 = vector.load %arg1[%c0_30, %c18, %c0_31] : memref<1x256x8xbf16, #tpu.memory_space<vmem>>, vector<1x222x8xbf16>
    %33 = vector.shape_cast %32 : vector<1x222x8xbf16> to vector<222x8xbf16>
    %c5 = arith.constant 5 : index
    %c0_32 = arith.constant 0 : index
    %c0_33 = arith.constant 0 : index
    %34 = vector.load %arg2[%c5, %c0_32, %c0_33] : memref<9x8x32xbf16, #tpu.memory_space<vmem>>, vector<1x8x32xbf16>
    %35 = vector.shape_cast %34 : vector<1x8x32xbf16> to vector<8x32xbf16>
    %cst_34 = arith.constant dense<0.000000e+00> : vector<222x32xf32>
    %36 = tpu.matmul %33, %35, %cst_34 {dimension_numbers = #tpu.dot_dimension_numbers<[1], [0], [0], [1], [0, 0, 1, 1], [], []>} : vector<222x8xbf16>, vector<8x32xbf16>, vector<222x32xf32> -> vector<222x32xf32>
    %37 = arith.addf %31, %36 : vector<222x32xf32>
    %c0_35 = arith.constant 0 : index
    %c32 = arith.constant 32 : index
    %c0_36 = arith.constant 0 : index
    %38 = vector.load %arg1[%c0_35, %c32, %c0_36] : memref<1x256x8xbf16, #tpu.memory_space<vmem>>, vector<1x222x8xbf16>
    %39 = vector.shape_cast %38 : vector<1x222x8xbf16> to vector<222x8xbf16>
    %c6 = arith.constant 6 : index
    %c0_37 = arith.constant 0 : index
    %c0_38 = arith.constant 0 : index
    %40 = vector.load %arg2[%c6, %c0_37, %c0_38] : memref<9x8x32xbf16, #tpu.memory_space<vmem>>, vector<1x8x32xbf16>
    %41 = vector.shape_cast %40 : vector<1x8x32xbf16> to vector<8x32xbf16>
    %cst_39 = arith.constant dense<0.000000e+00> : vector<222x32xf32>
    %42 = tpu.matmul %39, %41, %cst_39 {dimension_numbers = #tpu.dot_dimension_numbers<[1], [0], [0], [1], [0, 0, 1, 1], [], []>} : vector<222x8xbf16>, vector<8x32xbf16>, vector<222x32xf32> -> vector<222x32xf32>
    %43 = arith.addf %37, %42 : vector<222x32xf32>
    %c0_40 = arith.constant 0 : index
    %c33 = arith.constant 33 : index
    %c0_41 = arith.constant 0 : index
    %44 = vector.load %arg1[%c0_40, %c33, %c0_41] : memref<1x256x8xbf16, #tpu.memory_space<vmem>>, vector<1x222x8xbf16>
    %45 = vector.shape_cast %44 : vector<1x222x8xbf16> to vector<222x8xbf16>
    %c7 = arith.constant 7 : index
    %c0_42 = arith.constant 0 : index
    %c0_43 = arith.constant 0 : index
    %46 = vector.load %arg2[%c7, %c0_42, %c0_43] : memref<9x8x32xbf16, #tpu.memory_space<vmem>>, vector<1x8x32xbf16>
    %47 = vector.shape_cast %46 : vector<1x8x32xbf16> to vector<8x32xbf16>
    %cst_44 = arith.constant dense<0.000000e+00> : vector<222x32xf32>
    %48 = tpu.matmul %45, %47, %cst_44 {dimension_numbers = #tpu.dot_dimension_numbers<[1], [0], [0], [1], [0, 0, 1, 1], [], []>} : vector<222x8xbf16>, vector<8x32xbf16>, vector<222x32xf32> -> vector<222x32xf32>
    %49 = arith.addf %43, %48 : vector<222x32xf32>
    %c0_45 = arith.constant 0 : index
    %c34 = arith.constant 34 : index
    %c0_46 = arith.constant 0 : index
    %50 = vector.load %arg1[%c0_45, %c34, %c0_46] : memref<1x256x8xbf16, #tpu.memory_space<vmem>>, vector<1x222x8xbf16>
    %51 = vector.shape_cast %50 : vector<1x222x8xbf16> to vector<222x8xbf16>
    %c8 = arith.constant 8 : index
    %c0_47 = arith.constant 0 : index
    %c0_48 = arith.constant 0 : index
    %52 = vector.load %arg2[%c8, %c0_47, %c0_48] : memref<9x8x32xbf16, #tpu.memory_space<vmem>>, vector<1x8x32xbf16>
    %53 = vector.shape_cast %52 : vector<1x8x32xbf16> to vector<8x32xbf16>
    %cst_49 = arith.constant dense<0.000000e+00> : vector<222x32xf32>
    %54 = tpu.matmul %51, %53, %cst_49 {dimension_numbers = #tpu.dot_dimension_numbers<[1], [0], [0], [1], [0, 0, 1, 1], [], []>} : vector<222x8xbf16>, vector<8x32xbf16>, vector<222x32xf32> -> vector<222x32xf32>
    %55 = arith.addf %49, %54 : vector<222x32xf32>
    %c0_50 = arith.constant 0 : index
    %c0_51 = arith.constant 0 : index
    %56 = vector.load %arg3[%c0_50, %c0_51] : memref<1x32xf32, #tpu.memory_space<vmem>>, vector<1x32xf32>
    %57 = vector.broadcast %56 : vector<1x32xf32> to vector<222x32xf32>
    %58 = arith.addf %55, %57 : vector<222x32xf32>
    %cst_52 = arith.constant 0.000000e+00 : f32
    %59 = vector.broadcast %cst_52 : f32 to vector<222x32xf32>
    %60 = arith.cmpf oge, %58, %59 : vector<222x32xf32>
    %cst_53 = arith.constant 0.00999999977 : f32
    %61 = vector.broadcast %cst_53 : f32 to vector<222x32xf32>
    %62 = arith.mulf %61, %58 : vector<222x32xf32>
    %63 = arith.select %60, %58, %62 : vector<222x32xi1>, vector<222x32xf32>
    %64 = vector.broadcast %0 : vector<222x1xf32> to vector<222x32xf32>
    %65 = arith.mulf %63, %64 : vector<222x32xf32>
    %cst_54 = arith.constant 0.000000e+00 : f32
    %66 = vector.broadcast %cst_54 : f32 to vector<17x32xf32>
    %c0_55 = arith.constant 0 : index
    %c0_56 = arith.constant 0 : index
    %67 = vector.load %arg9[%c0_55, %c0_56] : memref<256x32xf32, #tpu.memory_space<vmem>>, vector<17x32xf32>
    tpu.vector_store %arg9[%c0_55, %c0_56], %66 {strides = array<i32>} : memref<256x32xf32, #tpu.memory_space<vmem>>, vector<17x32xf32>,
    %cst_57 = arith.constant 0.000000e+00 : f32
    %68 = vector.broadcast %cst_57 : f32 to vector<17x32xf32>
    %c239 = arith.constant 239 : index
    %c0_58 = arith.constant 0 : index
    %69 = vector.load %arg9[%c239, %c0_58] : memref<256x32xf32, #tpu.memory_space<vmem>>, vector<17x32xf32>
    tpu.vector_store %arg9[%c239, %c0_58], %68 {strides = array<i32>} : memref<256x32xf32, #tpu.memory_space<vmem>>, vector<17x32xf32>,
    %c17_59 = arith.constant 17 : index
    %c0_60 = arith.constant 0 : index
    %70 = vector.load %arg9[%c17_59, %c0_60] : memref<256x32xf32, #tpu.memory_space<vmem>>, vector<222x32xf32>
    tpu.vector_store %arg9[%c17_59, %c0_60], %65 {strides = array<i32>} : memref<256x32xf32, #tpu.memory_space<vmem>>, vector<222x32xf32>,
    %cst_61 = arith.constant 0.000000e+00 : f32
    %71 = vector.broadcast %cst_61 : f32 to vector<222x32xf32>
    %c0_62 = arith.constant 0 : index
    %c0_63 = arith.constant 0 : index
    %72 = vector.load %arg9[%c0_62, %c0_63] : memref<256x32xf32, #tpu.memory_space<vmem>>, vector<222x32xf32>
    %73 = arith.truncf %72 : vector<222x32xf32> to vector<222x32xbf16>
    %c0_64 = arith.constant 0 : index
    %c0_65 = arith.constant 0 : index
    %c0_66 = arith.constant 0 : index
    %74 = vector.load %arg4[%c0_64, %c0_65, %c0_66] : memref<9x32x32xbf16, #tpu.memory_space<vmem>>, vector<1x32x32xbf16>
    %75 = vector.shape_cast %74 : vector<1x32x32xbf16> to vector<32x32xbf16>
    %cst_67 = arith.constant dense<0.000000e+00> : vector<222x32xf32>
    %76 = tpu.matmul %73, %75, %cst_67 {dimension_numbers = #tpu.dot_dimension_numbers<[1], [0], [0], [1], [0, 0, 1, 1], [], []>} : vector<222x32xbf16>, vector<32x32xbf16>, vector<222x32xf32> -> vector<222x32xf32>
    %77 = arith.addf %71, %76 : vector<222x32xf32>
    %c1_68 = arith.constant 1 : index
    %c0_69 = arith.constant 0 : index
    %78 = vector.load %arg9[%c1_68, %c0_69] : memref<256x32xf32, #tpu.memory_space<vmem>>, vector<222x32xf32>
    %79 = arith.truncf %78 : vector<222x32xf32> to vector<222x32xbf16>
    %c1_70 = arith.constant 1 : index
    %c0_71 = arith.constant 0 : index
    %c0_72 = arith.constant 0 : index
    %80 = vector.load %arg4[%c1_70, %c0_71, %c0_72] : memref<9x32x32xbf16, #tpu.memory_space<vmem>>, vector<1x32x32xbf16>
    %81 = vector.shape_cast %80 : vector<1x32x32xbf16> to vector<32x32xbf16>
    %cst_73 = arith.constant dense<0.000000e+00> : vector<222x32xf32>
    %82 = tpu.matmul %79, %81, %cst_73 {dimension_numbers = #tpu.dot_dimension_numbers<[1], [0], [0], [1], [0, 0, 1, 1], [], []>} : vector<222x32xbf16>, vector<32x32xbf16>, vector<222x32xf32> -> vector<222x32xf32>
    %83 = arith.addf %77, %82 : vector<222x32xf32>
    %c2_74 = arith.constant 2 : index
    %c0_75 = arith.constant 0 : index
    %84 = vector.load %arg9[%c2_74, %c0_75] : memref<256x32xf32, #tpu.memory_space<vmem>>, vector<222x32xf32>
    %85 = arith.truncf %84 : vector<222x32xf32> to vector<222x32xbf16>
    %c2_76 = arith.constant 2 : index
    %c0_77 = arith.constant 0 : index
    %c0_78 = arith.constant 0 : index
    %86 = vector.load %arg4[%c2_76, %c0_77, %c0_78] : memref<9x32x32xbf16, #tpu.memory_space<vmem>>, vector<1x32x32xbf16>
    %87 = vector.shape_cast %86 : vector<1x32x32xbf16> to vector<32x32xbf16>
    %cst_79 = arith.constant dense<0.000000e+00> : vector<222x32xf32>
    %88 = tpu.matmul %85, %87, %cst_79 {dimension_numbers = #tpu.dot_dimension_numbers<[1], [0], [0], [1], [0, 0, 1, 1], [], []>} : vector<222x32xbf16>, vector<32x32xbf16>, vector<222x32xf32> -> vector<222x32xf32>
    %89 = arith.addf %83, %88 : vector<222x32xf32>
    %c16_80 = arith.constant 16 : index
    %c0_81 = arith.constant 0 : index
    %90 = vector.load %arg9[%c16_80, %c0_81] : memref<256x32xf32, #tpu.memory_space<vmem>>, vector<222x32xf32>
    %91 = arith.truncf %90 : vector<222x32xf32> to vector<222x32xbf16>
    %c3_82 = arith.constant 3 : index
    %c0_83 = arith.constant 0 : index
    %c0_84 = arith.constant 0 : index
    %92 = vector.load %arg4[%c3_82, %c0_83, %c0_84] : memref<9x32x32xbf16, #tpu.memory_space<vmem>>, vector<1x32x32xbf16>
    %93 = vector.shape_cast %92 : vector<1x32x32xbf16> to vector<32x32xbf16>
    %cst_85 = arith.constant dense<0.000000e+00> : vector<222x32xf32>
    %94 = tpu.matmul %91, %93, %cst_85 {dimension_numbers = #tpu.dot_dimension_numbers<[1], [0], [0], [1], [0, 0, 1, 1], [], []>} : vector<222x32xbf16>, vector<32x32xbf16>, vector<222x32xf32> -> vector<222x32xf32>
    %95 = arith.addf %89, %94 : vector<222x32xf32>
    %c17_86 = arith.constant 17 : index
    %c0_87 = arith.constant 0 : index
    %96 = vector.load %arg9[%c17_86, %c0_87] : memref<256x32xf32, #tpu.memory_space<vmem>>, vector<222x32xf32>
    %97 = arith.truncf %96 : vector<222x32xf32> to vector<222x32xbf16>
    %c4_88 = arith.constant 4 : index
    %c0_89 = arith.constant 0 : index
    %c0_90 = arith.constant 0 : index
    %98 = vector.load %arg4[%c4_88, %c0_89, %c0_90] : memref<9x32x32xbf16, #tpu.memory_space<vmem>>, vector<1x32x32xbf16>
    %99 = vector.shape_cast %98 : vector<1x32x32xbf16> to vector<32x32xbf16>
    %cst_91 = arith.constant dense<0.000000e+00> : vector<222x32xf32>
    %100 = tpu.matmul %97, %99, %cst_91 {dimension_numbers = #tpu.dot_dimension_numbers<[1], [0], [0], [1], [0, 0, 1, 1], [], []>} : vector<222x32xbf16>, vector<32x32xbf16>, vector<222x32xf32> -> vector<222x32xf32>
    %101 = arith.addf %95, %100 : vector<222x32xf32>
    %c18_92 = arith.constant 18 : index
    %c0_93 = arith.constant 0 : index
    %102 = vector.load %arg9[%c18_92, %c0_93] : memref<256x32xf32, #tpu.memory_space<vmem>>, vector<222x32xf32>
    %103 = arith.truncf %102 : vector<222x32xf32> to vector<222x32xbf16>
    %c5_94 = arith.constant 5 : index
    %c0_95 = arith.constant 0 : index
    %c0_96 = arith.constant 0 : index
    %104 = vector.load %arg4[%c5_94, %c0_95, %c0_96] : memref<9x32x32xbf16, #tpu.memory_space<vmem>>, vector<1x32x32xbf16>
    %105 = vector.shape_cast %104 : vector<1x32x32xbf16> to vector<32x32xbf16>
    %cst_97 = arith.constant dense<0.000000e+00> : vector<222x32xf32>
    %106 = tpu.matmul %103, %105, %cst_97 {dimension_numbers = #tpu.dot_dimension_numbers<[1], [0], [0], [1], [0, 0, 1, 1], [], []>} : vector<222x32xbf16>, vector<32x32xbf16>, vector<222x32xf32> -> vector<222x32xf32>
    %107 = arith.addf %101, %106 : vector<222x32xf32>
    %c32_98 = arith.constant 32 : index
    %c0_99 = arith.constant 0 : index
    %108 = vector.load %arg9[%c32_98, %c0_99] : memref<256x32xf32, #tpu.memory_space<vmem>>, vector<222x32xf32>
    %109 = arith.truncf %108 : vector<222x32xf32> to vector<222x32xbf16>
    %c6_100 = arith.constant 6 : index
    %c0_101 = arith.constant 0 : index
    %c0_102 = arith.constant 0 : index
    %110 = vector.load %arg4[%c6_100, %c0_101, %c0_102] : memref<9x32x32xbf16, #tpu.memory_space<vmem>>, vector<1x32x32xbf16>
    %111 = vector.shape_cast %110 : vector<1x32x32xbf16> to vector<32x32xbf16>
    %cst_103 = arith.constant dense<0.000000e+00> : vector<222x32xf32>
    %112 = tpu.matmul %109, %111, %cst_103 {dimension_numbers = #tpu.dot_dimension_numbers<[1], [0], [0], [1], [0, 0, 1, 1], [], []>} : vector<222x32xbf16>, vector<32x32xbf16>, vector<222x32xf32> -> vector<222x32xf32>
    %113 = arith.addf %107, %112 : vector<222x32xf32>
    %c33_104 = arith.constant 33 : index
    %c0_105 = arith.constant 0 : index
    %114 = vector.load %arg9[%c33_104, %c0_105] : memref<256x32xf32, #tpu.memory_space<vmem>>, vector<222x32xf32>
    %115 = arith.truncf %114 : vector<222x32xf32> to vector<222x32xbf16>
    %c7_106 = arith.constant 7 : index
    %c0_107 = arith.constant 0 : index
    %c0_108 = arith.constant 0 : index
    %116 = vector.load %arg4[%c7_106, %c0_107, %c0_108] : memref<9x32x32xbf16, #tpu.memory_space<vmem>>, vector<1x32x32xbf16>
    %117 = vector.shape_cast %116 : vector<1x32x32xbf16> to vector<32x32xbf16>
    %cst_109 = arith.constant dense<0.000000e+00> : vector<222x32xf32>
    %118 = tpu.matmul %115, %117, %cst_109 {dimension_numbers = #tpu.dot_dimension_numbers<[1], [0], [0], [1], [0, 0, 1, 1], [], []>} : vector<222x32xbf16>, vector<32x32xbf16>, vector<222x32xf32> -> vector<222x32xf32>
    %119 = arith.addf %113, %118 : vector<222x32xf32>
    %c34_110 = arith.constant 34 : index
    %c0_111 = arith.constant 0 : index
    %120 = vector.load %arg9[%c34_110, %c0_111] : memref<256x32xf32, #tpu.memory_space<vmem>>, vector<222x32xf32>
    %121 = arith.truncf %120 : vector<222x32xf32> to vector<222x32xbf16>
    %c8_112 = arith.constant 8 : index
    %c0_113 = arith.constant 0 : index
    %c0_114 = arith.constant 0 : index
    %122 = vector.load %arg4[%c8_112, %c0_113, %c0_114] : memref<9x32x32xbf16, #tpu.memory_space<vmem>>, vector<1x32x32xbf16>
    %123 = vector.shape_cast %122 : vector<1x32x32xbf16> to vector<32x32xbf16>
    %cst_115 = arith.constant dense<0.000000e+00> : vector<222x32xf32>
    %124 = tpu.matmul %121, %123, %cst_115 {dimension_numbers = #tpu.dot_dimension_numbers<[1], [0], [0], [1], [0, 0, 1, 1], [], []>} : vector<222x32xbf16>, vector<32x32xbf16>, vector<222x32xf32> -> vector<222x32xf32>
    %125 = arith.addf %119, %124 : vector<222x32xf32>
    %c17_116 = arith.constant 17 : index
    %c0_117 = arith.constant 0 : index
    %126 = vector.load %arg9[%c17_116, %c0_117] : memref<256x32xf32, #tpu.memory_space<vmem>>, vector<222x32xf32>
    %c0_118 = arith.constant 0 : index
    %c0_119 = arith.constant 0 : index
    %127 = vector.load %arg5[%c0_118, %c0_119] : memref<1x32xf32, #tpu.memory_space<vmem>>, vector<1x32xf32>
    %128 = vector.broadcast %127 : vector<1x32xf32> to vector<222x32xf32>
    %129 = arith.addf %125, %128 : vector<222x32xf32>
    %130 = arith.addf %129, %126 : vector<222x32xf32>
    %cst_120 = arith.constant 0.000000e+00 : f32
    %131 = vector.broadcast %cst_120 : f32 to vector<222x32xf32>
    %132 = arith.cmpf oge, %130, %131 : vector<222x32xf32>
    %cst_121 = arith.constant 0.00999999977 : f32
    %133 = vector.broadcast %cst_121 : f32 to vector<222x32xf32>
    %134 = arith.mulf %133, %130 : vector<222x32xf32>
    %135 = arith.select %132, %130, %134 : vector<222x32xi1>, vector<222x32xf32>
    %c0_122 = arith.constant 0 : index
    %c0_123 = arith.constant 0 : index
    %136 = vector.load %arg10[%c0_122, %c0_123] : memref<222x32xf32, #tpu.memory_space<vmem>>, vector<222x32xf32>
    tpu.vector_store %arg10[%c0_122, %c0_123], %135 {strides = array<i32>} : memref<222x32xf32, #tpu.memory_space<vmem>>, vector<222x32xf32>,
    %c0_124 = arith.constant 0 : index
    %c0_125 = arith.constant 0 : index
    %137 = vector.load %arg10[%c0_124, %c0_125] : memref<222x32xf32, #tpu.memory_space<vmem>>, vector<188x32xf32>
    %c1_126 = arith.constant 1 : index
    %c0_127 = arith.constant 0 : index
    %138 = vector.load %arg10[%c1_126, %c0_127] : memref<222x32xf32, #tpu.memory_space<vmem>>, vector<188x32xf32>
    %139 = arith.maximumf %137, %138 : vector<188x32xf32>
    %c2_128 = arith.constant 2 : index
    %c0_129 = arith.constant 0 : index
    %140 = vector.load %arg10[%c2_128, %c0_129] : memref<222x32xf32, #tpu.memory_space<vmem>>, vector<188x32xf32>
    %141 = arith.maximumf %139, %140 : vector<188x32xf32>
    %c16_130 = arith.constant 16 : index
    %c0_131 = arith.constant 0 : index
    %142 = vector.load %arg10[%c16_130, %c0_131] : memref<222x32xf32, #tpu.memory_space<vmem>>, vector<188x32xf32>
    %143 = arith.maximumf %141, %142 : vector<188x32xf32>
    %c17_132 = arith.constant 17 : index
    %c0_133 = arith.constant 0 : index
    %144 = vector.load %arg10[%c17_132, %c0_133] : memref<222x32xf32, #tpu.memory_space<vmem>>, vector<188x32xf32>
    %145 = arith.maximumf %143, %144 : vector<188x32xf32>
    %c18_134 = arith.constant 18 : index
    %c0_135 = arith.constant 0 : index
    %146 = vector.load %arg10[%c18_134, %c0_135] : memref<222x32xf32, #tpu.memory_space<vmem>>, vector<188x32xf32>
    %147 = arith.maximumf %145, %146 : vector<188x32xf32>
    %c32_136 = arith.constant 32 : index
    %c0_137 = arith.constant 0 : index
    %148 = vector.load %arg10[%c32_136, %c0_137] : memref<222x32xf32, #tpu.memory_space<vmem>>, vector<188x32xf32>
    %149 = arith.maximumf %147, %148 : vector<188x32xf32>
    %c33_138 = arith.constant 33 : index
    %c0_139 = arith.constant 0 : index
    %150 = vector.load %arg10[%c33_138, %c0_139] : memref<222x32xf32, #tpu.memory_space<vmem>>, vector<188x32xf32>
    %151 = arith.maximumf %149, %150 : vector<188x32xf32>
    %c34_140 = arith.constant 34 : index
    %c0_141 = arith.constant 0 : index
    %152 = vector.load %arg10[%c34_140, %c0_141] : memref<222x32xf32, #tpu.memory_space<vmem>>, vector<188x32xf32>
    %153 = arith.maximumf %151, %152 : vector<188x32xf32>
    %c0_142 = arith.constant 0 : index
    %c0_143 = arith.constant 0 : index
    %154 = vector.load %arg7[%c0_142, %c0_143] : memref<16x188xf32, #tpu.memory_space<vmem>>, vector<16x188xf32>
    %cst_144 = arith.constant dense<0.000000e+00> : vector<16x32xf32>
    %155 = tpu.matmul %154, %153, %cst_144 {dimension_numbers = #tpu.dot_dimension_numbers<[1], [0], [0], [1], [0, 0, 1, 1], [], []>} : vector<16x188xf32>, vector<188x32xf32>, vector<16x32xf32> -> vector<16x32xf32>
    %c0_145 = arith.constant 0 : index
    %c0_146 = arith.constant 0 : index
    %c0_147 = arith.constant 0 : index
    %156 = vector.load %arg8[%c0_145, %c0_146, %c0_147] : memref<1x16x32xf32, #tpu.memory_space<vmem>>, vector<1x16x32xf32>
    %157 = vector.shape_cast %156 : vector<1x16x32xf32> to vector<16x32xf32>
    %158 = vector.shape_cast %155 : vector<16x32xf32> to vector<1x16x32xf32>
    tpu.vector_store %arg8[%c0_145, %c0_146, %c0_147], %158 {strides = array<i32>} : memref<1x16x32xf32, #tpu.memory_space<vmem>>, vector<1x16x32xf32>,
    return
  }
  func.func @transform_0(%arg0: i32) -> (i32, i32, i32) {
    %c0_i32 = arith.constant 0 : i32
    %c0_i32_0 = arith.constant 0 : i32
    %c0_i32_1 = arith.constant 0 : i32
    return %arg0, %c0_i32, %c0_i32_0 : i32, i32, i32
  }
  func.func @transform_1(%arg0: i32) -> (i32, i32, i32) {
    %c0_i32 = arith.constant 0 : i32
    %c0_i32_0 = arith.constant 0 : i32
    %c0_i32_1 = arith.constant 0 : i32
    %c0_i32_2 = arith.constant 0 : i32
    return %c0_i32, %c0_i32_0, %c0_i32_1 : i32, i32, i32
  }
  func.func @transform_2(%arg0: i32) -> (i32, i32) {
    %c0_i32 = arith.constant 0 : i32
    %c0_i32_0 = arith.constant 0 : i32
    %c0_i32_1 = arith.constant 0 : i32
    return %c0_i32, %c0_i32_0 : i32, i32
  }
  func.func @transform_3(%arg0: i32) -> (i32, i32, i32) {
    %c0_i32 = arith.constant 0 : i32
    %c0_i32_0 = arith.constant 0 : i32
    %c0_i32_1 = arith.constant 0 : i32
    %c0_i32_2 = arith.constant 0 : i32
    return %c0_i32, %c0_i32_0, %c0_i32_1 : i32, i32, i32
  }
  func.func @transform_4(%arg0: i32) -> (i32, i32) {
    %c0_i32 = arith.constant 0 : i32
    %c0_i32_0 = arith.constant 0 : i32
    %c0_i32_1 = arith.constant 0 : i32
    return %c0_i32, %c0_i32_0 : i32, i32
  }
  func.func @transform_5(%arg0: i32) -> (i32, i32) {
    %c0_i32 = arith.constant 0 : i32
    %c0_i32_0 = arith.constant 0 : i32
    %c0_i32_1 = arith.constant 0 : i32
    return %c0_i32, %c0_i32_0 : i32, i32
  }
  func.func @transform_6(%arg0: i32) -> (i32, i32) {
    %c0_i32 = arith.constant 0 : i32
    %c0_i32_0 = arith.constant 0 : i32
    %c0_i32_1 = arith.constant 0 : i32
    return %c0_i32, %c0_i32_0 : i32, i32
  }
  func.func @transform_7(%arg0: i32) -> (i32, i32, i32) {
    %c0_i32 = arith.constant 0 : i32
    %c0_i32_0 = arith.constant 0 : i32
    %c0_i32_1 = arith.constant 0 : i32
    return %arg0, %c0_i32, %c0_i32_0 : i32, i32, i32
  }
}

</mosaic_0001>

<bundles_post_ra>
// kernel: res_block_forward.1
= control target key start
LH: loop header
LB: loop body
LE: loop exit
PB: predicated region body
PF: predicated region fallthrough
CT: control target
= control target key end

     0   :  { %12 = vsyncpa [#allocation5], 0  ;;  %s9767_s0 = inlined_call_operand.vmem [shape: bf16[2,256,8], index: 0, kind: input, shape index: {}]   ;;  %s9768_s1 = inlined_call_operand.vmem [shape: bf16[9,8,32], index: 1, kind: input, shape index: {}]   ;;  %s9769_s2 = inlined_call_operand.vmem [shape: f32[1,32], index: 2, kind: input, shape index: {}]   ;;  %s9770_s3 = inlined_call_operand.vmem [shape: bf16[9,32,32], index: 3, kind: input, shape index: {}]   ;;  %s9771_s4 = inlined_call_operand.vmem [shape: f32[1,32], index: 4, kind: input, shape index: {}]   ;;  %s9772_s5 = inlined_call_operand.vmem [shape: f32[222,1], index: 5, kind: input, shape index: {}]   ;;  %s9773_s6 = inlined_call_operand.vmem [shape: f32[16,188], index: 6, kind: input, shape index: {}]   ;;  %s9774_s7 = inlined_call_operand.hbm [shape: f32[2,16,32], index: 7, kind: output, shape index: {}]  }
   0x1   :  { %14 = vsyncpa [#allocation5 + $0x1], 0  ;;  %s8218_s24 = smov 0   ;;  %s8220_s25 = smov 0  }
   0x2   :  { %s8222_s26 = smov 0   ;;  %s8224_s27 = smov 0  }
   0x3 LB: > { %s8239_s28 = sadd.s32 4294967295, %s8169_s27   ;;  %s6283_s29 = sadd.s32 4294967294, %s8169_s27   ;;  %s8169_s27 = sphi %s8224_s27, %s9795_s27   ;;  %s8165_s26 = sphi %s8222_s26, %s9794_s26   ;;  %s8161_s25 = sphi %s8220_s25, %s9793_s25   ;;  %s8157_s24 = sphi %s8218_s24, %s9792_s24  }
   0x4   : > { %s8243_s30 = sadd.s32 1, %s8169_s27   ;;  %s179_s8 = sadd.s32 1, %s8165_s26 }
   0x5   : > { %s176_s9 = ssub.s32 %s8169_s27, %s8243_s30  ;;  %p189_p0 = scmp.ne.s32.totalorder %s8165_s26, %s8161_s25 }
   0x6   : > { %p177_p1 = scmp.eq.s32.totalorder %s176_s9, 0  ;;  %p190_p2 = scmp.eq.s32.totalorder %s8239_s28, 1 }
   0x7   : > { %p195_p3 = scmp.ne.s32.totalorder %s8161_s25, %s8157_s24  ;;  %p196_p4 = scmp.eq.s32.totalorder %s6283_s29, 1 }
   0x8   : > { %s8254_s10 = scalar_select %p177_p1, %s8165_s26, %s179_s8  }
   0x9   : > { %p8256_p5 = por %p190_p2, %p189_p0  ;;  %p8260_p6 = por %p196_p4, %p195_p3 }
   0xa   : > { %p6286_p7 = scmp.ge.s32.totalorder %s8169_s27, 1  ;;  %p240_p8 = scmp.lt.s32.totalorder %s8169_s27, 3 }
   0xc   : > { %p241_p9 = pnand %p6286_p7, %p240_p8 }
   0xe   : > { %244 = sbr.rel (%p241_p9) target bundleno = 1717 (0x6b5), region = 48 }
  0x15   : > { %v6290_v0 = vld [vmem:[%s9768_s1 + $0x4] sm:$0xf]  ;;  %vm563_vm0 = vcmask 1043456   ;;  %p272_p10 = scmp.lt.s32.totalorder %s8239_s28, 1  ;;  %v334_v2 = vld [vmem:[%s9768_s1] sm:$0xf] }
  0x16   : > { %7982 = vmatprep.subr.msk.bf16.mxu0 %vm563_vm0, %v6290_v0  ;;  %v565_v1 = vsel %vm563_vm0, %v6290_v0, 0  ;;  %vm408_vm1 = vsmask.f32 7424  ;;  %vm520_vm2 = vcmask 64512   ;;  %v745_v27 = vsel %vm563_vm0, %v334_v2, 0  ;;  %s6659_s23 = sshll.u32 %s8239_s28, 8 }
  0x17   : > { %6940 = vmatpush3.bf16.msra.mxu0 %v565_v1  ;;  %s273_s17 = scalar_select %p272_p10, %s8239_s28, 1  ;;  %v8317_v28 = vld [vmem:[%s9768_s1 + $0x8] sm:$0xf]  ;;  %vm898_vm3 = vcmask 1046528   ;;  %vm3213_vm4 = vcmask 261120   ;;  %vm3216_vm5 = vcmask 253952  }
  0x18   : > { %7983 = vmatprep.subr.msk.bf16.mxu0 %vm563_vm0, %v334_v2  ;;  %s9723_s9 = scalar_lea.hbm %s9774_s7, %s6659_s23  ;;  %s8175_s13 = smov [#allocation4]  }
  0x19   : > { %s6658_s18 = sshll.u32 %s273_s17, 7  ;;  %s8111_s14 = sshll.u32 %s8175_s13, 4  ;;  %s8112_s14 = int_to_ptr.vmem [resolvable:$false] %s8111_s14 }
  0x1a   : > { %s8280_s21 = scalar_lea.vmem %s9767_s0, %s6658_s18  ;;  %s269_s18 = sand.u32 1, %s8161_s25  }
  0x1b   : > { %v306_v3 = vld [vmem:[%s8280_s21] sm:$0xf]  ;;  %v8284_v4 = vld [vmem:[%s8280_s21 + $0x4] sm:$0xf]  ;;  %v8290_v6 = vld [vmem:[%s8280_s21 + $0x8] sm:$0xff]   ;;  %s6287_s19 = sshll.u32 %s269_s18, 4 }
  0x1c   : > { %v8287_v5 = vcombine.low %v306_v3, %v8284_v4  ;;  %v8293_v7 = vld [vmem:[%s8280_s21 + $0x10] sm:$0xff]   ;;  %v417_v10 = vshll.u32 %v8290_v6, 16  ;;  %v421_v11 = vshrl.u32 %v8290_v6, 16  ;;  %v8301_v13 = vld [vmem:[%s8280_s21 + $0x18] sm:$0xff]   ;;  %v8305_v15 = vld [vmem:[%s8280_s21 + $0x20] sm:$0xff]   ;;  %v900_v61 = vrot.slane %v8290_v6, 1 }
  0x1d   : > { %v425_v12 = vshll.u32 %v8293_v7, 16  ;;  %v429_v14 = vshrl.u32 %v8293_v7, 16  ;;  %v433_v19 = vshll.u32 %v8301_v13, 16  ;;  %v441_v22 = vshll.u32 %v8305_v15, 16  ;;  %v8310_v23 = vld [vmem:[%s8280_s21 + $0x28] sm:$0xff]   ;;  %v8326_v34 = vld [vmem:[%s8280_s21 + $0x30] sm:$0xff]  }
  0x1e   : > { %v410_v8 = vshrl.u32 %v8287_v5, 16  ;;  %v412_v9 = vshll.u32 %v8287_v5, 16  ;;  %v419_v17 = vrot.slane %v417_v10, 1  ;;  %v437_v26 = vshrl.u32 %v8301_v13, 16  ;;  %v8331_v37 = vld [vmem:[%s8280_s21 + $0x38] sm:$0xff]   ;;  %v8334_v40 = vld [vmem:[%s8280_s21 + $0x40] sm:$0xff]  }
  0x1f   : > { %v427_v18 = vrot.slane %v425_v12, 1  ;;  %v435_v25 = vrot.slane %v433_v19, 1  ;;  %v445_v31 = vshrl.u32 %v8305_v15, 16  ;;  %v449_v32 = vshll.u32 %v8310_v23, 16  ;;  %v8340_v42 = vld [vmem:[%s8280_s21 + $0x48] sm:$0xff]   ;;  %v8353_v53 = vld [vmem:[%s8280_s21 + $0x50] sm:$0xff]  }
  0x20   : > { %v414_v16 = vrot.slane %v412_v9, 1  ;;  %v423_v21 = vor.u32 %v421_v11, %v419_v17  ;;  %v443_v35 = vrot.slane %v441_v22, 1  ;;  %v457_v41 = vshll.u32 %v8326_v34, 16  ;;  %v892_v51 = vld [vmem:[%s8280_s21] sm:$0xe]  ;;  %v8358_v56 = vld [vmem:[%s8280_s21 + $0x58] sm:$0xff]  }
  0x21   : > { %v431_v24 = vor.u32 %v429_v14, %v427_v18  ;;  %v439_v36 = vor.u32 %v437_v26, %v435_v25  ;;  %v451_v39 = vrot.slane %v449_v32, 1  ;;  %v453_v44 = vshrl.u32 %v8310_v23, 16  ;;  %v8369_v9 = vld [vmem:[%s8280_s21 + $0x60] sm:$0xff]   ;;  %v332_v14 = vld [vmem:[%s8280_s21 + $0x68] sm:$0xf]  ;;  %s271_s20 = scalar_lea.vmem [#allocation4], %s6287_s19 }
  0x22   : > { %v415_v20 = vor.u32 %v414_v16, %v410_v8  ;;  %v428_v30 = vsel %vm408_vm1, %v423_v21, %v427_v18  ;;  %v447_v38 = vor.u32 %v445_v31, %v443_v35  ;;  %v461_v46 = vshrl.u32 %v8326_v34, 16  ;;  %v335_v18 = vld [vmem:[%s8280_s21 + $0x6c] sm:$0xf]  ;;  %s6221_s22 = sshll.u32 %s271_s20, 4  ;;  %s8113_s15 = scalar_lea.vmem %s8112_s14, 512  ;;  %s9718_s22 = int_to_ptr.vmem [resolvable:$true] %s6221_s22 }
  0x23   : > { %v436_v33 = vsel %vm408_vm1, %v431_v24, %v435_v25  ;;  %v444_v43 = vsel %vm408_vm1, %v439_v36, %v443_v35  ;;  %v465_v47 = vshll.u32 %v8331_v37, 16  ;;  %v473_v48 = vshll.u32 %v8334_v40, 16  ;;  %s8107_s28 = scalar_lea.vmem %s9718_s22, 256  ;;  %p8114_p0 = scmp.lt.s32.totalorder %s9718_s22, %s8112_s14 }
  0x24   : > { %v420_v29 = vsel %vm408_vm1, %v415_v20, %v419_v17  ;;  %v452_v45 = vsel %vm408_vm1, %v447_v38, %v451_v39  ;;  %v459_v49 = vrot.slane %v457_v41, 1  ;;  %v469_v50 = vshrl.u32 %v8331_v37, 16  ;;  %p8108_p11 = scmp.ne.s32.totalorder %s9718_s22, %s8107_s28  ;;  %p8115_p1 = scmp.lt.s32.totalorder %s8113_s15, %s8107_s28 }
  0x25   : > { %6941 = vmatprep.mubr.msk.bf16.mxu0 %vm520_vm2, %v420_v29  ;;  %v481_v52 = vshll.u32 %v8340_v42, 16  ;;  %v455_v54 = vor.u32 %v453_v44, %v451_v39  ;;  %v477_v55 = vshrl.u32 %v8334_v40, 16  ;;  %v6335_v57 = vcombine.low %v892_v51, %v8284_v4 }
  0x26   : > { %6942 = vmatmul.mubr.msk.bf16.vlgmr.msra.gmra.mrb[0].mxu0 %vm520_vm2, %v428_v30  ;;  %v463_v58 = vor.u32 %v461_v46, %v459_v49  ;;  %v467_v59 = vrot.slane %v465_v47, 1  ;;  %v475_v60 = vrot.slane %v473_v48, 1  ;;  %v902_v63 = vrot.slane %v8293_v7, 1  ;;  %v6350_v47 = vld [vmem:[%s9768_s1 + $0xc] sm:$0xf]  ;;  %p8109_p12 = pnand %p8108_p11, %p8256_p5  ;;  %p8116_p2 = por %p8115_p1, %p8114_p0 }
  0x27   : > { %6945 = vmatprep.mubr.msk.bf16.mxu0 %vm520_vm2, %v436_v33  ;;  %6970 = vmatpush3.bf16.msra.mxu0 %v745_v27  ;;  %v899_v62 = vrot.slane %v6335_v57, 1  ;;  %v483_v0 = vrot.slane %v481_v52, 1  ;;  %v485_v1 = vshrl.u32 %v8340_v42, 16  ;;  %v489_v2 = vshll.u32 %v8353_v53, 16 }
  0x28   : > { %7984 = vmatprep.subr.msk.bf16.mxu0 %vm563_vm0, %v8317_v28  ;;  %v493_v3 = vshrl.u32 %v8353_v53, 16  ;;  %v460_v8 = vsel %vm408_vm1, %v455_v54, %v459_v49  ;;  %v497_v4 = vshll.u32 %v8358_v56, 16  ;;  %v903_v11 = vsel %vm898_vm3, %v900_v61, %v902_v63  ;;  %p8110_p13 = pneg %p8109_p12 }
  0x29   : > { %v901_v10 = vsel %vm898_vm3, %v899_v62, %v900_v61  ;;  %v468_v12 = vsel %vm408_vm1, %v463_v58, %v467_v59  ;;  %v491_v16 = vrot.slane %v489_v2, 1  ;;  %v501_v17 = vshrl.u32 %v8358_v56, 16  ;;  %v8484_v2 = vld [vmem:[%s8280_s21 + $0x10] sm:$0xff]  }
  0x2a   : > { %v471_v19 = vor.u32 %v469_v50, %v467_v59  ;;  %v499_v20 = vrot.slane %v497_v4, 1  ;;  %v505_v21 = vshll.u32 %v8369_v9, 16  ;;  %v479_v22 = vor.u32 %v477_v55, %v475_v60  ;;  %v6379_v50 = vld [vmem:[%s9768_s1 + $0x10] sm:$0xf]  ;;  %v6395_v4 = vld [vmem:[%s9768_s1 + $0x14] sm:$0xf]  ;;  %p8117_p3 = pnand %p8116_p2, %p8110_p13 }
  0x2b   : > { %v8382_v24 = vcombine.low %v332_v14, %v335_v18  ;;  %v509_v27 = vshrl.u32 %v8369_v9, 16  ;;  %v487_v30 = vor.u32 %v485_v1, %v483_v0  ;;  %v495_v31 = vor.u32 %v493_v3, %v491_v16  ;;  %v8487_v3 = vld [vmem:[%s8280_s21 + $0x18] sm:$0xff]  }
  0x2c   : > { %v476_v25 = vsel %vm408_vm1, %v471_v19, %v475_v60  ;;  %v484_v26 = vsel %vm408_vm1, %v479_v22, %v483_v0  ;;  %v507_v35 = vrot.slane %v505_v21, 1  ;;  %v503_v36 = vor.u32 %v501_v17, %v499_v20  ;;  %v8478_v0 = vld [vmem:[%s8280_s21 + $0xc] sm:$0xf]  ;;  %v8529_v17 = vld [vmem:[%s8280_s21 + $0x50] sm:$0xff]   ;;  %v8532_v18 = vld [vmem:[%s8280_s21 + $0x58] sm:$0xff]  }
  0x2d   : > { %v513_v29 = vshll.u32 %v8382_v24, 16  ;;  %v492_v32 = vsel %vm408_vm1, %v487_v30, %v491_v16  ;;  %v500_v33 = vsel %vm408_vm1, %v495_v31, %v499_v20  ;;  %v517_v44 = vshrl.u32 %v8382_v24, 16  ;;  %v8522_v16 = vld [vmem:[%s8280_s21 + $0x48] sm:$0xff]   ;;  %v8539_v20 = vld [vmem:[%s8280_s21 + $0x60] sm:$0xff]  }
  0x2e   : > { %6946 = vmatmul.mubr.msk.bf16.gmra.mrb[4].mxu0 %vm520_vm2, %v444_v43  ;;  %v511_v39 = vor.u32 %v509_v27, %v507_v35  ;;  %v508_v41 = vsel %vm408_vm1, %v503_v36, %v507_v35  ;;  %v969_v46 = vsel %vm563_vm0, %v8317_v28, 0  ;;  %v904_v28 = vrot.slane %v8301_v13, 1  ;;  %v8542_v21 = vld [vmem:[%s8280_s21 + $0x68] sm:$0xff]   ;;  %v1171_v27 = vld [vmem:[%s8280_s21 + $0x74] sm:$0x7] }
  0x2f   : > { %6949 = vmatprep.mubr.msk.bf16.mxu0 %vm520_vm2, %v452_v45  ;;  %v515_v38 = vrot.slane %v513_v29, 1  ;;  %v1287_v49 = vsel %vm563_vm0, %v6350_v47, 0  ;;  %v906_v51 = vrot.slane %v8305_v15, 1  ;;  %v908_v52 = vrot.slane %v8310_v23, 1 }
  0x30   : > { %v905_v48 = vsel %vm898_vm3, %v902_v63, %v904_v28  ;;  %v910_v54 = vrot.slane %v8326_v34, 1  ;;  %v912_v55 = vrot.slane %v8331_v37, 1  ;;  %v916_v58 = vrot.slane %v8340_v42, 1 }
  0x31   : > { %v516_v43 = vsel %vm408_vm1, %v511_v39, %v515_v38  ;;  %v519_v45 = vor.u32 %v517_v44, %v515_v38  ;;  %v924_v62 = vrot.slane %v8382_v24, 1  ;;  %v1485_v36 = vshrl.u32 %v8487_v3, 16 }
  0x32   : > { %v911_v57 = vsel %vm898_vm3, %v908_v52, %v910_v54 }
  0x36   : > { %6950 = vmatmul.mubr.msk.bf16.gmra.mrb[8].mxu0 %vm520_vm2, %v460_v8  ;;  %v1609_v8 = vsel %vm563_vm0, %v6379_v50, 0 }
  0x37   : > { %6953 = vmatprep.mubr.msk.bf16.mxu0 %vm520_vm2, %v468_v12  ;;  %v8512_v12 = vld [vmem:[%s8280_s21 + $0x38] sm:$0xff]  }
  0x3e   : > { %6954 = vmatmul.mubr.msk.bf16.gmra.mrb[12].mxu0 %vm520_vm2, %v476_v25  ;;  %v1474_v25 = vshll.u32 %v8484_v2, 16 }
  0x3f   : > { %6957 = vmatprep.mubr.msk.bf16.mxu0 %vm520_vm2, %v484_v26  ;;  %v8550_v26 = vld [vmem:[%s8280_s21 + $0x70] sm:$0xf] }
  0x40   : > { %v1476_v30 = vrot.slane %v1474_v25, 1  ;;  %v6364_v31 = vcombine.low %v8550_v26, %v1171_v27  ;;  %v1541_v25 = vshrl.u32 %v8532_v18, 16  ;;  %v1544_v27 = vshll.u32 %v8539_v20, 16 }
  0x46   : > { %6958 = vmatmul.mubr.msk.bf16.gmra.mrb[16].mxu0 %vm520_vm2, %v492_v32  ;;  %v1481_v32 = vshll.u32 %v8487_v3, 16 }
  0x47   : > { %6961 = vmatprep.mubr.msk.bf16.mxu0 %vm520_vm2, %v500_v33  ;;  %v1478_v33 = vshrl.u32 %v8484_v2, 16 }
  0x48   : > { %v1483_v39 = vrot.slane %v1481_v32, 1 }
  0x4e   : > { %6962 = vmatmul.mubr.msk.bf16.gmra.mrb[20].mxu0 %vm520_vm2, %v508_v41  ;;  %v1480_v41 = vor.u32 %v1478_v33, %v1476_v30 }
  0x4f   : > { %6965 = vmatprep.mubr.msk.bf16.mxu0 %vm520_vm2, %v516_v43  ;;  %v1487_v43 = vor.u32 %v1485_v36, %v1483_v39  ;;  %v1551_v36 = vshll.u32 %v8542_v21, 16 }
  0x56   : > { %6966 = vmatmul.mubr.msk.bf16.gmra.mrb[24].mxu0 %vm520_vm2, %v519_v45 }
  0x57   : > { %6971 = vmatprep.mubr.msk.bf16.mxu0 %vm520_vm2, %v8287_v5  ;;  %v333_v5 = vld [vmem:[%s8280_s21 + $0x6c] sm:$0x7] }
  0x5e   : > { %6972 = vmatmul.mubr.msk.bf16.vlgmr.msra.gmra.mrb[0].mxu0 %vm520_vm2, %v8290_v6  ;;  %v6319_v6 = vcombine.low %v332_v14, %v333_v5  ;;  %v8519_v14 = vld [vmem:[%s8280_s21 + $0x40] sm:$0xff]  }
  0x5f   : > { %6975 = vmatprep.mubr.msk.bf16.mxu0 %vm520_vm2, %v8293_v7  ;;  %7000 = vmatpush3.bf16.msra.mxu0 %v969_v46  ;;  %v907_v7 = vsel %vm898_vm3, %v904_v28, %v906_v51  ;;  %v1484_v46 = vsel %vm408_vm1, %v1480_v41, %v1483_v39  ;;  %v1548_v39 = vshrl.u32 %v8539_v20, 16 }
  0x60   : > { %7985 = vmatprep.subr.msk.bf16.mxu0 %vm563_vm0, %v6350_v47 }
  0x66   : > { %6976 = vmatmul.mubr.msk.bf16.gmra.mrb[4].mxu0 %vm520_vm2, %v8301_v13  ;;  %v909_v13 = vsel %vm898_vm3, %v906_v51, %v908_v52 }
  0x67   : > { %6979 = vmatprep.mubr.msk.bf16.mxu0 %vm520_vm2, %v8305_v15  ;;  %v913_v15 = vsel %vm898_vm3, %v910_v54, %v912_v55 }
  0x6e   : > { %6980 = vmatmul.mubr.msk.bf16.gmra.mrb[8].mxu0 %vm520_vm2, %v8310_v23  ;;  %v914_v23 = vrot.slane %v8334_v40, 1 }
  0x6f   : > { %6983 = vmatprep.mubr.msk.bf16.mxu0 %vm520_vm2, %v8326_v34  ;;  %v918_v34 = vrot.slane %v8353_v53, 1 }
  0x70   : > { %v915_v59 = vsel %vm898_vm3, %v912_v55, %v914_v23  ;;  %v917_v60 = vsel %vm898_vm3, %v914_v23, %v916_v58  ;;  %v1516_v23 = vshll.u32 %v8519_v14, 16 }
  0x71   : > { %v919_v61 = vsel %vm898_vm3, %v916_v58, %v918_v34 }
  0x76   : > { %6984 = vmatmul.mubr.msk.bf16.gmra.mrb[12].mxu0 %vm520_vm2, %v8331_v37  ;;  %v920_v37 = vrot.slane %v8358_v56, 1 }
  0x77   : > { %6987 = vmatprep.mubr.msk.bf16.mxu0 %vm520_vm2, %v8334_v40 }
  0x78   : > { %v921_v40 = vsel %vm898_vm3, %v918_v34, %v920_v37  ;;  %v1518_v34 = vrot.slane %v1516_v23, 1 }
  0x7e   : > { %6988 = vmatmul.mubr.msk.bf16.gmra.mrb[16].mxu0 %vm520_vm2, %v8340_v42  ;;  %v922_v42 = vrot.slane %v8369_v9, 1 }
  0x7f   : > { %6991 = vmatprep.mubr.msk.bf16.mxu0 %vm520_vm2, %v8353_v53 }
  0x80   : > { %v923_v63 = vsel %vm898_vm3, %v920_v37, %v922_v42  ;;  %v925_v53 = vsel %vm898_vm3, %v922_v42, %v924_v62  ;;  %v1523_v37 = vshll.u32 %v8522_v16, 16 }
  0x86   : > { %6992 = vmatmul.mubr.msk.bf16.gmra.mrb[20].mxu0 %vm520_vm2, %v8358_v56  ;;  %v1144_v56 = vld [vmem:[%s8280_s21 + $0x8] sm:$0xf] }
  0x87   : > { %6995 = vmatprep.mubr.msk.bf16.mxu0 %vm520_vm2, %v8369_v9  ;;  %v6351_v1 = vcombine.low %v1144_v56, %v8478_v0  ;;  %v8499_v9 = vld [vmem:[%s8280_s21 + $0x20] sm:$0xff]  }
  0x88   : > { %v1488_v38 = vshll.u32 %v8499_v9, 16  ;;  %v1492_v47 = vshrl.u32 %v8499_v9, 16 }
  0x89   : > { %v1470_v19 = vshll.u32 %v6351_v1, 16  ;;  %v1468_v22 = vshrl.u32 %v6351_v1, 16 }
  0x8a   : > { %v1490_v44 = vrot.slane %v1488_v38, 1 }
  0x8b   : > { %v1472_v24 = vrot.slane %v1470_v19, 1 }
  0x8c   : > { %v1491_v5 = vsel %vm408_vm1, %v1487_v43, %v1490_v44  ;;  %v1494_v51 = vor.u32 %v1492_v47, %v1490_v44  ;;  %v1555_v43 = vshrl.u32 %v8542_v21, 16 }
  0x8d   : > { %v1473_v29 = vor.u32 %v1472_v24, %v1468_v22  ;;  %v1534_v22 = vshrl.u32 %v8529_v17, 16 }
  0x8e   : > { %6996 = vmatmul.mubr.msk.bf16.gmra.mrb[24].mxu0 %vm520_vm2, %v6319_v6  ;;  %v1860_v6 = vsel %vm563_vm0, %v6395_v4, 0 }
  0x8f   : > { %7001 = vmatprep.mubr.msk.bf16.mxu0 %vm520_vm2, %v901_v10  ;;  %v8502_v10 = vld [vmem:[%s8280_s21 + $0x28] sm:$0xff]   ;;  %v1477_v35 = vsel %vm408_vm1, %v1473_v29, %v1476_v30  ;;  %v1462_v29 = vld [vmem:[%s8280_s21 + $0x74] sm:$0xf] }
  0x90   : > { %v1495_v45 = vshll.u32 %v8502_v10, 16  ;;  %v1499_v28 = vshrl.u32 %v8502_v10, 16  ;;  %v8603_v32 = vcombine.low %v8550_v26, %v1462_v29  ;;  %v1797_v23 = vrot.slane %v8502_v10, 1  ;;  %v280_v29 = vld [vmem:[%s9772_s5 + $0x10] sm:$0xff] }
  0x92   : > { %v1559_v44 = vshll.u32 %v8603_v32, 16 }
  0x94   : > { %v1561_v47 = vrot.slane %v1559_v44, 1  ;;  %v286_v44 = vld [vmem:[%s9772_s5 + $0x40] sm:$0xff] }
  0x96   : > { %7002 = vmatmul.mubr.msk.bf16.vlgmr.msra.gmra.mrb[0].mxu0 %vm520_vm2, %v903_v11  ;;  %v8509_v11 = vld [vmem:[%s8280_s21 + $0x30] sm:$0xff]  }
  0x97   : > { %7005 = vmatprep.mubr.msk.bf16.mxu0 %vm520_vm2, %v905_v48  ;;  %7030 = vmatpush3.bf16.msra.mxu0 %v1287_v49  ;;  %v1502_v48 = vshll.u32 %v8509_v11, 16  ;;  %v8571_v49 = vld [vmem:[%s9768_s1 + $0x18] sm:$0xf]  ;;  %v1506_v55 = vshrl.u32 %v8509_v11, 16 }
  0x98   : > { %7986 = vmatprep.subr.msk.bf16.mxu0 %vm563_vm0, %v6379_v50  ;;  %v1497_v50 = vrot.slane %v1495_v45, 1  ;;  %v1553_v45 = vrot.slane %v1551_v36, 1  ;;  %v283_v36 = vld [vmem:[%s9772_s5 + $0x28] sm:$0xff] }
  0x9a   : > { %v1501_v52 = vor.u32 %v1499_v28, %v1497_v50  ;;  %v1498_v54 = vsel %vm408_vm1, %v1494_v51, %v1497_v50  ;;  %v1563_v50 = vshrl.u32 %v8603_v32, 16 }
  0x9e   : > { %7006 = vmatmul.mubr.msk.bf16.gmra.mrb[4].mxu0 %vm520_vm2, %v907_v7  ;;  %v1504_v7 = vrot.slane %v1502_v48, 1 }
  0x9f   : > { %7009 = vmatprep.mubr.msk.bf16.mxu0 %vm520_vm2, %v909_v13  ;;  %v1509_v13 = vshll.u32 %v8512_v12, 16 }
  0xa1   : > { %v1511_v58 = vrot.slane %v1509_v13, 1 }
  0xa6   : > { %7010 = vmatmul.mubr.msk.bf16.gmra.mrb[8].mxu0 %vm520_vm2, %v911_v57  ;;  %v1505_v57 = vsel %vm408_vm1, %v1501_v52, %v1504_v7  ;;  %v1791_v52 = vrot.slane %v8484_v2, 1 }
  0xa7   : > { %7013 = vmatprep.mubr.msk.bf16.mxu0 %vm520_vm2, %v913_v15  ;;  %v1513_v15 = vshrl.u32 %v8512_v12, 16 }
  0xae   : > { %7014 = vmatmul.mubr.msk.bf16.gmra.mrb[12].mxu0 %vm520_vm2, %v915_v59  ;;  %v1508_v59 = vor.u32 %v1506_v55, %v1504_v7  ;;  %v1565_v7 = vor.u32 %v1563_v50, %v1561_v47  ;;  %v289_v50 = vld [vmem:[%s9772_s5 + $0x58] sm:$0xff] }
  0xaf   : > { %7017 = vmatprep.mubr.msk.bf16.mxu0 %vm520_vm2, %v917_v60  ;;  %v1515_v60 = vor.u32 %v1513_v15, %v1511_v58  ;;  %v2178_v15 = vsel %vm563_vm0, %v8571_v49, 0 }
  0xb1   : > { %v1519_v42 = vsel %vm408_vm1, %v1515_v60, %v1518_v34 }
  0xb6   : > { %7018 = vmatmul.mubr.msk.bf16.gmra.mrb[16].mxu0 %vm520_vm2, %v919_v61  ;;  %v1512_v61 = vsel %vm408_vm1, %v1508_v59, %v1511_v58  ;;  %v1803_v59 = vrot.slane %v8519_v14, 1 }
  0xb7   : > { %7021 = vmatprep.mubr.msk.bf16.mxu0 %vm520_vm2, %v921_v40  ;;  %v1520_v40 = vshrl.u32 %v8519_v14, 16 }
  0xb9   : > { %v1522_v56 = vor.u32 %v1520_v40, %v1518_v34  ;;  %v1807_v34 = vrot.slane %v8529_v17, 1 }
  0xbe   : > { %7022 = vmatmul.mubr.msk.bf16.gmra.mrb[20].mxu0 %vm520_vm2, %v923_v63  ;;  %v1530_v63 = vshll.u32 %v8529_v17, 16 }
  0xbf   : > { %7025 = vmatprep.mubr.msk.bf16.mxu0 %vm520_vm2, %v925_v53  ;;  %v1525_v53 = vrot.slane %v1523_v37, 1 }
  0xc1   : > { %v1526_v19 = vsel %vm408_vm1, %v1522_v56, %v1525_v53  ;;  %v8680_v56 = vld [vmem:[%s8280_s21 + $0x20] sm:$0xff]  }
  0xc6   : > { %7026 = vmatmul.mubr.msk.bf16.gmra.mrb[24].mxu0 %vm520_vm2, %v924_v62  ;;  %v1527_v62 = vshrl.u32 %v8522_v16, 16 }
  0xc7   : > { %7031 = vmatprep.mubr.msk.bf16.mxu0 %vm520_vm2, %v6351_v1 }
  0xc8   : > { %v1529_v1 = vor.u32 %v1527_v62, %v1525_v53 }
  0xce   : > { %7032 = vmatmul.mubr.msk.bf16.vlgmr.msra.gmra.mrb[0].mxu0 %vm520_vm2, %v8484_v2  ;;  %v6440_v2 = vld [vmem:[%s9768_s1 + $0x1c] sm:$0xf] }
  0xcf   : > { %7035 = vmatprep.mubr.msk.bf16.mxu0 %vm520_vm2, %v8487_v3  ;;  %7060 = vmatpush3.bf16.msra.mxu0 %v1609_v8  ;;  %v1532_v8 = vrot.slane %v1530_v63, 1  ;;  %v8668_v63 = vld [vmem:[%s8280_s21 + $0x14] sm:$0xf] }
  0xd0   : > { %7987 = vmatprep.subr.msk.bf16.mxu0 %vm563_vm0, %v6395_v4  ;;  %v1537_v4 = vshll.u32 %v8532_v18, 16 }
  0xd1   : > { %v1533_v24 = vsel %vm408_vm1, %v1529_v1, %v1532_v8  ;;  %v2500_v1 = vsel %vm563_vm0, %v6440_v2, 0 }
  0xd2   : > { %v1539_v30 = vrot.slane %v1537_v4, 1  ;;  %v8695_v4 = vld [vmem:[%s8280_s21 + $0x28] sm:$0xff]  }
  0xd4   : > { %v1543_v33 = vor.u32 %v1541_v25, %v1539_v30  ;;  %v278_v25 = vld [vmem:[%s9772_s5] sm:$0xff] }
  0xd6   : > { %7036 = vmatmul.mubr.msk.bf16.gmra.mrb[4].mxu0 %vm520_vm2, %v8499_v9 }
  0xd7   : > { %7039 = vmatprep.mubr.msk.bf16.mxu0 %vm520_vm2, %v8502_v10 }
  0xde   : > { %7040 = vmatmul.mubr.msk.bf16.gmra.mrb[8].mxu0 %vm520_vm2, %v8509_v11 }
  0xdf   : > { %7043 = vmatprep.mubr.msk.bf16.mxu0 %vm520_vm2, %v8512_v12 }
  0xe6   : > { %7044 = vmatmul.mubr.msk.bf16.gmra.mrb[12].mxu0 %vm520_vm2, %v8519_v14  ;;  %v1811_v14 = vrot.slane %v8539_v20, 1 }
  0xe7   : > { %7047 = vmatprep.mubr.msk.bf16.mxu0 %vm520_vm2, %v8522_v16 }
  0xee   : > { %7048 = vmatmul.mubr.msk.bf16.gmra.mrb[16].mxu0 %vm520_vm2, %v8529_v17  ;;  %v1813_v17 = vrot.slane %v8542_v21, 1 }
  0xef   : > { %7051 = vmatprep.mubr.msk.bf16.mxu0 %vm520_vm2, %v8532_v18 }
  0xf0   : > { %v1814_v62 = vsel %vm898_vm3, %v1811_v14, %v1813_v17 }
  0xf6   : > { %7052 = vmatmul.mubr.msk.bf16.gmra.mrb[20].mxu0 %vm520_vm2, %v8539_v20  ;;  %v2035_v20 = vld [vmem:[%s8280_s21 + $0x10] sm:$0xf] }
  0xf7   : > { %7055 = vmatprep.mubr.msk.bf16.mxu0 %vm520_vm2, %v8542_v21  ;;  %v8671_v53 = vcombine.low %v2035_v20, %v8668_v63  ;;  %v8677_v21 = vld [vmem:[%s8280_s21 + $0x18] sm:$0xff]  }
  0xfe   : > { %7056 = vmatmul.mubr.msk.bf16.gmra.mrb[24].mxu0 %vm520_vm2, %v6364_v31  ;;  %v1536_v31 = vor.u32 %v1534_v22, %v1532_v8  ;;  %v8686_v8 = vld [vmem:[%s9768_s1 + $0x20] sm:$0xf]  ;;  %v8705_v22 = vld [vmem:[%s8280_s21 + $0x38] sm:$0xff]  }
  0xff   : > { %7061 = vmatprep.mubr.msk.bf16.mxu0 %vm520_vm2, %v1477_v35  ;;  %v1546_v35 = vrot.slane %v1544_v27, 1  ;;  %v8171_v27 = vmov 0  }
 0x100   : > { %v1540_v38 = vsel %vm408_vm1, %v1536_v31, %v1539_v30  ;;  %8036 = vset.pattern.permute.xlu0 %v8171_v27  ;;  %8037 = vset.pattern.permute.xlu1 %v8171_v27  ;;  %v279_v30 = vld [vmem:[%s9772_s5 + $0x8] sm:$0xff]  ;;  %v300_v27 = vld [vmem:[%s9772_s5 + $0xb0] sm:$0xff] }
 0x101   : > { %v1547_v41 = vsel %vm408_vm1, %v1543_v33, %v1546_v35  ;;  %v1550_v26 = vor.u32 %v1548_v39, %v1546_v35  ;;  %3047 = vperm.xlu0 %8036, %v278_v25   ;;  %3057 = vperm.xlu1 %8037, %v280_v29   ;;  %v8724_v31 = vld [vmem:[%s8280_s21 + $0x48] sm:$0xff]   ;;  %v281_v33 = vld [vmem:[%s9772_s5 + $0x18] sm:$0xff]  ;;  %v282_v35 = vld [vmem:[%s9772_s5 + $0x20] sm:$0xff] }
 0x102   : > { %v8746_v39 = vld [vmem:[%s8280_s21 + $0x58] sm:$0xff]   ;;  %v299_v25 = vld [vmem:[%s9772_s5 + $0xa8] sm:$0xff] }
 0x105   : > { %3052 = vperm.xlu0 %8036, %v279_v30   ;;  %3062 = vperm.xlu1 %8037, %v281_v33   ;;  %v2397_v33 = vshrl.u32 %v8705_v22, 16 }
 0x106   : > { %7062 = vmatmul.mubr.msk.bf16.vlgmr.msra.gmra.mrb[0].mxu0 %vm520_vm2, %v1484_v46  ;;  %v1557_v46 = vor.u32 %v1555_v43, %v1553_v45  ;;  %v285_v43 = vld [vmem:[%s9772_s5 + $0x38] sm:$0xff] }
 0x107   : > { %7065 = vmatprep.mubr.msk.bf16.mxu0 %vm520_vm2, %v1491_v5  ;;  %7090 = vmatpush3.bf16.msra.mxu0 %v1860_v6  ;;  %v1784_v5 = vld [vmem:[%s8280_s21 + $0x8] sm:$0xe]  ;;  %v1554_v6 = vsel %vm408_vm1, %v1550_v26, %v1553_v45  ;;  %v2361_v45 = vshll.u32 %v8671_v53, 16 }
 0x108   : > { %7988 = vmatprep.subr.msk.bf16.mxu0 %vm563_vm0, %v8571_v49  ;;  %v1562_v28 = vsel %vm408_vm1, %v1557_v46, %v1561_v47  ;;  %v6396_v48 = vcombine.low %v1784_v5, %v8478_v0  ;;  %v1795_v0 = vrot.slane %v8499_v9, 1  ;;  %v1801_v49 = vrot.slane %v8512_v12, 1  ;;  %v287_v26 = vld [vmem:[%s9772_s5 + $0x48] sm:$0xff]  ;;  %v288_v46 = vld [vmem:[%s9772_s5 + $0x50] sm:$0xff] }
 0x109   : > { %v1809_v12 = vrot.slane %v8532_v18, 1  ;;  %3067 = vperm.xlu0 %8036, %v282_v35   ;;  %3072 = vperm.xlu1 %8037, %v283_v36   ;;  %v8769_v47 = vld [vmem:[%s8280_s21 + $0x68] sm:$0xff]   ;;  %v8772_v5 = vld [vmem:[%s8280_s21 + $0x70] sm:$0xff]  }
 0x10a   : > { %v1790_v51 = vrot.slane %v6396_v48, 1  ;;  %v1798_v9 = vsel %vm898_vm3, %v1795_v0, %v1797_v23  ;;  %v1804_v10 = vsel %vm898_vm3, %v1801_v49, %v1803_v59  ;;  %v2365_v48 = vshll.u32 %v8677_v21, 16 }
 0x10b   : > { %v1810_v40 = vsel %vm898_vm3, %v1807_v34, %v1809_v12 }
 0x10c   : > { %v1792_v13 = vsel %vm898_vm3, %v1790_v51, %v1791_v52  ;;  %v290_v51 = vld [vmem:[%s9772_s5 + $0x60] sm:$0xff] }
 0x10d   : > { %3082 = vperm.xlu1 %8037, %v285_v43   ;;  %v301_v43 = vld [vmem:[%s9772_s5 + $0xb8] sm:$0xff] }
 0x10e   : > { %7066 = vmatmul.mubr.msk.bf16.gmra.mrb[4].mxu0 %vm520_vm2, %v1498_v54  ;;  %v1793_v54 = vrot.slane %v8487_v3, 1  ;;  %v1799_v3 = vrot.slane %v8509_v11, 1  ;;  %v1805_v11 = vrot.slane %v8522_v16, 1  ;;  %v1812_v16 = vsel %vm898_vm3, %v1809_v12, %v1811_v14 }
 0x10f   : > { %7069 = vmatprep.mubr.msk.bf16.mxu0 %vm520_vm2, %v1505_v57  ;;  %v2383_v14 = vshrl.u32 %v8695_v4, 16 }
 0x110   : > { %v1794_v55 = vsel %vm898_vm3, %v1791_v52, %v1793_v54  ;;  %v1796_v57 = vsel %vm898_vm3, %v1793_v54, %v1795_v0  ;;  %v1800_v58 = vsel %vm898_vm3, %v1797_v23, %v1799_v3  ;;  %v1802_v60 = vsel %vm898_vm3, %v1799_v3, %v1801_v49  ;;  %v8787_v52 = vld [vmem:[%s8280_s21 + $0x78] sm:$0xf]  ;;  %v291_v0 = vld [vmem:[%s9772_s5 + $0x68] sm:$0xff]  ;;  %v294_v49 = vld [vmem:[%s9772_s5 + $0x80] sm:$0xff] }
 0x111   : > { %v1806_v37 = vsel %vm898_vm3, %v1803_v59, %v1805_v11  ;;  %3092 = vperm.xlu1 %8037, %v287_v26   ;;  %v2367_v54 = vrot.slane %v2365_v48, 1  ;;  %v2376_v3 = vshrl.u32 %v8680_v56, 16  ;;  %v304_v48 = vld [vmem:[%s9772_s5 + $0xd0] sm:$0xff] }
 0x115   : > { %3102 = vperm.xlu1 %8037, %v289_v50  }
 0x116   : > { %7070 = vmatmul.mubr.msk.bf16.gmra.mrb[8].mxu0 %vm520_vm2, %v1512_v61  ;;  %v1808_v61 = vsel %vm898_vm3, %v1805_v11, %v1807_v34  ;;  %v295_v34 = vld [vmem:[%s9772_s5 + $0x88] sm:$0xff] }
 0x117   : > { %7073 = vmatprep.mubr.msk.bf16.mxu0 %vm520_vm2, %v1519_v42  ;;  %v1815_v42 = vrot.slane %v8603_v32, 1  ;;  %v8727_v32 = vld [vmem:[%s8280_s21 + $0x50] sm:$0xff]  }
 0x118   : > { %v2414_v50 = vshll.u32 %v8727_v32, 16 }
 0x119   : > { %v1816_v18 = vsel %vm898_vm3, %v1813_v17, %v1815_v42  ;;  %3112 = vperm.xlu1 %8037, %v291_v0   ;;  %v2421_v0 = vshll.u32 %v8746_v39, 16 }
 0x11e   : > { %7074 = vmatmul.mubr.msk.bf16.gmra.mrb[12].mxu0 %vm520_vm2, %v1526_v19  ;;  %v8698_v19 = vld [vmem:[%s8280_s21 + $0x30] sm:$0xff]  }
 0x11f   : > { %7077 = vmatprep.mubr.msk.bf16.mxu0 %vm520_vm2, %v1533_v24  ;;  %v8708_v24 = vld [vmem:[%s8280_s21 + $0x40] sm:$0xff]   ;;  %v2390_v17 = vshrl.u32 %v8698_v19, 16 }
 0x120   : > { %v2400_v29 = vshll.u32 %v8708_v24, 16  ;;  %v2404_v36 = vshrl.u32 %v8708_v24, 16 }
 0x126   : > { %7078 = vmatmul.mubr.msk.bf16.gmra.mrb[16].mxu0 %vm520_vm2, %v1540_v38  ;;  %v284_v38 = vld [vmem:[%s9772_s5 + $0x30] sm:$0xff] }
 0x127   : > { %7081 = vmatprep.mubr.msk.bf16.mxu0 %vm520_vm2, %v1547_v41  ;;  %v8749_v41 = vld [vmem:[%s8280_s21 + $0x60] sm:$0xff]   ;;  %3077 = vperm.xlu0 %8036, %v284_v38   ;;  %v2407_v38 = vshll.u32 %v8724_v31, 16 }
 0x12b   : > { %3087 = vperm.xlu0 %8036, %v286_v44   ;;  %v302_v44 = vld [vmem:[%s9772_s5 + $0xc0] sm:$0xff] }
 0x12e   : > { %7082 = vmatmul.mubr.msk.bf16.gmra.mrb[20].mxu0 %vm520_vm2, %v1554_v6  ;;  %v2359_v6 = vshrl.u32 %v8671_v53, 16 }
 0x12f   : > { %7085 = vmatprep.mubr.msk.bf16.mxu0 %vm520_vm2, %v1562_v28  ;;  %v2363_v28 = vrot.slane %v2361_v45, 1  ;;  %3097 = vperm.xlu0 %8036, %v288_v46   ;;  %v2402_v45 = vrot.slane %v2400_v29, 1 }
 0x131   : > { %v2406_v46 = vor.u32 %v2404_v36, %v2402_v45 }
 0x133   : > { %3107 = vperm.xlu0 %8036, %v290_v51  }
 0x136   : > { %7086 = vmatmul.mubr.msk.bf16.gmra.mrb[24].mxu0 %vm520_vm2, %v1565_v7  ;;  %v2062_v7 = vld [vmem:[%s8280_s21 + $0x7c] sm:$0x7] }
 0x137   : > { %7091 = vmatprep.mubr.msk.bf16.mxu0 %vm520_vm2, %v1792_v13  ;;  %v2364_v13 = vor.u32 %v2363_v28, %v2359_v6  ;;  %v2409_v6 = vrot.slane %v2407_v38, 1  ;;  %v303_v28 = vld [vmem:[%s9772_s5 + $0xc8] sm:$0xff]  ;;  %v2684_v38 = vrot.slane %v8680_v56, 1 }
 0x139   : > { %v2368_v23 = vsel %vm408_vm1, %v2364_v13, %v2367_v54  ;;  %v2410_v13 = vsel %vm408_vm1, %v2406_v46, %v2409_v6 }
 0x13e   : > { %7092 = vmatmul.mubr.msk.bf16.vlgmr.msra.gmra.mrb[0].mxu0 %vm520_vm2, %v1794_v55  ;;  %v292_v55 = vld [vmem:[%s9772_s5 + $0x70] sm:$0xff] }
 0x13f   : > { %7095 = vmatprep.mubr.msk.bf16.mxu0 %vm520_vm2, %v1796_v57  ;;  %7120 = vmatpush3.bf16.msra.mxu0 %v2178_v15  ;;  %v6425_v57 = vcombine.low %v8787_v52, %v2062_v7  ;;  %v2372_v15 = vshll.u32 %v8680_v56, 16  ;;  %v2411_v7 = vshrl.u32 %v8724_v31, 16 }
 0x140   : > { %7989 = vmatprep.subr.msk.bf16.mxu0 %vm563_vm0, %v6440_v2  ;;  %v2369_v2 = vshrl.u32 %v8677_v21, 16  ;;  %3117 = vperm.xlu0 %8036, %v292_v55   ;;  %v305_v55 = vld [vmem:[%s9772_s5 + $0xd8] sm:$0x3f] }
 0x141   : > { %v2374_v59 = vrot.slane %v2372_v15, 1  ;;  %v2413_v15 = vor.u32 %v2411_v7, %v2409_v6 }
 0x144   : > { %3127 = vperm.xlu0 %8036, %v294_v49  }
 0x146   : > { %7096 = vmatmul.mubr.msk.bf16.gmra.mrb[4].mxu0 %vm520_vm2, %v1798_v9  ;;  %v2379_v9 = vshll.u32 %v8695_v4, 16 }
 0x147   : > { %7099 = vmatprep.mubr.msk.bf16.mxu0 %vm520_vm2, %v1800_v58  ;;  %v293_v58 = vld [vmem:[%s9772_s5 + $0x78] sm:$0xff] }
 0x148   : > { %3122 = vperm.xlu1 %8037, %v293_v58   ;;  %v2381_v11 = vrot.slane %v2379_v9, 1  ;;  %v2425_v58 = vshrl.u32 %v8746_v39, 16 }
 0x14c   : > { %3132 = vperm.xlu1 %8037, %v295_v34  }
 0x14e   : > { %7100 = vmatmul.mubr.msk.bf16.gmra.mrb[8].mxu0 %vm520_vm2, %v1802_v60  ;;  %v2371_v60 = vor.u32 %v2369_v2, %v2367_v54  ;;  %v2418_v54 = vshrl.u32 %v8727_v32, 16 }
 0x14f   : > { %7103 = vmatprep.mubr.msk.bf16.mxu0 %vm520_vm2, %v1804_v10  ;;  %v2378_v10 = vor.u32 %v2376_v3, %v2374_v59  ;;  %v2428_v3 = vshll.u32 %v8749_v41, 16 }
 0x150   : > { %v2375_v12 = vsel %vm408_vm1, %v2371_v60, %v2374_v59  ;;  %v2432_v59 = vshrl.u32 %v8749_v41, 16  ;;  %v2435_v60 = vshll.u32 %v8769_v47, 16 }
 0x156   : > { %7104 = vmatmul.mubr.msk.bf16.gmra.mrb[12].mxu0 %vm520_vm2, %v1806_v37  ;;  %v296_v37 = vld [vmem:[%s9772_s5 + $0x90] sm:$0xff] }
 0x157   : > { %7107 = vmatprep.mubr.msk.bf16.mxu0 %vm520_vm2, %v1808_v61  ;;  %v2386_v61 = vshll.u32 %v8698_v19, 16  ;;  %3137 = vperm.xlu0 %8036, %v296_v37  }
 0x159   : > { %v2388_v20 = vrot.slane %v2386_v61, 1 }
 0x15e   : > { %7108 = vmatmul.mubr.msk.bf16.gmra.mrb[16].mxu0 %vm520_vm2, %v1810_v40  ;;  %v2382_v40 = vsel %vm408_vm1, %v2378_v10, %v2381_v11  ;;  %v2353_v10 = vld [vmem:[%s8280_s21 + $0x7c] sm:$0xf] }
 0x15f   : > { %7111 = vmatprep.mubr.msk.bf16.mxu0 %vm520_vm2, %v1812_v16  ;;  %v2751_v16 = vsel %vm563_vm0, %v8686_v8, 0  ;;  %v8879_v37 = vcombine.low %v8787_v52, %v2353_v10  ;;  %v8959_v10 = vld [vmem:[%s9769_s2] ss:$0 sm:$0xff] }
 0x161   : > { %v2454_v29 = vshrl.u32 %v8879_v37, 16 }
 0x166   : > { %7112 = vmatmul.mubr.msk.bf16.gmra.mrb[20].mxu0 %vm520_vm2, %v1814_v62  ;;  %v297_v62 = vld [vmem:[%s9772_s5 + $0x98] sm:$0xff] }
 0x167   : > { %7115 = vmatprep.mubr.msk.bf16.mxu0 %vm520_vm2, %v1816_v18  ;;  %v298_v18 = vld [vmem:[%s9772_s5 + $0xa0] sm:$0xff]  ;;  %3142 = vperm.xlu1 %8037, %v297_v62   ;;  %v2450_v62 = vshll.u32 %v8879_v37, 16 }
 0x168   : > { %3147 = vperm.xlu0 %8036, %v298_v18  }
 0x16b   : > { %3152 = vperm.xlu1 %8037, %v299_v25  }
 0x16c   : > { %3157 = vperm.xlu0 %8036, %v300_v27  }
 0x16e   : > { %7116 = vmatmul.mubr.msk.bf16.gmra.mrb[24].mxu0 %vm520_vm2, %v1815_v42  ;;  %v2393_v42 = vshll.u32 %v8705_v22, 16 }
 0x16f   : > { %7121 = vmatprep.mubr.msk.bf16.mxu0 %vm520_vm2, %v8671_v53  ;;  %v2385_v53 = vor.u32 %v2383_v14, %v2381_v11  ;;  %3162 = vperm.xlu1 %8037, %v301_v43   ;;  %v2430_v11 = vrot.slane %v2428_v3, 1  ;;  %v2442_v14 = vshll.u32 %v8772_v5, 16 }
 0x170   : > { %3167 = vperm.xlu0 %8036, %v302_v44  }
 0x171   : > { %v2389_v30 = vsel %vm408_vm1, %v2385_v53, %v2388_v20  ;;  %v2434_v61 = vor.u32 %v2432_v59, %v2430_v11  ;;  %v2444_v18 = vrot.slane %v2442_v14, 1  ;;  %v2452_v53 = vrot.slane %v2450_v62, 1 }
 0x173   : > { %3172 = vperm.xlu1 %8037, %v303_v28  }
 0x174   : > { %3177 = vperm.xlu0 %8036, %v304_v48  }
 0x176   : > { %7122 = vmatmul.mubr.msk.bf16.vlgmr.msra.gmra.mrb[0].mxu0 %vm520_vm2, %v8677_v21 }
 0x177   : > { %7125 = vmatprep.mubr.msk.bf16.mxu0 %vm520_vm2, %v8680_v56  ;;  %7150 = vmatpush3.bf16.msra.mxu0 %v2500_v1  ;;  %v2392_v1 = vor.u32 %v2390_v17, %v2388_v20  ;;  %v2692_v56 = vrot.slane %v8708_v24, 1 }
 0x178   : > { %7990 = vmatprep.subr.msk.bf16.mxu0 %vm563_vm0, %v8686_v8  ;;  %v2395_v8 = vrot.slane %v2393_v42, 1  ;;  %3182 = vperm.xlu1 %8037, %v305_v55   ;;  %v2446_v42 = vshrl.u32 %v8772_v5, 16 }
 0x17a   : > { %v2396_v35 = vsel %vm408_vm1, %v2392_v1, %v2395_v8  ;;  %v2399_v26 = vor.u32 %v2397_v33, %v2395_v8  ;;  %v2448_v20 = vor.u32 %v2446_v42, %v2444_v18  ;;  %v2675_v1 = vld [vmem:[%s8280_s21 + $0x10] sm:$0xe]  ;;  %v2682_v33 = vrot.slane %v8677_v21, 1  ;;  %s9726_s21 = scalar_lea.sflag [#allocation5], %s269_s18 }
 0x17b   : > { %v6457_v27 = vcombine.low %v2675_v1, %v8668_v63  ;;  %v2686_v63 = vrot.slane %v8695_v4, 1  ;;  %v2688_v21 = vrot.slane %v8698_v19, 1 }
 0x17c   : > { %v2403_v51 = vsel %vm408_vm1, %v2399_v26, %v2402_v45  ;;  %v2453_v25 = vsel %vm408_vm1, %v2448_v20, %v2452_v53  ;;  %v2685_v43 = vsel %vm898_vm3, %v2682_v33, %v2684_v38  ;;  %v2690_v45 = vrot.slane %v8705_v22, 1 }
 0x17d   : > { %v2687_v44 = vsel %vm898_vm3, %v2684_v38, %v2686_v63  ;;  %v2689_v26 = vsel %vm898_vm3, %v2686_v63, %v2688_v21 }
 0x17e   : > { %7126 = vmatmul.mubr.msk.bf16.gmra.mrb[4].mxu0 %vm520_vm2, %v8695_v4  ;;  %v2691_v46 = vsel %vm898_vm3, %v2688_v21, %v2690_v45  ;;  %v2694_v4 = vrot.slane %v8724_v31, 1  ;;  %v2693_v6 = vsel %vm898_vm3, %v2690_v45, %v2692_v56 }
 0x17f   : > { %7129 = vmatprep.mubr.msk.bf16.mxu0 %vm520_vm2, %v8698_v19  ;;  %v2696_v19 = vrot.slane %v8727_v32, 1 }
 0x180   : > { %v2695_v28 = vsel %vm898_vm3, %v2692_v56, %v2694_v4 }
 0x181   : > { %v2697_v48 = vsel %vm898_vm3, %v2694_v4, %v2696_v19 }
 0x186   : > { %7130 = vmatmul.mubr.msk.bf16.gmra.mrb[8].mxu0 %vm520_vm2, %v8705_v22  ;;  %v2698_v22 = vrot.slane %v8746_v39, 1 }
 0x187   : > { %7133 = vmatprep.mubr.msk.bf16.mxu0 %vm520_vm2, %v8708_v24  ;;  %v2700_v24 = vrot.slane %v8749_v41, 1 }
 0x18e   : > { %7134 = vmatmul.mubr.msk.bf16.gmra.mrb[12].mxu0 %vm520_vm2, %v8724_v31  ;;  %v2702_v31 = vrot.slane %v8769_v47, 1 }
 0x18f   : > { %7137 = vmatprep.mubr.msk.bf16.mxu0 %vm520_vm2, %v8727_v32  ;;  %v2704_v32 = vrot.slane %v8772_v5, 1 }
 0x190   : > { %v2703_v7 = vsel %vm898_vm3, %v2700_v24, %v2702_v31 }
 0x196   : > { %7138 = vmatmul.mubr.msk.bf16.gmra.mrb[16].mxu0 %vm520_vm2, %v8746_v39  ;;  %v2706_v39 = vrot.slane %v8879_v37, 1 }
 0x197   : > { %7141 = vmatprep.mubr.msk.bf16.mxu0 %vm520_vm2, %v8749_v41  ;;  %v8172_v41 = vmov 0.0  }
 0x198   : > { %3214 = vst.msk [vmem:[#allocation2] sm:$0xff] %vm3213_vm4, %v8172_v41  ;;  %3215 = vst.msk [vmem:[#allocation2 + $0x8] sm:$0xff] %vm3213_vm4, %v8172_v41 }
 0x199   : > { %3217 = vst.msk [vmem:[#allocation2 + $0x10] sm:$0x1] %vm3216_vm5, %v8172_v41  ;;  %3220 = vst.msk [vmem:[#allocation2 + $0xff] sm:$0x1] %vm3216_vm5, %v8172_v41 }
 0x19a   : > { %3218 = vst.msk [vmem:[#allocation2 + $0xef] sm:$0xff] %vm3213_vm4, %v8172_v41  ;;  %3219 = vst.msk [vmem:[#allocation2 + $0xf7] sm:$0xff] %vm3213_vm4, %v8172_v41 }
 0x19e   : > { %7142 = vmatmul.mubr.msk.bf16.gmra.mrb[20].mxu0 %vm520_vm2, %v8769_v47 }
 0x19f   : > { %7145 = vmatprep.mubr.msk.bf16.mxu0 %vm520_vm2, %v8772_v5  ;;  %v8087_v5 = vld [vmem:[%s9770_s3 + $0x18] sm:$0xff]  }
 0x1a0   : > { %v3297_v55 = vld [vmem:[#allocation2 + $0x9] sm:$0xff] }
 0x1a6   : > { %7146 = vmatmul.mubr.msk.bf16.gmra.mrb[24].mxu0 %vm520_vm2, %v6425_v57  ;;  %v2416_v57 = vrot.slane %v2414_v50, 1  ;;  %v2699_v50 = vsel %vm898_vm3, %v2696_v19, %v2698_v22 }
 0x1a7   : > { %7151 = vmatprep.mubr.msk.bf16.mxu0 %vm520_vm2, %v2368_v23  ;;  %v2423_v23 = vrot.slane %v2421_v0, 1  ;;  %v3296_v0 = vld [vmem:[#allocation2 + $0x1] sm:$0xff] }
 0x1a8   : > { %v2420_v2 = vor.u32 %v2418_v54, %v2416_v57  ;;  %v2417_v9 = vsel %vm408_vm1, %v2413_v15, %v2416_v57  ;;  %v2707_v54 = vsel %vm898_vm3, %v2704_v32, %v2706_v39  ;;  %v3324_v57 = vpack.c.bf16 %v3297_v55, %v3296_v0  ;;  %v8951_v15 = vld [vmem:[%s9770_s3] sm:$0xff]  }
 0x1a9   : > { %v2427_v34 = vor.u32 %v2425_v58, %v2423_v23 }
 0x1aa   : > { %v2424_v49 = vsel %vm408_vm1, %v2420_v2, %v2423_v23  ;;  %7213 = vmatprep.mubr.msk.bf16.mxu1 %vm3213_vm4, %v3324_v57  ;;  %v3048_v2 = vpop.permute.xlu0 %3047  ;;  %v3058_v23 = vpop.permute.xlu1 %3057 }
 0x1ae   : > { %7152 = vmatmul.mubr.msk.bf16.vlgmr.msra.gmra.mrb[0].mxu0 %vm520_vm2, %v2375_v12  ;;  %v2437_v12 = vrot.slane %v2435_v60, 1  ;;  %v3053_v3 = vpop.permute.xlu0 %3052 }
 0x1af   : > { %7155 = vmatprep.mubr.msk.bf16.mxu0 %vm520_vm2, %v2382_v40  ;;  %7180 = vmatpush3.bf16.msra.mxu0 %v2751_v16  ;;  %v2431_v40 = vsel %vm408_vm1, %v2427_v34, %v2430_v11  ;;  %v2439_v16 = vshrl.u32 %v8769_v47, 16  ;;  %v8086_v47 = vld [vmem:[%s9770_s3 + $0x10] sm:$0xff]  }
 0x1b0   : > { %v2438_v17 = vsel %vm408_vm1, %v2434_v61, %v2437_v12  ;;  %7209 = vmatprep.subr.bf16.mxu1 %v8086_v47 }
 0x1b1   : > { %v2441_v52 = vor.u32 %v2439_v16, %v2437_v12  ;;  %7210 = vmatpush3.bf16.msra.mxu1 %v8086_v47 }
 0x1b2   : > { %7211 = vmatprep.subr.bf16.mxu1 %v8087_v5  ;;  %v3068_v58 = vpop.permute.xlu0 %3067 }
 0x1b3   : > { %v2445_v8 = vsel %vm408_vm1, %v2441_v52, %v2444_v18 }
 0x1b5   : > { %7212 = vmatpush3.bf16.msra.mxu1 %v8087_v5 }
 0x1b6   : > { %7156 = vmatmul.mubr.msk.bf16.gmra.mrb[4].mxu0 %vm520_vm2, %v2389_v30  ;;  %v2681_v30 = vrot.slane %v6457_v27, 1  ;;  %7241 = vmatprep.subr.bf16.mxu1 %v8951_v15  ;;  %v3078_v59 = vpop.permute.xlu0 %3077 }
 0x1b7   : > { %7159 = vmatprep.mubr.msk.bf16.mxu0 %vm520_vm2, %v2396_v35  ;;  %v2456_v35 = vor.u32 %v2454_v29, %v2452_v53 }
 0x1b8   : > { %v2683_v36 = vsel %vm898_vm3, %v2681_v30, %v2682_v33 }
 0x1ba   : > { %v8961_v11 = vpop.permute.xlu0 %3087 }
 0x1be   : > { %7160 = vmatmul.mubr.msk.bf16.gmra.mrb[8].mxu0 %vm520_vm2, %v2403_v51  ;;  %v2701_v51 = vsel %vm898_vm3, %v2698_v22, %v2700_v24  ;;  %v8969_v52 = vpop.permute.xlu0 %3097 }
 0x1bf   : > { %7163 = vmatprep.mubr.msk.bf16.mxu0 %vm520_vm2, %v2410_v13  ;;  %v2705_v13 = vsel %vm898_vm3, %v2702_v31, %v2704_v32 }
 0x1c2   : > { %v8978_v45 = vpop.permute.xlu0 %3107 }
 0x1c6   : > { %7164 = vmatmul.mubr.msk.bf16.gmra.mrb[12].mxu0 %vm520_vm2, %v2417_v9  ;;  %v3063_v9 = vpop.permute.xlu1 %3062 }
 0x1c7   : > { %7167 = vmatprep.mubr.msk.bf16.mxu0 %vm520_vm2, %v2424_v49 }
 0x1ca   : > { %v8954_v49 = vpop.permute.xlu1 %3072 }
 0x1ce   : > { %7168 = vmatmul.mubr.msk.bf16.gmra.mrb[16].mxu0 %vm520_vm2, %v2431_v40  ;;  %v3083_v60 = vpop.permute.xlu1 %3082 }
 0x1cf   : > { %7171 = vmatprep.mubr.msk.bf16.mxu0 %vm520_vm2, %v2438_v17 }
 0x1d2   : > { %v8963_v37 = vpop.permute.xlu1 %3092 }
 0x1d6   : > { %7172 = vmatmul.mubr.msk.bf16.gmra.mrb[20].mxu0 %vm520_vm2, %v2445_v8  ;;  %v8971_v27 = vpop.permute.xlu1 %3102 }
 0x1d7   : > { %7175 = vmatprep.mubr.msk.bf16.mxu0 %vm520_vm2, %v2453_v25 }
 0x1de   : > { %7176 = vmatmul.mubr.msk.bf16.gmra.mrb[24].mxu0 %vm520_vm2, %v2456_v35 }
 0x1df   : > { %7181 = vmatprep.mubr.msk.bf16.mxu0 %vm520_vm2, %v2683_v36 }
 0x1e6   : > { %7182 = vmatmul.mubr.msk.bf16.vlgmr.msra.gmra.mrb[0].mxu0 %vm520_vm2, %v2685_v43 }
 0x1e7   : > { %7185 = vmatprep.mubr.msk.bf16.mxu0 %vm520_vm2, %v2687_v44 }
 0x1ee   : > { %7186 = vmatmul.mubr.msk.bf16.gmra.mrb[4].mxu0 %vm520_vm2, %v2689_v26 }
 0x1ef   : > { %7189 = vmatprep.mubr.msk.bf16.mxu0 %vm520_vm2, %v2691_v46 }
 0x1f6   : > { %7190 = vmatmul.mubr.msk.bf16.gmra.mrb[8].mxu0 %vm520_vm2, %v2693_v6 }
 0x1f7   : > { %7193 = vmatprep.mubr.msk.bf16.mxu0 %vm520_vm2, %v2695_v28  ;;  %v8983_v28 = vpop.permute.xlu1 %3112 }
 0x1fe   : > { %7194 = vmatmul.mubr.msk.bf16.gmra.mrb[12].mxu0 %vm520_vm2, %v2697_v48 }
 0x1ff   : > { %7197 = vmatprep.mubr.msk.bf16.mxu0 %vm520_vm2, %v2699_v50 }
 0x206   : > { %7198 = vmatmul.mubr.msk.bf16.gmra.mrb[16].mxu0 %vm520_vm2, %v2701_v51 }
 0x207   : > { %7201 = vmatprep.mubr.msk.bf16.mxu0 %vm520_vm2, %v2703_v7 }
 0x20e   : > { %7202 = vmatmul.mubr.msk.bf16.gmra.mrb[20].mxu0 %vm520_vm2, %v2705_v13  ;;  %v8986_v13 = vpop.permute.xlu0 %3117 }
 0x20f   : > { %7205 = vmatprep.mubr.msk.bf16.mxu0 %vm520_vm2, %v2707_v54 }
 0x216   : > { %7206 = vmatmul.mubr.msk.bf16.gmra.mrb[24].mxu0 %vm520_vm2, %v2706_v39 }
 0x2b9   : > { %v7183_v34 = vpop.f32.mrb[0].mxu0 }
 0x2ba   : > { %v2935_v61 = vadd.f32 %v7183_v34, %v8959_v10  ;;  %v2787_v12 = vpop.f32.mrb[1].mxu0 }
 0x2bb   : > { %v2933_v14 = vadd.f32 %v8959_v10, %v2787_v12  ;;  %v7184_v40 = vpop.f32.mrb[2].mxu0 }
 0x2bc   : > { %vm2963_vm6 = vcmp.ge.f32.partialorder %v2935_v61, 0.0  ;;  %v2991_v16 = vmul.f32 0.01, %v2935_v61  ;;  %v2936_v17 = vadd.f32 %v7184_v40, %v8959_v10  ;;  %v2790_v42 = vpop.f32.mrb[3].mxu0 }
 0x2bd   : > { %vm2961_vm7 = vcmp.ge.f32.partialorder %v2933_v14, 0.0  ;;  %v2989_v62 = vmul.f32 0.01, %v2933_v14  ;;  %v2934_v18 = vadd.f32 %v8959_v10, %v2790_v42 }
 0x2be   : > { %v3019_v20 = vsel %vm2963_vm6, %v2935_v61, %v2991_v16  ;;  %vm2964_vm8 = vcmp.ge.f32.partialorder %v2936_v17, 0.0  ;;  %v2992_v53 = vmul.f32 0.01, %v2936_v17 }
 0x2bf   : > { %v3187_v1 = vmul.f32 %v3058_v23, %v3019_v20  ;;  %v3017_v8 = vsel %vm2961_vm7, %v2933_v14, %v2989_v62  ;;  %vm2962_vm9 = vcmp.ge.f32.partialorder %v2934_v18, 0.0  ;;  %v2990_v25 = vmul.f32 0.01, %v2934_v18  ;;  %v8999_v23 = vpop.permute.xlu1 %3122  ;;  %v9023_v62 = vpop.permute.xlu0 %3127 }
 0x2c0   : > { %v3185_v29 = vmul.f32 %v3048_v2, %v3017_v8  ;;  %v3020_v30 = vsel %vm2964_vm8, %v2936_v17, %v2992_v53  ;;  %v9029_v53 = vld [vmem:[%s9770_s3 + $0x20] sm:$0xff]  }
 0x2c1   : > { %3223 = vst.msk [vmem:[#allocation2 + $0x21] sm:$0xff] %vm3213_vm4, %v3187_v1  ;;  %v3188_v33 = vmul.f32 %v3063_v9, %v3020_v30  ;;  %v3018_v35 = vsel %vm2962_vm9, %v2934_v18, %v2990_v25  ;;  %v7187_v36 = vpop.f32.mrb[4].mxu0 }
 0x2c2   : > { %3221 = vst.msk [vmem:[#allocation2 + $0x11] sm:$0xff] %vm3213_vm4, %v3185_v29  ;;  %v3186_v38 = vmul.f32 %v3053_v3, %v3018_v35  ;;  %v2939_v63 = vadd.f32 %v7187_v36, %v8959_v10  ;;  %v2803_v43 = vpop.f32.mrb[5].mxu0 }
 0x2c3   : > { %3224 = vst.msk [vmem:[#allocation2 + $0x29] sm:$0xff] %vm3213_vm4, %v3188_v33  ;;  %v2937_v44 = vadd.f32 %v8959_v10, %v2803_v43  ;;  %v7188_v21 = vpop.f32.mrb[6].mxu0  ;;  %v9033_v25 = vpop.permute.xlu1 %3132 }
 0x2c4   : > { %3222 = vst.msk [vmem:[#allocation2 + $0x19] sm:$0xff] %vm3213_vm4, %v3186_v38  ;;  %vm2967_vm10 = vcmp.ge.f32.partialorder %v2939_v63, 0.0  ;;  %v2995_v26 = vmul.f32 0.01, %v2939_v63  ;;  %v2940_v46 = vadd.f32 %v7188_v21, %v8959_v10  ;;  %v2806_v56 = vpop.f32.mrb[7].mxu0 }
 0x2c5   : > { %vm2965_vm11 = vcmp.ge.f32.partialorder %v2937_v44, 0.0  ;;  %v2993_v4 = vmul.f32 0.01, %v2937_v44  ;;  %v2938_v6 = vadd.f32 %v8959_v10, %v2806_v56  ;;  %v3138_v56 = vpop.permute.xlu0 %3137 }
 0x2c6   : > { %v3023_v19 = vsel %vm2967_vm10, %v2939_v63, %v2995_v26  ;;  %vm2968_vm12 = vcmp.ge.f32.partialorder %v2940_v46, 0.0  ;;  %v2996_v22 = vmul.f32 0.01, %v2940_v46 }
 0x2c7   : > { %v3191_v48 = vmul.f32 %v3078_v59, %v3023_v19  ;;  %v3021_v50 = vsel %vm2965_vm11, %v2937_v44, %v2993_v4  ;;  %vm2966_vm13 = vcmp.ge.f32.partialorder %v2938_v6, 0.0  ;;  %v2994_v24 = vmul.f32 0.01, %v2938_v6 }
 0x2c8   : > { %v3189_v31 = vmul.f32 %v3068_v58, %v3021_v50  ;;  %v3024_v51 = vsel %vm2968_vm12, %v2940_v46, %v2996_v22  ;;  %v9007_v59 = vld [vmem:[#allocation2 + $0x21] sm:$0xff]  ;;  %v3143_v50 = vpop.permute.xlu1 %3142 }
 0x2c9   : > { %3227 = vst.msk [vmem:[#allocation2 + $0x41] sm:$0xff] %vm3213_vm4, %v3191_v48  ;;  %v3192_v7 = vmul.f32 %v3083_v60, %v3024_v51  ;;  %v3022_v32 = vsel %vm2966_vm13, %v2938_v6, %v2994_v24  ;;  %v7191_v39 = vpop.f32.mrb[8].mxu0  ;;  %v8995_v57 = vld [vmem:[#allocation2 + $0x11] sm:$0xff]  ;;  %v8089_v60 = vld [vmem:[%s9770_s3 + $0x8] sm:$0xff]  }
 0x2ca   : > { %3225 = vst.msk [vmem:[#allocation2 + $0x31] sm:$0xff] %vm3213_vm4, %v3189_v31  ;;  %v3190_v54 = vmul.f32 %v8954_v49, %v3022_v32  ;;  %v2943_v41 = vadd.f32 %v7191_v39, %v8959_v10  ;;  %v2819_v47 = vpop.f32.mrb[9].mxu0  ;;  %v8991_v5 = vld [vmem:[#allocation2 + $0x29] sm:$0xff] }
 0x2cb   : > { %3228 = vst.msk [vmem:[#allocation2 + $0x49] sm:$0xff] %vm3213_vm4, %v3192_v7  ;;  %v2941_v0 = vadd.f32 %v8959_v10, %v2819_v47  ;;  %v7192_v55 = vpop.f32.mrb[10].mxu0  ;;  %v8997_v2 = vld [vmem:[#allocation2 + $0x19] sm:$0xff]  ;;  %v9015_v12 = vpack.c.bf16 %v8991_v5, %v9007_v59 }
 0x2cc   : > { %3226 = vst.msk [vmem:[#allocation2 + $0x39] sm:$0xff] %vm3213_vm4, %v3190_v54  ;;  %vm2971_vm14 = vcmp.ge.f32.partialorder %v2943_v41, 0.0  ;;  %v2999_v3 = vmul.f32 0.01, %v2943_v41  ;;  %v2944_v9 = vadd.f32 %v7192_v55, %v8959_v10  ;;  %v2822_v58 = vpop.f32.mrb[11].mxu0  ;;  %v9005_v49 = vpack.c.bf16 %v8997_v2, %v8995_v57 }
 0x2cd   : > { %vm2969_vm15 = vcmp.ge.f32.partialorder %v2941_v0, 0.0  ;;  %v2997_v34 = vmul.f32 0.01, %v2941_v0  ;;  %v2942_v61 = vadd.f32 %v8959_v10, %v2822_v58 }
 0x2ce   : > { %v3027_v14 = vsel %vm2971_vm14, %v2943_v41, %v2999_v3  ;;  %vm2972_vm1 = vcmp.ge.f32.partialorder %v2944_v9, 0.0  ;;  %v3000_v40 = vmul.f32 0.01, %v2944_v9  ;;  %7214 = vmatmul.mubr.msk.bf16.vlgmr.msra.gmra.mrb[0].mxu1 %vm3213_vm4, %v9005_v49 }
 0x2cf   : > { %v3195_v16 = vmul.f32 %v8969_v52, %v3027_v14  ;;  %v3025_v17 = vsel %vm2969_vm15, %v2941_v0, %v2997_v34  ;;  %vm2970_vm2 = vcmp.ge.f32.partialorder %v2942_v61, 0.0  ;;  %v2998_v42 = vmul.f32 0.01, %v2942_v61  ;;  %7217 = vmatprep.mubr.msk.bf16.mxu1 %vm3213_vm4, %v9015_v12  ;;  %7242 = vmatpush3.bf16.msra.mxu1 %v8951_v15 }
 0x2d0   : > { %v3193_v18 = vmul.f32 %v8961_v11, %v3025_v17  ;;  %v3028_v20 = vsel %vm2972_vm1, %v2944_v9, %v3000_v40  ;;  %7243 = vmatprep.subr.bf16.mxu1 %v8089_v60  ;;  %v9052_v44 = vld [vmem:[#allocation2 + $0x41] sm:$0xff]  ;;  %v3153_v40 = vpop.permute.xlu1 %3152 }
 0x2d1   : > { %3231 = vst.msk [vmem:[#allocation2 + $0x61] sm:$0xff] %vm3213_vm4, %v3195_v16  ;;  %v3196_v52 = vmul.f32 %v8971_v27, %v3028_v20  ;;  %v3026_v1 = vsel %vm2970_vm2, %v2942_v61, %v2998_v42  ;;  %v7195_v8 = vpop.f32.mrb[12].mxu0  ;;  %v9042_v36 = vld [vmem:[#allocation2 + $0x31] sm:$0xff] }
 0x2d2   : > { %3229 = vst.msk [vmem:[#allocation2 + $0x51] sm:$0xff] %vm3213_vm4, %v3193_v18  ;;  %v3194_v15 = vmul.f32 %v8963_v37, %v3026_v1  ;;  %v2947_v11 = vadd.f32 %v7195_v8, %v8959_v10  ;;  %v2835_v29 = vpop.f32.mrb[13].mxu0  ;;  %v9038_v30 = vld [vmem:[#allocation2 + $0x49] sm:$0xff] }
 0x2d3   : > { %3232 = vst.msk [vmem:[#allocation2 + $0x69] sm:$0xff] %vm3213_vm4, %v3196_v52  ;;  %v2945_v33 = vadd.f32 %v8959_v10, %v2835_v29  ;;  %v7196_v35 = vpop.f32.mrb[14].mxu0  ;;  %v9044_v27 = vld [vmem:[#allocation2 + $0x39] sm:$0xff]  ;;  %7244 = vmatpush3.bf16.msra.mxu1 %v8089_v60  ;;  %v9058_v46 = vpack.c.bf16 %v9038_v30, %v9052_v44 }
 0x2d4   : > { %3230 = vst.msk [vmem:[#allocation2 + $0x59] sm:$0xff] %vm3213_vm4, %v3194_v15  ;;  %vm2975_vm3 = vcmp.ge.f32.partialorder %v2947_v11, 0.0  ;;  %v3003_v38 = vmul.f32 0.01, %v2947_v11  ;;  %v2948_v37 = vadd.f32 %v7196_v35, %v8959_v10  ;;  %v2838_v63 = vpop.f32.mrb[15].mxu0  ;;  %v9050_v43 = vpack.c.bf16 %v9044_v27, %v9042_v36  ;;  %7273 = vmatprep.subr.bf16.mxu1 %v9029_v53 }
 0x2d5   : > { %vm2973_vm5 = vcmp.ge.f32.partialorder %v2945_v33, 0.0  ;;  %v3001_v21 = vmul.f32 0.01, %v2945_v33  ;;  %v2946_v26 = vadd.f32 %v8959_v10, %v2838_v63 }
 0x2d6   : > { %v3031_v4 = vsel %vm2975_vm3, %v2947_v11, %v3003_v38  ;;  %vm2976_vm6 = vcmp.ge.f32.partialorder %v2948_v37, 0.0  ;;  %v3004_v6 = vmul.f32 0.01, %v2948_v37  ;;  %7218 = vmatmul.mubr.msk.bf16.gmra.mrb[4].mxu1 %vm3213_vm4, %v9050_v43 }
 0x2d7   : > { %v3199_v19 = vmul.f32 %v8986_v13, %v3031_v4  ;;  %v3029_v22 = vsel %vm2973_vm5, %v2945_v33, %v3001_v21  ;;  %vm2974_vm7 = vcmp.ge.f32.partialorder %v2946_v26, 0.0  ;;  %v3002_v48 = vmul.f32 0.01, %v2946_v26  ;;  %7221 = vmatprep.mubr.msk.bf16.mxu1 %vm3213_vm4, %v9058_v46 }
 0x2d8   : > { %v3197_v24 = vmul.f32 %v8978_v45, %v3029_v22  ;;  %v3032_v31 = vsel %vm2976_vm6, %v2948_v37, %v3004_v6  ;;  %v9085_v60 = vld [vmem:[#allocation2 + $0x61] sm:$0xff]  ;;  %vm3248_vm6 = vcmask 259072  }
 0x2d9   : > { %3235 = vst.msk [vmem:[#allocation2 + $0x81] sm:$0xff] %vm3213_vm4, %v3199_v19  ;;  %v3200_v51 = vmul.f32 %v8999_v23, %v3032_v31  ;;  %v3030_v7 = vsel %vm2974_vm7, %v2946_v26, %v3002_v48  ;;  %v7199_v32 = vpop.f32.mrb[16].mxu0  ;;  %v9075_v0 = vld [vmem:[#allocation2 + $0x51] sm:$0xff]  ;;  %v3148_v23 = vpop.permute.xlu0 %3147  ;;  %vm6120_vm7 = vcmask 490496  }
 0x2da   : > { %3233 = vst.msk [vmem:[#allocation2 + $0x71] sm:$0xff] %vm3213_vm4, %v3197_v24  ;;  %v3198_v39 = vmul.f32 %v8983_v28, %v3030_v7  ;;  %v2951_v13 = vadd.f32 %v7199_v32, %v8959_v10  ;;  %v2851_v54 = vpop.f32.mrb[17].mxu0  ;;  %v9071_v41 = vld [vmem:[#allocation2 + $0x69] sm:$0xff] }
 0x2db   : > { %3236 = vst.msk [vmem:[#allocation2 + $0x89] sm:$0xff] %vm3213_vm4, %v3200_v51  ;;  %v2949_v45 = vadd.f32 %v8959_v10, %v2851_v54  ;;  %v7200_v47 = vpop.f32.mrb[18].mxu0  ;;  %v9077_v55 = vld [vmem:[#allocation2 + $0x59] sm:$0xff]  ;;  %v9090_v14 = vpack.c.bf16 %v9071_v41, %v9085_v60 }
 0x2dc   : > { %3234 = vst.msk [vmem:[#allocation2 + $0x79] sm:$0xff] %vm3213_vm4, %v3198_v39  ;;  %vm2979_vm8 = vcmp.ge.f32.partialorder %v2951_v13, 0.0  ;;  %v3007_v3 = vmul.f32 0.01, %v2951_v13  ;;  %v2952_v28 = vadd.f32 %v7200_v47, %v8959_v10  ;;  %v2854_v9 = vpop.f32.mrb[19].mxu0  ;;  %v9083_v58 = vpack.c.bf16 %v9077_v55, %v9075_v0 }
 0x2dd   : > { %vm2977_vm9 = vcmp.ge.f32.partialorder %v2949_v45, 0.0  ;;  %v3005_v34 = vmul.f32 0.01, %v2949_v45  ;;  %v2950_v61 = vadd.f32 %v8959_v10, %v2854_v9  ;;  %v3158_v29 = vpop.permute.xlu0 %3157 }
 0x2de   : > { %v3035_v16 = vsel %vm2979_vm8, %v2951_v13, %v3007_v3  ;;  %vm2980_vm10 = vcmp.ge.f32.partialorder %v2952_v28, 0.0  ;;  %v3008_v17 = vmul.f32 0.01, %v2952_v28  ;;  %7222 = vmatmul.mubr.msk.bf16.gmra.mrb[8].mxu1 %vm3213_vm4, %v9083_v58 }
 0x2df   : > { %v3203_v42 = vmul.f32 %v3138_v56, %v3035_v16  ;;  %v3033_v18 = vsel %vm2977_vm9, %v2949_v45, %v3005_v34  ;;  %vm2978_vm11 = vcmp.ge.f32.partialorder %v2950_v61, 0.0  ;;  %v3006_v20 = vmul.f32 0.01, %v2950_v61  ;;  %7225 = vmatprep.mubr.msk.bf16.mxu1 %vm3213_vm4, %v9090_v14  ;;  %v3163_v56 = vpop.permute.xlu1 %3162 }
 0x2e0   : > { %v3201_v52 = vmul.f32 %v9023_v62, %v3033_v18  ;;  %v3036_v1 = vsel %vm2980_vm10, %v2952_v28, %v3008_v17  ;;  %v9115_v22 = vld [vmem:[#allocation2 + $0x81] sm:$0xff] }
 0x2e1   : > { %3239 = vst.msk [vmem:[#allocation2 + $0xa1] sm:$0xff] %vm3213_vm4, %v3203_v42  ;;  %v3204_v8 = vmul.f32 %v3143_v50, %v3036_v1  ;;  %v3034_v15 = vsel %vm2978_vm11, %v2950_v61, %v3006_v20  ;;  %v7203_v11 = vpop.f32.mrb[20].mxu0  ;;  %v9105_v21 = vld [vmem:[#allocation2 + $0x71] sm:$0xff]  ;;  %v3168_v13 = vpop.permute.xlu0 %3167 }
 0x2e2   : > { %3237 = vst.msk [vmem:[#allocation2 + $0x91] sm:$0xff] %vm3213_vm4, %v3201_v52  ;;  %v3202_v33 = vmul.f32 %v9033_v25, %v3034_v15  ;;  %v2955_v35 = vadd.f32 %v7203_v11, %v8959_v10  ;;  %v2867_v38 = vpop.f32.mrb[21].mxu0  ;;  %v9101_v37 = vld [vmem:[#allocation2 + $0x89] sm:$0xff] }
 0x2e3   : > { %3240 = vst.msk [vmem:[#allocation2 + $0xa9] sm:$0xff] %vm3213_vm4, %v3204_v8  ;;  %v2953_v62 = vadd.f32 %v8959_v10, %v2867_v38  ;;  %v7204_v63 = vpop.f32.mrb[22].mxu0  ;;  %v9107_v26 = vld [vmem:[#allocation2 + $0x79] sm:$0xff]  ;;  %v9120_v24 = vpack.c.bf16 %v9101_v37, %v9115_v22  ;;  %v3173_v9 = vpop.permute.xlu1 %3172 }
 0x2e4   : > { %3238 = vst.msk [vmem:[#allocation2 + $0x99] sm:$0xff] %vm3213_vm4, %v3202_v33  ;;  %vm2983_vm12 = vcmp.ge.f32.partialorder %v2955_v35, 0.0  ;;  %v3011_v4 = vmul.f32 0.01, %v2955_v35  ;;  %v2956_v25 = vadd.f32 %v7204_v63, %v8959_v10  ;;  %v2870_v6 = vpop.f32.mrb[23].mxu0  ;;  %v9113_v19 = vpack.c.bf16 %v9107_v26, %v9105_v21 }
 0x2e5   : > { %vm2981_vm13 = vcmp.ge.f32.partialorder %v2953_v62, 0.0  ;;  %v3009_v48 = vmul.f32 0.01, %v2953_v62  ;;  %v2954_v50 = vadd.f32 %v8959_v10, %v2870_v6 }
 0x2e6   : > { %v3039_v31 = vsel %vm2983_vm12, %v2955_v35, %v3011_v4  ;;  %vm2984_vm14 = vcmp.ge.f32.partialorder %v2956_v25, 0.0  ;;  %v3012_v51 = vmul.f32 0.01, %v2956_v25  ;;  %7226 = vmatmul.mubr.msk.bf16.gmra.mrb[12].mxu1 %vm3213_vm4, %v9113_v19  ;;  %v3178_v35 = vpop.permute.xlu0 %3177 }
 0x2e7   : > { %v3207_v7 = vmul.f32 %v3158_v29, %v3039_v31  ;;  %v3037_v32 = vsel %vm2981_vm13, %v2953_v62, %v3009_v48  ;;  %vm2982_vm15 = vcmp.ge.f32.partialorder %v2954_v50, 0.0  ;;  %v3010_v39 = vmul.f32 0.01, %v2954_v50  ;;  %7229 = vmatprep.mubr.msk.bf16.mxu1 %vm3213_vm4, %v9120_v24 }
 0x2e8   : > { %v3205_v54 = vmul.f32 %v3148_v23, %v3037_v32  ;;  %v3040_v45 = vsel %vm2984_vm14, %v2956_v25, %v3012_v51  ;;  %v9143_v15 = vld [vmem:[#allocation2 + $0xa1] sm:$0xff]  ;;  %v3183_v25 = vpop.permute.xlu1 %3182 }
 0x2e9   : > { %3243 = vst.msk [vmem:[#allocation2 + $0xc1] sm:$0xff] %vm3213_vm4, %v3207_v7  ;;  %v3208_v47 = vmul.f32 %v3163_v56, %v3040_v45  ;;  %v3038_v3 = vsel %vm2982_vm15, %v2954_v50, %v3010_v39  ;;  %v7207_v28 = vpop.f32.mrb[24].mxu0  ;;  %v9133_v18 = vld [vmem:[#allocation2 + $0x91] sm:$0xff]  ;;  %v3250_v45 = vld [vmem:[#allocation2] sm:$0xff] }
 0x2ea   : > { %3241 = vst.msk [vmem:[#allocation2 + $0xb1] sm:$0xff] %vm3213_vm4, %v3205_v54  ;;  %v3206_v34 = vmul.f32 %v3153_v40, %v3038_v3  ;;  %v2959_v61 = vadd.f32 %v7207_v28, %v8959_v10  ;;  %v2883_v16 = vpop.f32.mrb[25].mxu0  ;;  %v9129_v17 = vld [vmem:[#allocation2 + $0xa9] sm:$0xff]  ;;  %9783 = vst [vmem:[#allocation8_spill] sm:$0xff] %v9133_v18 }
 0x2eb   : > { %9782 = vst [vmem:[#allocation7_spill] sm:$0xff] %v9129_v17  ;;  %3244 = vst.msk [vmem:[#allocation2 + $0xc9] sm:$0xff] %vm3213_vm4, %v3208_v47  ;;  %v2957_v42 = vadd.f32 %v8959_v10, %v2883_v16  ;;  %v7208_v23 = vpop.f32.mrb[26].mxu0  ;;  %v9135_v20 = vld [vmem:[#allocation2 + $0x99] sm:$0xff]  ;;  %v9148_v33 = vpack.c.bf16 %v9129_v17, %v9143_v15  ;;  %v3251_v47 = vld [vmem:[#allocation2 + $0x8] sm:$0xff] }
 0x2ec   : > { %9784 = vst [vmem:[#allocation9_spill] sm:$0xff] %v9135_v20  ;;  %3242 = vst.msk [vmem:[#allocation2 + $0xb9] sm:$0xff] %vm3213_vm4, %v3206_v34  ;;  %vm2987_vm1 = vcmp.ge.f32.partialorder %v2959_v61, 0.0  ;;  %v3015_v52 = vmul.f32 0.01, %v2959_v61  ;;  %v2960_v40 = vadd.f32 %v7208_v23, %v8959_v10  ;;  %v2886_v1 = vpop.f32.mrb[27].mxu0  ;;  %v9141_v8 = vpack.c.bf16 %v9135_v20, %v9133_v18 }
 0x2ed   : > { %vm2985_vm2 = vcmp.ge.f32.partialorder %v2957_v42, 0.0  ;;  %v3013_v11 = vmul.f32 0.01, %v2957_v42  ;;  %v2958_v29 = vadd.f32 %v8959_v10, %v2886_v1  ;;  %v3254_v16 = vld [vmem:[#allocation2 + $0x20] sm:$0xff]  ;;  %v3252_v23 = vld [vmem:[#allocation2 + $0x10] sm:$0xff] }
 0x2ee   : > { %v3043_v38 = vsel %vm2987_vm1, %v2959_v61, %v3015_v52  ;;  %vm2988_vm3 = vcmp.ge.f32.partialorder %v2960_v40, 0.0  ;;  %v3016_v62 = vmul.f32 0.01, %v2960_v40  ;;  %7230 = vmatmul.mubr.msk.bf16.gmra.mrb[16].mxu1 %vm3213_vm4, %v9141_v8  ;;  %v3253_v61 = vld [vmem:[#allocation2 + $0x18] sm:$0xff] }
 0x2ef   : > { %v3211_v63 = vmul.f32 %v3178_v35, %v3043_v38  ;;  %v3041_v56 = vsel %vm2985_vm2, %v2957_v42, %v3013_v11  ;;  %vm2986_vm5 = vcmp.ge.f32.partialorder %v2958_v29, 0.0  ;;  %v3014_v4 = vmul.f32 0.01, %v2958_v29  ;;  %7233 = vmatprep.mubr.msk.bf16.mxu1 %vm3213_vm4, %v9148_v33  ;;  %v3255_v42 = vld [vmem:[#allocation2 + $0x28] sm:$0xff]  ;;  %v8092_v11 = vld [vmem:[%s9770_s3 + $0x30] sm:$0xff]   ;;  %v3258_v35 = vld [vmem:[#allocation2 + $0x40] sm:$0xff] }
 0x2f0   : > { %v3209_v10 = vmul.f32 %v3168_v13, %v3041_v56  ;;  %v3044_v6 = vsel %vm2988_vm3, %v2960_v40, %v3016_v62  ;;  %v9163_v13 = vld [vmem:[#allocation2 + $0xc1] sm:$0xff]  ;;  %v9177_v52 = vpack.c.bf16 %v3253_v61, %v3252_v23  ;;  %v9182_v1 = vpack.c.bf16 %v3255_v42, %v3254_v16  ;;  %v3256_v62 = vld [vmem:[#allocation2 + $0x30] sm:$0xff] }
 0x2f1   : > { %3247 = vst.msk [vmem:[#allocation2 + $0xe1] sm:$0xff] %vm3213_vm4, %v3211_v63  ;;  %v3212_v48 = vmul.f32 %v3183_v25, %v3044_v6  ;;  %v3042_v50 = vsel %vm2986_vm5, %v2958_v29, %v3014_v4  ;;  %v9157_v7 = vld [vmem:[#allocation2 + $0xb1] sm:$0xff]  ;;  %9786 = vst [vmem:[#allocation11_spill] sm:$0xff] %v9163_v13  ;;  %v8091_v40 = vld [vmem:[%s9770_s3 + $0x28] sm:$0xff]  }
 0x2f2   : > { %3245 = vst.msk [vmem:[#allocation2 + $0xd1] sm:$0xff] %vm3213_vm4, %v3209_v10  ;;  %v3210_v31 = vmul.f32 %v3173_v9, %v3042_v50  ;;  %v3321_v51 = vld [vmem:[#allocation2 + $0xc9] sm:$0xff]  ;;  %9785 = vst [vmem:[#allocation10_spill] sm:$0xff] %v9157_v7  ;;  %v3278_v9 = vpack.c.bf16 %v3251_v47, %v3250_v45  ;;  %v3257_v29 = vld [vmem:[#allocation2 + $0x38] sm:$0xff] }
 0x2f3   : > { %3249 = vst.msk [vmem:[#allocation2 + $0xe9] sm:$0x3f] %vm3248_vm6, %v3212_v48  ;;  %v3319_v32 = vld [vmem:[#allocation2 + $0xb9] sm:$0xff]  ;;  %v9166_v54 = vpack.c.bf16 %v3321_v51, %v9163_v13  ;;  %v3259_v38 = vld [vmem:[#allocation2 + $0x48] sm:$0xff]  ;;  %v9192_v63 = vpack.c.bf16 %v3257_v29, %v3256_v62  ;;  %v3260_v10 = vld [vmem:[#allocation2 + $0x50] sm:$0xff] }
 0x2f4   : > { %3246 = vst.msk [vmem:[#allocation2 + $0xd9] sm:$0xff] %vm3213_vm4, %v3210_v31  ;;  %v9161_v39 = vpack.c.bf16 %v3319_v32, %v9157_v7  ;;  %v9194_v56 = vpack.c.bf16 %v3259_v38, %v3258_v35  ;;  %v3262_v4 = vld [vmem:[#allocation2 + $0x60] sm:$0xff]  ;;  %v3263_v25 = vld [vmem:[#allocation2 + $0x68] sm:$0xff]  ;;  %v3265_v50 = vld [vmem:[#allocation2 + $0x78] sm:$0xff] }
 0x2f5   : > { %v9202_v48 = vpack.c.bf16 %v3263_v25, %v3262_v4  ;;  %v3266_v31 = vld [vmem:[#allocation2 + $0x80] sm:$0xff]  ;;  %v3267_v51 = vld [vmem:[#allocation2 + $0x88] sm:$0xff]  ;;  %v3264_v32 = vld [vmem:[#allocation2 + $0x70] sm:$0xff] }
 0x2f6   : > { %7234 = vmatmul.mubr.msk.bf16.gmra.mrb[20].mxu1 %vm3213_vm4, %v9161_v39  ;;  %v9208_v45 = vpack.c.bf16 %v3265_v50, %v3264_v32  ;;  %v9210_v47 = vpack.c.bf16 %v3267_v51, %v3266_v31  ;;  %v3268_v61 = vld [vmem:[#allocation2 + $0x90] sm:$0xff]  ;;  %v3273_v23 = vld [vmem:[#allocation2 + $0xb8] sm:$0xff]  ;;  %v3275_v29 = vld [vmem:[#allocation2 + $0xc8] sm:$0xff] }
 0x2f7   : > { %7237 = vmatprep.mubr.msk.bf16.mxu1 %vm3213_vm4, %v9166_v54  ;;  %v3272_v35 = vld [vmem:[#allocation2 + $0xb0] sm:$0xff]  ;;  %v3741_v4 = vld [vmem:[#allocation2 + $0x2] sm:$0xff]  ;;  %v3744_v32 = vld [vmem:[#allocation2 + $0x1a] sm:$0xff] }
 0x2f8   : > { %v9224_v38 = vpack.c.bf16 %v3273_v23, %v3272_v35  ;;  %v3742_v25 = vld [vmem:[#allocation2 + $0xa] sm:$0xff]  ;;  %v3743_v51 = vld [vmem:[#allocation2 + $0x12] sm:$0xff]  ;;  %v3748_v35 = vld [vmem:[#allocation2 + $0x3a] sm:$0xff] }
 0x2f9   : > { %v9172_v3 = vld [vmem:[#allocation2 + $0xd1] sm:$0xff]  ;;  %v3769_v31 = vpack.c.bf16 %v3742_v25, %v3741_v4  ;;  %v3749_v25 = vld [vmem:[#allocation2 + $0x42] sm:$0xff] }
 0x2fa   : > { %v3761_v13 = vld [vmem:[#allocation2 + $0xa2] sm:$0xff] }
 0x2fb   : > { %v3323_v28 = vld [vmem:[#allocation2 + $0xd9] sm:$0x3f]  ;;  %v3765_v17 = vld [vmem:[#allocation2 + $0xc2] sm:$0xff] }
 0x2fc   : > { %v3337_v34 = vpack.c.bf16 %v3323_v28, %v9172_v3  ;;  %v3269_v28 = vld [vmem:[#allocation2 + $0x98] sm:$0xff] }
 0x2fd   : > { %v9216_v16 = vpack.c.bf16 %v3269_v28, %v3268_v61  ;;  %v3746_v28 = vld [vmem:[#allocation2 + $0x2a] sm:$0xff]  ;;  %v8093_v61 = vld [vmem:[%s9770_s3 + $0x38] sm:$0xff]  }
 0x2fe   : > { %7238 = vmatmul.mubr.msk.bf16.gmra.mrb[24].mxu1 %vm3213_vm4, %v3337_v34  ;;  %v3271_v34 = vld [vmem:[#allocation2 + $0xa8] sm:$0xff] }
 0x2ff   : > { %7245 = vmatprep.mubr.msk.bf16.mxu1 %vm3213_vm4, %v3278_v9  ;;  %v3270_v9 = vld [vmem:[#allocation2 + $0xa0] sm:$0xff] }
 0x300   : > { %v9218_v42 = vpack.c.bf16 %v3271_v34, %v3270_v9  ;;  %v9237_v9 = vpack.c.bf16 %v3744_v32, %v3743_v51  ;;  %v3745_v34 = vld [vmem:[#allocation2 + $0x22] sm:$0xff]  ;;  %v3754_v51 = vld [vmem:[#allocation2 + $0x6a] sm:$0xff] }
 0x301   : > { %v9242_v23 = vpack.c.bf16 %v3746_v28, %v3745_v34  ;;  %v3753_v28 = vld [vmem:[#allocation2 + $0x62] sm:$0xff] }
 0x302   : > { %v9261_v34 = vpack.c.bf16 %v3754_v51, %v3753_v28  ;;  %v3762_v51 = vld [vmem:[#allocation2 + $0xaa] sm:$0xff] }
 0x303   : > { %v9277_v20 = vpack.c.bf16 %v3762_v51, %v3761_v13  ;;  %v9291_v13 = vld [vmem:[#allocation2 + $0xd2] sm:$0xff] }
 0x304   : > { %v8096_v51 = vld [vmem:[%s9770_s3 + $0x50] sm:$0xff]  }
 0x306   : > { %7246 = vmatmul.mubr.msk.bf16.vlgmr.msra.gmra.mrb[0].mxu1 %vm3213_vm4, %v9177_v52 }
 0x307   : > { %7249 = vmatprep.mubr.msk.bf16.mxu1 %vm3213_vm4, %v9182_v1  ;;  %7274 = vmatpush3.bf16.msra.mxu1 %v9029_v53  ;;  %v3261_v53 = vld [vmem:[#allocation2 + $0x58] sm:$0xff] }
 0x308   : > { %7275 = vmatprep.subr.bf16.mxu1 %v8091_v40  ;;  %v9200_v6 = vpack.c.bf16 %v3261_v53, %v3260_v10  ;;  %v3277_v53 = vld [vmem:[#allocation2 + $0xd8] sm:$0x3f]  ;;  %v9232_v10 = vld [vmem:[#allocation2 + $0xd0] sm:$0xff] }
 0x309   : > { %v3291_v50 = vpack.c.bf16 %v3277_v53, %v9232_v10  ;;  %v3750_v53 = vld [vmem:[#allocation2 + $0x4a] sm:$0xff] }
 0x30b   : > { %7276 = vmatpush3.bf16.msra.mxu1 %v8091_v40  ;;  %v3274_v40 = vld [vmem:[#allocation2 + $0xc0] sm:$0xff] }
 0x30c   : > { %7305 = vmatprep.subr.bf16.mxu1 %v8092_v11  ;;  %v9226_v62 = vpack.c.bf16 %v3275_v29, %v3274_v40  ;;  %v8094_v40 = vld [vmem:[%s9770_s3 + $0x40] sm:$0xff]   ;;  %v3747_v29 = vld [vmem:[#allocation2 + $0x32] sm:$0xff] }
 0x30d   : > { %v9251_v4 = vpack.c.bf16 %v3748_v35, %v3747_v29  ;;  %v3756_v29 = vld [vmem:[#allocation2 + $0x7a] sm:$0xff]  ;;  %v3758_v35 = vld [vmem:[#allocation2 + $0x8a] sm:$0xff] }
 0x30e   : > { %7250 = vmatmul.mubr.msk.bf16.gmra.mrb[4].mxu1 %vm3213_vm4, %v9192_v63 }
 0x30f   : > { %7253 = vmatprep.mubr.msk.bf16.mxu1 %vm3213_vm4, %v9194_v56 }
 0x316   : > { %7254 = vmatmul.mubr.msk.bf16.gmra.mrb[8].mxu1 %vm3213_vm4, %v9200_v6 }
 0x317   : > { %7257 = vmatprep.mubr.msk.bf16.mxu1 %vm3213_vm4, %v9202_v48 }
 0x31e   : > { %7258 = vmatmul.mubr.msk.bf16.gmra.mrb[12].mxu1 %vm3213_vm4, %v9208_v45 }
 0x31f   : > { %7261 = vmatprep.mubr.msk.bf16.mxu1 %vm3213_vm4, %v9210_v47 }
 0x326   : > { %7262 = vmatmul.mubr.msk.bf16.gmra.mrb[16].mxu1 %vm3213_vm4, %v9216_v16 }
 0x327   : > { %7265 = vmatprep.mubr.msk.bf16.mxu1 %vm3213_vm4, %v9218_v42 }
 0x32e   : > { %7266 = vmatmul.mubr.msk.bf16.gmra.mrb[20].mxu1 %vm3213_vm4, %v9224_v38 }
 0x32f   : > { %7269 = vmatprep.mubr.msk.bf16.mxu1 %vm3213_vm4, %v9226_v62 }
 0x336   : > { %7270 = vmatmul.mubr.msk.bf16.gmra.mrb[24].mxu1 %vm3213_vm4, %v3291_v50  ;;  %v9253_v50 = vpack.c.bf16 %v3750_v53, %v3749_v25  ;;  %v3757_v25 = vld [vmem:[#allocation2 + $0x82] sm:$0xff] }
 0x337   : > { %7277 = vmatprep.mubr.msk.bf16.mxu1 %vm3213_vm4, %v3769_v31  ;;  %v3752_v31 = vld [vmem:[#allocation2 + $0x5a] sm:$0xff]  ;;  %v9269_v7 = vpack.c.bf16 %v3758_v35, %v3757_v25  ;;  %v3766_v35 = vld [vmem:[#allocation2 + $0xca] sm:$0xff] }
 0x338   : > { %v9285_v18 = vpack.c.bf16 %v3766_v35, %v3765_v17  ;;  %v8095_v17 = vld [vmem:[%s9770_s3 + $0x48] sm:$0xff]  }
 0x33e   : > { %7278 = vmatmul.mubr.msk.bf16.vlgmr.msra.gmra.mrb[0].mxu1 %vm3213_vm4, %v9237_v9 }
 0x33f   : > { %7281 = vmatprep.mubr.msk.bf16.mxu1 %vm3213_vm4, %v9242_v23  ;;  %7306 = vmatpush3.bf16.msra.mxu1 %v8092_v11  ;;  %v3751_v11 = vld [vmem:[#allocation2 + $0x52] sm:$0xff] }
 0x340   : > { %7307 = vmatprep.subr.bf16.mxu1 %v8093_v61  ;;  %v9259_v32 = vpack.c.bf16 %v3752_v31, %v3751_v11  ;;  %v3759_v11 = vld [vmem:[#allocation2 + $0x92] sm:$0xff]  ;;  %v3760_v31 = vld [vmem:[#allocation2 + $0x9a] sm:$0xff] }
 0x341   : > { %v9275_v28 = vpack.c.bf16 %v3760_v31, %v3759_v11  ;;  %v3768_v11 = vld [vmem:[#allocation2 + $0xda] sm:$0x3f] }
 0x342   : > { %v3782_v31 = vpack.c.bf16 %v3768_v11, %v9291_v13  ;;  %v8098_v11 = vld [vmem:[%s9770_s3 + $0x60] sm:$0xff]  }
 0x343   : > { %7308 = vmatpush3.bf16.msra.mxu1 %v8093_v61  ;;  %v3755_v61 = vld [vmem:[#allocation2 + $0x72] sm:$0xff] }
 0x344   : > { %7337 = vmatprep.subr.bf16.mxu1 %v8094_v40  ;;  %v9267_v53 = vpack.c.bf16 %v3756_v29, %v3755_v61  ;;  %v3763_v61 = vld [vmem:[#allocation2 + $0xb2] sm:$0xff]  ;;  %v3764_v29 = vld [vmem:[#allocation2 + $0xba] sm:$0xff] }
 0x345   : > { %v9283_v25 = vpack.c.bf16 %v3764_v29, %v3763_v61  ;;  %v9330_v61 = vld [vmem:[#allocation2 + $0xe0] sm:$0xff]  ;;  %v4042_v29 = vld [vmem:[#allocation2 + $0xe8] sm:$0x3f] }
 0x346   : > { %7282 = vmatmul.mubr.msk.bf16.gmra.mrb[4].mxu1 %vm3213_vm4, %v9251_v4  ;;  %v4056_v35 = vpack.c.bf16 %v4042_v29, %v9330_v61  ;;  %v4590_v29 = vld [vmem:[#allocation2 + $0xea] sm:$0x3f] }
 0x347   : > { %7285 = vmatprep.mubr.msk.bf16.mxu1 %vm3213_vm4, %v9253_v50 }
 0x34e   : > { %7286 = vmatmul.mubr.msk.bf16.gmra.mrb[8].mxu1 %vm3213_vm4, %v9259_v32 }
 0x34f   : > { %7289 = vmatprep.mubr.msk.bf16.mxu1 %vm3213_vm4, %v9261_v34 }
 0x356   : > { %7290 = vmatmul.mubr.msk.bf16.gmra.mrb[12].mxu1 %vm3213_vm4, %v9267_v53 }
 0x357   : > { %7293 = vmatprep.mubr.msk.bf16.mxu1 %vm3213_vm4, %v9269_v7 }
 0x35e   : > { %7294 = vmatmul.mubr.msk.bf16.gmra.mrb[16].mxu1 %vm3213_vm4, %v9275_v28 }
 0x35f   : > { %7297 = vmatprep.mubr.msk.bf16.mxu1 %vm3213_vm4, %v9277_v20 }
 0x366   : > { %7298 = vmatmul.mubr.msk.bf16.gmra.mrb[20].mxu1 %vm3213_vm4, %v9283_v25 }
 0x367   : > { %7301 = vmatprep.mubr.msk.bf16.mxu1 %vm3213_vm4, %v9285_v18 }
 0x36e   : > { %7302 = vmatmul.mubr.msk.bf16.gmra.mrb[24].mxu1 %vm3213_vm4, %v3782_v31 }
 0x36f   : > { %7309 = vmatprep.mubr.msk.bf16.mxu1 %vm3213_vm4, %v9177_v52  ;;  %v4040_v52 = vld [vmem:[#allocation2 + $0xd8] sm:$0xff] }
 0x376   : > { %7310 = vmatmul.mubr.msk.bf16.vlgmr.msra.gmra.mrb[0].mxu1 %vm3213_vm4, %v9182_v1 }
 0x377   : > { %7313 = vmatprep.mubr.msk.bf16.mxu1 %vm3213_vm4, %v9192_v63  ;;  %7338 = vmatpush3.bf16.msra.mxu1 %v8094_v40  ;;  %v9324_v40 = vpack.c.bf16 %v4040_v52, %v9232_v10  ;;  %v8097_v10 = vld [vmem:[%s9770_s3 + $0x58] sm:$0xff]   ;;  %v9414_v52 = vld [vmem:[#allocation2 + $0xe2] sm:$0xff] }
 0x378   : > { %7339 = vmatprep.subr.bf16.mxu1 %v8095_v17 }
 0x37b   : > { %7340 = vmatpush3.bf16.msra.mxu1 %v8095_v17  ;;  %v8100_v17 = vld [vmem:[%s9770_s3 + $0x70] sm:$0xff]  }
 0x37c   : > { %7369 = vmatprep.subr.bf16.mxu1 %v8096_v51 }
 0x37e   : > { %7314 = vmatmul.mubr.msk.bf16.gmra.mrb[4].mxu1 %vm3213_vm4, %v9194_v56 }
 0x37f   : > { %7317 = vmatprep.mubr.msk.bf16.mxu1 %vm3213_vm4, %v9200_v6 }
 0x386   : > { %7318 = vmatmul.mubr.msk.bf16.gmra.mrb[8].mxu1 %vm3213_vm4, %v9202_v48 }
 0x387   : > { %7321 = vmatprep.mubr.msk.bf16.mxu1 %vm3213_vm4, %v9208_v45 }
 0x38e   : > { %7322 = vmatmul.mubr.msk.bf16.gmra.mrb[12].mxu1 %vm3213_vm4, %v9210_v47 }
 0x38f   : > { %7325 = vmatprep.mubr.msk.bf16.mxu1 %vm3213_vm4, %v9216_v16 }
 0x396   : > { %7326 = vmatmul.mubr.msk.bf16.gmra.mrb[16].mxu1 %vm3213_vm4, %v9218_v42 }
 0x397   : > { %7329 = vmatprep.mubr.msk.bf16.mxu1 %vm3213_vm4, %v9224_v38 }
 0x39e   : > { %7330 = vmatmul.mubr.msk.bf16.gmra.mrb[20].mxu1 %vm3213_vm4, %v9226_v62 }
 0x39f   : > { %7333 = vmatprep.mubr.msk.bf16.mxu1 %vm3213_vm4, %v9324_v40 }
 0x3a6   : > { %7334 = vmatmul.mubr.msk.bf16.gmra.mrb[24].mxu1 %vm3213_vm4, %v4056_v35  ;;  %v4604_v35 = vpack.c.bf16 %v4590_v29, %v9414_v52 }
 0x3a7   : > { %7341 = vmatprep.mubr.msk.bf16.mxu1 %vm3213_vm4, %v9005_v49  ;;  %v9362_v49 = vld [vmem:[#allocation2 + $0xd9] sm:$0xff] }
 0x3ae   : > { %7342 = vmatmul.mubr.msk.bf16.vlgmr.msra.gmra.mrb[0].mxu1 %vm3213_vm4, %v9015_v12  ;;  %v9366_v12 = vpack.c.bf16 %v9362_v49, %v9172_v3  ;;  %v8099_v3 = vld [vmem:[%s9770_s3 + $0x68] sm:$0xff]  }
 0x3af   : > { %7345 = vmatprep.mubr.msk.bf16.mxu1 %vm3213_vm4, %v9050_v43  ;;  %7370 = vmatpush3.bf16.msra.mxu1 %v8096_v51  ;;  %v9372_v43 = vld [vmem:[#allocation2 + $0xe9] sm:$0x3f] }
 0x3b0   : > { %7371 = vmatprep.subr.bf16.mxu1 %v8097_v10 }
 0x3b3   : > { %7372 = vmatpush3.bf16.msra.mxu1 %v8097_v10  ;;  %v8102_v10 = vld [vmem:[%s9770_s3 + $0x80] sm:$0xff]  }
 0x3b4   : > { %7401 = vmatprep.subr.bf16.mxu1 %v8098_v11 }
 0x3b6   : > { %7346 = vmatmul.mubr.msk.bf16.gmra.mrb[4].mxu1 %vm3213_vm4, %v9058_v46  ;;  %v9374_v46 = vld [vmem:[#allocation2 + $0xe1] sm:$0xff] }
 0x3b7   : > { %7349 = vmatprep.mubr.msk.bf16.mxu1 %vm3213_vm4, %v9083_v58  ;;  %v4330_v31 = vpack.c.bf16 %v9372_v43, %v9374_v46 }
 0x3be   : > { %7350 = vmatmul.mubr.msk.bf16.gmra.mrb[8].mxu1 %vm3213_vm4, %v9090_v14 }
 0x3bf   : > { %7353 = vmatprep.mubr.msk.bf16.mxu1 %vm3213_vm4, %v9113_v19 }
 0x3c6   : > { %7354 = vmatmul.mubr.msk.bf16.gmra.mrb[12].mxu1 %vm3213_vm4, %v9120_v24 }
 0x3c7   : > { %7357 = vmatprep.mubr.msk.bf16.mxu1 %vm3213_vm4, %v9141_v8 }
 0x3ce   : > { %7358 = vmatmul.mubr.msk.bf16.gmra.mrb[16].mxu1 %vm3213_vm4, %v9148_v33 }
 0x3cf   : > { %7361 = vmatprep.mubr.msk.bf16.mxu1 %vm3213_vm4, %v9161_v39 }
 0x3d6   : > { %7362 = vmatmul.mubr.msk.bf16.gmra.mrb[20].mxu1 %vm3213_vm4, %v9166_v54 }
 0x3d7   : > { %7365 = vmatprep.mubr.msk.bf16.mxu1 %vm3213_vm4, %v9366_v12 }
 0x3de   : > { %7366 = vmatmul.mubr.msk.bf16.gmra.mrb[24].mxu1 %vm3213_vm4, %v4330_v31 }
 0x3df   : > { %7373 = vmatprep.mubr.msk.bf16.mxu1 %vm3213_vm4, %v9237_v9  ;;  %v4588_v9 = vld [vmem:[#allocation2 + $0xda] sm:$0xff] }
 0x3e0   : > { %v9408_v51 = vpack.c.bf16 %v4588_v9, %v9291_v13  ;;  %v8101_v13 = vld [vmem:[%s9770_s3 + $0x78] sm:$0xff]  }
 0x3e6   : > { %7374 = vmatmul.mubr.msk.bf16.vlgmr.msra.gmra.mrb[0].mxu1 %vm3213_vm4, %v9242_v23 }
 0x3e7   : > { %7377 = vmatprep.mubr.msk.bf16.mxu1 %vm3213_vm4, %v9251_v4  ;;  %7402 = vmatpush3.bf16.msra.mxu1 %v8098_v11 }
 0x3e8   : > { %7403 = vmatprep.subr.bf16.mxu1 %v8099_v3 }
 0x3eb   : > { %7404 = vmatpush3.bf16.msra.mxu1 %v8099_v3 }
 0x3ec   : > { %7433 = vmatprep.subr.bf16.mxu1 %v8100_v17 }
 0x3ee   : > { %7378 = vmatmul.mubr.msk.bf16.gmra.mrb[4].mxu1 %vm3213_vm4, %v9253_v50 }
 0x3ef   : > { %7381 = vmatprep.mubr.msk.bf16.mxu1 %vm3213_vm4, %v9259_v32 }
 0x3f6   : > { %7382 = vmatmul.mubr.msk.bf16.gmra.mrb[8].mxu1 %vm3213_vm4, %v9261_v34 }
 0x3f7   : > { %7385 = vmatprep.mubr.msk.bf16.mxu1 %vm3213_vm4, %v9267_v53 }
 0x3fe   : > { %7386 = vmatmul.mubr.msk.bf16.gmra.mrb[12].mxu1 %vm3213_vm4, %v9269_v7 }
 0x3ff   : > { %7389 = vmatprep.mubr.msk.bf16.mxu1 %vm3213_vm4, %v9275_v28 }
 0x406   : > { %7390 = vmatmul.mubr.msk.bf16.gmra.mrb[16].mxu1 %vm3213_vm4, %v9277_v20 }
 0x407   : > { %7393 = vmatprep.mubr.msk.bf16.mxu1 %vm3213_vm4, %v9283_v25 }
 0x40e   : > { %7394 = vmatmul.mubr.msk.bf16.gmra.mrb[20].mxu1 %vm3213_vm4, %v9285_v18 }
 0x40f   : > { %7397 = vmatprep.mubr.msk.bf16.mxu1 %vm3213_vm4, %v9408_v51 }
 0x416   : > { %7398 = vmatmul.mubr.msk.bf16.gmra.mrb[24].mxu1 %vm3213_vm4, %v4604_v35 }
 0x417   : > { %7405 = vmatprep.mubr.msk.bf16.mxu1 %vm3213_vm4, %v9182_v1  ;;  %v4862_v1 = vld [vmem:[#allocation2 + $0xe8] sm:$0xff] }
 0x41e   : > { %7406 = vmatmul.mubr.msk.bf16.vlgmr.msra.gmra.mrb[0].mxu1 %vm3213_vm4, %v9192_v63  ;;  %v4877_v63 = vpack.c.bf16 %v4862_v1, %v9330_v61  ;;  %v5115_v61 = vld [vmem:[#allocation2 + $0x41] sm:$0xff] }
 0x41f   : > { %7409 = vmatprep.mubr.msk.bf16.mxu1 %vm3213_vm4, %v9194_v56  ;;  %7434 = vmatpush3.bf16.msra.mxu1 %v8100_v17  ;;  %v4863_v56 = vld [vmem:[#allocation2 + $0xf0] sm:$0xff] }
 0x420   : > { %7435 = vmatprep.subr.bf16.mxu1 %v8101_v13 }
 0x423   : > { %7436 = vmatpush3.bf16.msra.mxu1 %v8101_v13 }
 0x424   : > { %7465 = vmatprep.subr.bf16.mxu1 %v8102_v10 }
 0x426   : > { %7410 = vmatmul.mubr.msk.bf16.gmra.mrb[4].mxu1 %vm3213_vm4, %v9200_v6  ;;  %v4864_v6 = vld [vmem:[#allocation2 + $0xf8] sm:$0x3f] }
 0x427   : > { %7413 = vmatprep.mubr.msk.bf16.mxu1 %vm3213_vm4, %v9202_v48  ;;  %v4878_v48 = vpack.c.bf16 %v4864_v6, %v4863_v56 }
 0x42e   : > { %7414 = vmatmul.mubr.msk.bf16.gmra.mrb[8].mxu1 %vm3213_vm4, %v9208_v45  ;;  %v5112_v45 = vld [vmem:[#allocation2 + $0x29] sm:$0xff] }
 0x42f   : > { %7417 = vmatprep.mubr.msk.bf16.mxu1 %vm3213_vm4, %v9210_v47  ;;  %v5111_v47 = vld [vmem:[#allocation2 + $0x21] sm:$0xff] }
 0x436   : > { %7418 = vmatmul.mubr.msk.bf16.gmra.mrb[12].mxu1 %vm3213_vm4, %v9216_v16  ;;  %v5139_v16 = vpack.c.bf16 %v5112_v45, %v5111_v47 }
 0x437   : > { %7421 = vmatprep.mubr.msk.bf16.mxu1 %vm3213_vm4, %v9218_v42  ;;  %v5114_v42 = vld [vmem:[#allocation2 + $0x39] sm:$0xff] }
 0x43e   : > { %7422 = vmatmul.mubr.msk.bf16.gmra.mrb[16].mxu1 %vm3213_vm4, %v9224_v38  ;;  %v5116_v38 = vld [vmem:[#allocation2 + $0x49] sm:$0xff] }
 0x43f   : > { %7425 = vmatprep.mubr.msk.bf16.mxu1 %vm3213_vm4, %v9226_v62  ;;  %v5113_v62 = vld [vmem:[#allocation2 + $0x31] sm:$0xff]  ;;  %v5141_v31 = vpack.c.bf16 %v5116_v38, %v5115_v61 }
 0x440   : > { %v5140_v11 = vpack.c.bf16 %v5114_v42, %v5113_v62 }
 0x446   : > { %7426 = vmatmul.mubr.msk.bf16.gmra.mrb[20].mxu1 %vm3213_vm4, %v9324_v40  ;;  %v8103_v40 = vld [vmem:[%s9770_s3 + $0x88] sm:$0xff]  }
 0x447   : > { %7429 = vmatprep.mubr.msk.bf16.mxu1 %vm3213_vm4, %v4877_v63 }
 0x44e   : > { %7430 = vmatmul.mubr.msk.bf16.gmra.mrb[24].mxu1 %vm3213_vm4, %v4878_v48 }
 0x44f   : > { %7437 = vmatprep.mubr.msk.bf16.mxu1 %vm3213_vm4, %v5139_v16 }
 0x456   : > { %7438 = vmatmul.mubr.msk.bf16.vlgmr.msra.gmra.mrb[0].mxu1 %vm3213_vm4, %v5140_v11 }
 0x457   : > { %7441 = vmatprep.mubr.msk.bf16.mxu1 %vm3213_vm4, %v5141_v31  ;;  %7466 = vmatpush3.bf16.msra.mxu1 %v8102_v10 }
 0x458   : > { %7467 = vmatprep.subr.bf16.mxu1 %v8103_v40 }
 0x45b   : > { %7468 = vmatpush3.bf16.msra.mxu1 %v8103_v40 }
 0x45e   : > { %7442 = vmatmul.mubr.msk.bf16.gmra.mrb[4].mxu1 %vm3213_vm4, %v9083_v58  ;;  %v5136_v58 = vld [vmem:[#allocation2 + $0xe9] sm:$0xff] }
 0x45f   : > { %7445 = vmatprep.mubr.msk.bf16.mxu1 %vm3213_vm4, %v9090_v14  ;;  %v5151_v14 = vpack.c.bf16 %v5136_v58, %v9374_v46 }
 0x466   : > { %7446 = vmatmul.mubr.msk.bf16.gmra.mrb[8].mxu1 %vm3213_vm4, %v9113_v19  ;;  %v5137_v19 = vld [vmem:[#allocation2 + $0xf1] sm:$0xff] }
 0x467   : > { %7449 = vmatprep.mubr.msk.bf16.mxu1 %vm3213_vm4, %v9120_v24  ;;  %v5138_v24 = vld [vmem:[#allocation2 + $0xf9] sm:$0x3f] }
 0x46e   : > { %7450 = vmatmul.mubr.msk.bf16.gmra.mrb[12].mxu1 %vm3213_vm4, %v9141_v8  ;;  %v5152_v8 = vpack.c.bf16 %v5138_v24, %v5137_v19 }
 0x46f   : > { %7453 = vmatprep.mubr.msk.bf16.mxu1 %vm3213_vm4, %v9148_v33  ;;  %v5410_v33 = vld [vmem:[#allocation2 + $0xea] sm:$0xff] }
 0x476   : > { %7454 = vmatmul.mubr.msk.bf16.gmra.mrb[16].mxu1 %vm3213_vm4, %v9161_v39  ;;  %v5425_v39 = vpack.c.bf16 %v5410_v33, %v9414_v52 }
 0x477   : > { %7457 = vmatprep.mubr.msk.bf16.mxu1 %vm3213_vm4, %v9166_v54  ;;  %v5412_v54 = vld [vmem:[#allocation2 + $0xfa] sm:$0x3f] }
 0x47e   : > { %7458 = vmatmul.mubr.msk.bf16.gmra.mrb[20].mxu1 %vm3213_vm4, %v9366_v12 }
 0x47f   : > { %7461 = vmatprep.mubr.msk.bf16.mxu1 %vm3213_vm4, %v5151_v14 }
 0x486   : > { %7462 = vmatmul.mubr.msk.bf16.gmra.mrb[24].mxu1 %vm3213_vm4, %v5152_v8 }
 0x487   : > { %7469 = vmatprep.mubr.msk.bf16.mxu1 %vm3213_vm4, %v9242_v23 }
 0x48e   : > { %7470 = vmatmul.mubr.msk.bf16.vlgmr.msra.gmra.mrb[0].mxu1 %vm3213_vm4, %v9251_v4  ;;  %v9513_v4 = vld [vmem:[%s9771_s4] ss:$0 sm:$0xff] }
 0x48f   : > { %7473 = vmatprep.mubr.msk.bf16.mxu1 %vm3213_vm4, %v9253_v50 }
 0x496   : > { %7474 = vmatmul.mubr.msk.bf16.gmra.mrb[4].mxu1 %vm3213_vm4, %v9259_v32 }
 0x497   : > { %7477 = vmatprep.mubr.msk.bf16.mxu1 %vm3213_vm4, %v9261_v34 }
 0x49e   : > { %7478 = vmatmul.mubr.msk.bf16.gmra.mrb[8].mxu1 %vm3213_vm4, %v9267_v53 }
 0x49f   : > { %7481 = vmatprep.mubr.msk.bf16.mxu1 %vm3213_vm4, %v9269_v7  ;;  %v5411_v7 = vld [vmem:[#allocation2 + $0xf2] sm:$0xff] }
 0x4a0   : > { %v5426_v23 = vpack.c.bf16 %v5412_v54, %v5411_v7 }
 0x4a6   : > { %7482 = vmatmul.mubr.msk.bf16.gmra.mrb[12].mxu1 %vm3213_vm4, %v9275_v28 }
 0x4a7   : > { %7485 = vmatprep.mubr.msk.bf16.mxu1 %vm3213_vm4, %v9277_v20  ;;  %v8173_v20 = vmov 0.0|0.0  }
 0x4a8   : > { %7497 = vmatprep.subr.bf16.mxu0 %v8173_v20 }
 0x4ae   : > { %7486 = vmatmul.mubr.msk.bf16.gmra.mrb[16].mxu1 %vm3213_vm4, %v9283_v25 }
 0x4af   : > { %7489 = vmatprep.mubr.msk.bf16.mxu1 %vm3213_vm4, %v9285_v18  ;;  %v6117_v18 = vld [vmem:[%s9773_s6 + $0x8] sm:$0xff] }
 0x4b0   : > { %6651 = vmatprep.mubr.msk.f32.mxu0 %vm6120_vm7, %v6117_v18 }
 0x4b6   : > { %7490 = vmatmul.mubr.msk.bf16.gmra.mrb[20].mxu1 %vm3213_vm4, %v9408_v51 }
 0x4b7   : > { %7493 = vmatprep.mubr.msk.bf16.mxu1 %vm3213_vm4, %v5425_v39 }
 0x4be   : > { %7494 = vmatmul.mubr.msk.bf16.gmra.mrb[24].mxu1 %vm3213_vm4, %v5426_v23 }
 0x561   : > { %v7471_v50 = vpop.f32.mrb[0].mxu1 }
 0x562   : > { %v5668_v32 = vadd.f32 %v7471_v50, %v9513_v4  ;;  %v5520_v34 = vpop.f32.mrb[1].mxu1 }
 0x563   : > { %v5666_v53 = vadd.f32 %v9513_v4, %v5520_v34  ;;  %v7472_v28 = vpop.f32.mrb[2].mxu1 }
 0x564   : > { %v5696_v25 = vadd.f32 %v5668_v32, %v9007_v59  ;;  %v5669_v12 = vadd.f32 %v7472_v28, %v9513_v4  ;;  %v5523_v3 = vpop.f32.mrb[3].mxu1 }
 0x565   : > { %v5694_v17 = vadd.f32 %v5666_v53, %v8995_v57  ;;  %v5667_v9 = vadd.f32 %v9513_v4, %v5523_v3 }
 0x566   : > { %vm5724_vm8 = vcmp.ge.f32.partialorder %v5696_v25, 0.0  ;;  %v5752_v51 = vmul.f32 0.01, %v5696_v25  ;;  %v5697_v52 = vadd.f32 %v5669_v12, %v8991_v5 }
 0x567   : > { %vm5722_vm9 = vcmp.ge.f32.partialorder %v5694_v17, 0.0  ;;  %v5750_v29 = vmul.f32 0.01, %v5694_v17  ;;  %v5695_v35 = vadd.f32 %v5667_v9, %v8997_v2 }
 0x568   : > { %v5780_v13 = vsel %vm5724_vm8, %v5696_v25, %v5752_v51  ;;  %vm5725_vm10 = vcmp.ge.f32.partialorder %v5697_v52, 0.0  ;;  %v5753_v10 = vmul.f32 0.01, %v5697_v52 }
 0x569   : > { %5808 = vst.msk [vmem:[#allocation3 + $0x10] sm:$0xff] %vm3213_vm4, %v5780_v13  ;;  %v5778_v59 = vsel %vm5722_vm9, %v5694_v17, %v5750_v29  ;;  %vm5723_vm11 = vcmp.ge.f32.partialorder %v5695_v35, 0.0  ;;  %v5751_v1 = vmul.f32 0.01, %v5695_v35  ;;  %v7475_v63 = vpop.f32.mrb[4].mxu1 }
 0x56a   : > { %5806 = vst.msk [vmem:[#allocation3] sm:$0xff] %vm3213_vm4, %v5778_v59  ;;  %v5781_v57 = vsel %vm5725_vm10, %v5697_v52, %v5753_v10  ;;  %v5672_v56 = vadd.f32 %v7475_v63, %v9513_v4  ;;  %v5536_v6 = vpop.f32.mrb[5].mxu1 }
 0x56b   : > { %5809 = vst.msk [vmem:[#allocation3 + $0x18] sm:$0xff] %vm3213_vm4, %v5781_v57  ;;  %v5779_v5 = vsel %vm5723_vm11, %v5695_v35, %v5751_v1  ;;  %v5670_v2 = vadd.f32 %v9513_v4, %v5536_v6  ;;  %v7476_v48 = vpop.f32.mrb[6].mxu1 }
 0x56c   : > { %5807 = vst.msk [vmem:[#allocation3 + $0x8] sm:$0xff] %vm3213_vm4, %v5779_v5  ;;  %v5700_v45 = vadd.f32 %v5672_v56, %v9052_v44  ;;  %v5673_v47 = vadd.f32 %v7476_v48, %v9513_v4  ;;  %v5539_v16 = vpop.f32.mrb[7].mxu1 }
 0x56d   : > { %v5698_v42 = vadd.f32 %v5670_v2, %v9042_v36  ;;  %v5671_v38 = vadd.f32 %v9513_v4, %v5539_v16 }
 0x56e   : > { %vm5728_vm12 = vcmp.ge.f32.partialorder %v5700_v45, 0.0  ;;  %v5756_v62 = vmul.f32 0.01, %v5700_v45  ;;  %v5701_v11 = vadd.f32 %v5673_v47, %v9038_v30 }
 0x56f   : > { %vm5726_vm13 = vcmp.ge.f32.partialorder %v5698_v42, 0.0  ;;  %v5754_v61 = vmul.f32 0.01, %v5698_v42  ;;  %v5699_v40 = vadd.f32 %v5671_v38, %v9044_v27 }
 0x570   : > { %v5784_v31 = vsel %vm5728_vm12, %v5700_v45, %v5756_v62  ;;  %vm5729_vm14 = vcmp.ge.f32.partialorder %v5701_v11, 0.0  ;;  %v5757_v58 = vmul.f32 0.01, %v5701_v11  ;;  %v5836_v33 = vld [vmem:[#allocation3 + $0x10] sm:$0xff] }
 0x571   : > { %5812 = vst.msk [vmem:[#allocation3 + $0x30] sm:$0xff] %vm3213_vm4, %v5784_v31  ;;  %v5782_v44 = vsel %vm5726_vm13, %v5698_v42, %v5754_v61  ;;  %vm5727_vm15 = vcmp.ge.f32.partialorder %v5699_v40, 0.0  ;;  %v5755_v14 = vmul.f32 0.01, %v5699_v40  ;;  %v7479_v19 = vpop.f32.mrb[8].mxu1  ;;  %v5834_v30 = vld [vmem:[#allocation3] sm:$0xff] }
 0x572   : > { %5810 = vst.msk [vmem:[#allocation3 + $0x20] sm:$0xff] %vm3213_vm4, %v5782_v44  ;;  %v5785_v36 = vsel %vm5729_vm14, %v5701_v11, %v5757_v58  ;;  %v5676_v24 = vadd.f32 %v7479_v19, %v9513_v4  ;;  %v5552_v8 = vpop.f32.mrb[9].mxu1  ;;  %v5860_v39 = vld [vmem:[#allocation3 + $0x11] sm:$0xff] }
 0x573   : > { %5813 = vst.msk [vmem:[#allocation3 + $0x38] sm:$0xff] %vm3213_vm4, %v5785_v36  ;;  %v5783_v27 = vsel %vm5727_vm15, %v5699_v40, %v5755_v14  ;;  %v5674_v7 = vadd.f32 %v9513_v4, %v5552_v8  ;;  %v7480_v54 = vpop.f32.mrb[10].mxu1  ;;  %v5835_v23 = vld [vmem:[#allocation3 + $0x8] sm:$0xff]  ;;  %v5884_v32 = vmax.f32 %v5836_v33, %v5860_v39  ;;  %v9543_v3 = vld [vmem:[#allocation3 + $0x12] sm:$0xff] }
 0x574   : > { %v5858_v18 = vld [vmem:[#allocation3 + $0x1] sm:$0xff]  ;;  %v5859_v50 = vld [vmem:[#allocation3 + $0x9] sm:$0xff]  ;;  %5811 = vst.msk [vmem:[#allocation3 + $0x28] sm:$0xff] %vm3213_vm4, %v5783_v27  ;;  %v5704_v34 = vadd.f32 %v5676_v24, %v9085_v60  ;;  %v5677_v53 = vadd.f32 %v7480_v54, %v9513_v4  ;;  %v5555_v28 = vpop.f32.mrb[11].mxu1 }
 0x575   : > { %v5882_v25 = vmax.f32 %v5834_v30, %v5858_v18  ;;  %v5883_v12 = vmax.f32 %v5835_v23, %v5859_v50  ;;  %v5702_v17 = vadd.f32 %v5674_v7, %v9075_v0  ;;  %v5675_v9 = vadd.f32 %v9513_v4, %v5555_v28  ;;  %v5906_v51 = vld [vmem:[#allocation3 + $0x2] sm:$0xff]  ;;  %v5907_v13 = vld [vmem:[#allocation3 + $0xa] sm:$0xff]  ;;  %v5837_v0 = vld [vmem:[#allocation3 + $0x18] sm:$0xff] }
 0x576   : > { %v5932_v52 = vmax.f32 %v5884_v32, %v9543_v3  ;;  %vm5732_vm1 = vcmp.ge.f32.partialorder %v5704_v34, 0.0  ;;  %v5760_v29 = vmul.f32 0.01, %v5704_v34  ;;  %v5705_v35 = vadd.f32 %v5677_v53, %v9071_v41 }
 0x577   : > { %v5930_v60 = vmax.f32 %v5882_v25, %v5906_v51  ;;  %vm5730_vm2 = vcmp.ge.f32.partialorder %v5702_v17, 0.0  ;;  %v5758_v10 = vmul.f32 0.01, %v5702_v17  ;;  %v5703_v59 = vadd.f32 %v5675_v9, %v9077_v55 }
 0x578   : > { %v5931_v1 = vmax.f32 %v5883_v12, %v5907_v13  ;;  %v5788_v63 = vsel %vm5732_vm1, %v5704_v34, %v5760_v29  ;;  %vm5733_vm3 = vcmp.ge.f32.partialorder %v5705_v35, 0.0  ;;  %v5761_v57 = vmul.f32 0.01, %v5705_v35 }
 0x579   : > { %v5957_v56 = vmax.f32 %v5930_v60, %v5836_v33  ;;  %5816 = vst.msk [vmem:[#allocation3 + $0x50] sm:$0xff] %vm3213_vm4, %v5788_v63  ;;  %v5786_v6 = vsel %vm5730_vm2, %v5702_v17, %v5758_v10  ;;  %vm5731_vm5 = vcmp.ge.f32.partialorder %v5703_v59, 0.0  ;;  %v5759_v5 = vmul.f32 0.01, %v5703_v59  ;;  %v7483_v2 = vpop.f32.mrb[12].mxu1  ;;  %v5838_v48 = vld [vmem:[#allocation3 + $0x20] sm:$0xff] }
 0x57a   : > { %v5861_v41 = vld [vmem:[#allocation3 + $0x19] sm:$0xff]  ;;  %v5958_v45 = vmax.f32 %v5931_v1, %v5837_v0  ;;  %5814 = vst.msk [vmem:[#allocation3 + $0x40] sm:$0xff] %vm3213_vm4, %v5786_v6  ;;  %v5789_v47 = vsel %vm5733_vm3, %v5705_v35, %v5761_v57  ;;  %v5680_v55 = vadd.f32 %v7483_v2, %v9513_v4  ;;  %v5568_v16 = vpop.f32.mrb[13].mxu1  ;;  %v5959_v38 = vmax.f32 %v5932_v52, %v5838_v48  ;;  %v9588_v60 = vld [vmem:[#allocation3 + $0x31] sm:$0xff] }
 0x57b   : > { %v5885_v42 = vmax.f32 %v5837_v0, %v5861_v41  ;;  %5817 = vst.msk [vmem:[#allocation3 + $0x58] sm:$0xff] %vm3213_vm4, %v5789_v47  ;;  %v5787_v62 = vsel %vm5731_vm5, %v5703_v59, %v5759_v5  ;;  %v5678_v11 = vadd.f32 %v9513_v4, %v5568_v16  ;;  %v7484_v61 = vpop.f32.mrb[14].mxu1  ;;  %v5839_v40 = vld [vmem:[#allocation3 + $0x28] sm:$0xff]  ;;  %v5984_v44 = vmax.f32 %v5957_v56, %v5860_v39  ;;  %v5909_v33 = vld [vmem:[#allocation3 + $0x1a] sm:$0xff]  ;;  %v5840_v2 = vld [vmem:[#allocation3 + $0x30] sm:$0xff] }
 0x57c   : > { %v9555_v31 = vld [vmem:[#allocation3 + $0x21] sm:$0xff]  ;;  %v9557_v58 = vld [vmem:[#allocation3 + $0x29] sm:$0xff]  ;;  %v5985_v14 = vmax.f32 %v5958_v45, %v5861_v41  ;;  %5815 = vst.msk [vmem:[#allocation3 + $0x48] sm:$0xff] %vm3213_vm4, %v5787_v62  ;;  %v5708_v19 = vadd.f32 %v5680_v55, %v9115_v22  ;;  %v5681_v36 = vadd.f32 %v7484_v61, %v9513_v4  ;;  %v5571_v24 = vpop.f32.mrb[15].mxu1 }
 0x57d   : > { %v5886_v8 = vmax.f32 %v5838_v48, %v9555_v31  ;;  %v5887_v30 = vmax.f32 %v5839_v40, %v9557_v58  ;;  %v5706_v27 = vadd.f32 %v5678_v11, %v9105_v21  ;;  %v5679_v7 = vadd.f32 %v9513_v4, %v5571_v24  ;;  %v9566_v54 = vld [vmem:[#allocation3 + $0x22] sm:$0xff]  ;;  %v9572_v50 = vld [vmem:[#allocation3 + $0x2a] sm:$0xff] }
 0x57e   : > { %v5933_v39 = vmax.f32 %v5885_v42, %v5909_v33  ;;  %v9569_v23 = vmax.f32 %v5959_v38, %v9555_v31  ;;  %vm5736_vm8 = vcmp.ge.f32.partialorder %v5708_v19, 0.0  ;;  %v5764_v22 = vmul.f32 0.01, %v5708_v19  ;;  %v9787_v41 = vld [vmem:[#allocation8_spill] sm:$0xff]  ;;  %v9788_v42 = vld [vmem:[#allocation7_spill] sm:$0xff]  ;;  %v9789_v61 = vld [vmem:[#allocation9_spill] sm:$0xff] }
 0x57f   : > { %v5709_v18 = vadd.f32 %v5681_v36, %v9101_v37  ;;  %v9575_v32 = vmax.f32 %v5886_v8, %v9566_v54  ;;  %vm5734_vm9 = vcmp.ge.f32.partialorder %v5706_v27, 0.0  ;;  %v5762_v34 = vmul.f32 0.01, %v5706_v27  ;;  %v5841_v36 = vld [vmem:[#allocation3 + $0x38] sm:$0xff] }
 0x580   : > { %v5707_v21 = vadd.f32 %v5679_v7, %v9107_v26  ;;  %v9579_v53 = vmax.f32 %v5887_v30, %v9572_v50  ;;  %v5792_v28 = vsel %vm5736_vm8, %v5708_v19, %v5764_v22  ;;  %v5960_v12 = vmax.f32 %v5933_v39, %v5839_v40 }
 0x581   : > { %vm5737_vm10 = vcmp.ge.f32.partialorder %v5709_v18, 0.0  ;;  %v5765_v25 = vmul.f32 0.01, %v5709_v18  ;;  %5820 = vst.msk [vmem:[#allocation3 + $0x70] sm:$0xff] %vm3213_vm4, %v5792_v28  ;;  %v5790_v17 = vsel %vm5734_vm9, %v5706_v27, %v5762_v34  ;;  %v7487_v9 = vpop.f32.mrb[16].mxu1  ;;  %v6011_v51 = vmax.f32 %v5984_v44, %v9543_v3  ;;  %v9605_v62 = vld [vmem:[#allocation3 + $0x39] sm:$0xff] }
 0x582   : > { %vm5735_vm11 = vcmp.ge.f32.partialorder %v5707_v21, 0.0  ;;  %v5763_v37 = vmul.f32 0.01, %v5707_v21  ;;  %5818 = vst.msk [vmem:[#allocation3 + $0x60] sm:$0xff] %vm3213_vm4, %v5790_v17  ;;  %v5684_v26 = vadd.f32 %v7487_v9, %v9513_v4  ;;  %v5584_v29 = vpop.f32.mrb[17].mxu1  ;;  %v9586_v35 = vmax.f32 %v5960_v12, %v9557_v58 }
 0x583   : > { %v5793_v52 = vsel %vm5737_vm10, %v5709_v18, %v5765_v25  ;;  %v6012_v13 = vmax.f32 %v5985_v14, %v5909_v33  ;;  %v5682_v59 = vadd.f32 %v9513_v4, %v5584_v29  ;;  %v7488_v1 = vpop.f32.mrb[18].mxu1  ;;  %v6013_v3 = vmax.f32 %v9569_v23, %v9566_v54  ;;  %v9612_v33 = vld [vmem:[#allocation3 + $0x32] sm:$0xff]  ;;  %v9616_v23 = vld [vmem:[#allocation3 + $0x3a] sm:$0xff] }
 0x584   : > { %5821 = vst.msk [vmem:[#allocation3 + $0x78] sm:$0xff] %vm3213_vm4, %v5793_v52  ;;  %v5791_v10 = vsel %vm5735_vm11, %v5707_v21, %v5763_v37  ;;  %v6038_v63 = vmax.f32 %v6011_v51, %v5838_v48  ;;  %v5712_v57 = vadd.f32 %v5684_v26, %v9143_v15  ;;  %v5685_v0 = vadd.f32 %v7488_v1, %v9513_v4  ;;  %v5587_v56 = vpop.f32.mrb[19].mxu1  ;;  %v9790_v25 = vld [vmem:[#allocation11_spill] sm:$0xff]  ;;  %v9791_v52 = vld [vmem:[#allocation10_spill] sm:$0xff] }
 0x585   : > { %5819 = vst.msk [vmem:[#allocation3 + $0x68] sm:$0xff] %vm3213_vm4, %v5791_v10  ;;  %v6014_v6 = vmax.f32 %v9586_v35, %v9572_v50  ;;  %v6039_v5 = vmax.f32 %v6012_v13, %v5839_v40  ;;  %v5710_v45 = vadd.f32 %v5682_v59, %v9787_v41  ;;  %v5683_v47 = vadd.f32 %v9513_v4, %v5587_v56  ;;  %v8104_v10 = vld [vmem:[#allocation2 + $0xc9] sm:$0xff]  ;;  %v5866_v56 = vld [vmem:[#allocation3 + $0x41] sm:$0xff] }
 0x586   : > { %v6065_v55 = vmax.f32 %v6038_v63, %v9555_v31  ;;  %v5888_v48 = vmax.f32 %v5840_v2, %v9588_v60  ;;  %vm5740_vm12 = vcmp.ge.f32.partialorder %v5712_v57, 0.0  ;;  %v5768_v16 = vmul.f32 0.01, %v5712_v57 }
 0x587   : > { %v5713_v15 = vadd.f32 %v5685_v0, %v9788_v42  ;;  %v6066_v38 = vmax.f32 %v6039_v5, %v9557_v58  ;;  %vm5738_vm13 = vcmp.ge.f32.partialorder %v5710_v45, 0.0  ;;  %v5766_v11 = vmul.f32 0.01, %v5710_v45  ;;  %v5843_v0 = vld [vmem:[#allocation3 + $0x48] sm:$0xff] }
 0x588   : > { %v5711_v40 = vadd.f32 %v5683_v47, %v9789_v61  ;;  %v6092_v44 = vmax.f32 %v6065_v55, %v9566_v54  ;;  %v5796_v14 = vsel %vm5740_vm12, %v5712_v57, %v5768_v16  ;;  %v5889_v30 = vmax.f32 %v5841_v36, %v9605_v62  ;;  %v8105_v57 = vld [vmem:[#allocation2 + $0xb9] sm:$0xff]  ;;  %v5867_v5 = vld [vmem:[#allocation3 + $0x49] sm:$0xff] }
 0x589   : > { %vm5741_vm14 = vcmp.ge.f32.partialorder %v5713_v15, 0.0  ;;  %v5769_v19 = vmul.f32 0.01, %v5713_v15  ;;  %v6093_v31 = vmax.f32 %v6066_v38, %v9572_v50  ;;  %5824 = vst.msk [vmem:[#allocation3 + $0x90] sm:$0xff] %vm3213_vm4, %v5796_v14  ;;  %v5794_v24 = vsel %vm5738_vm13, %v5710_v45, %v5766_v11  ;;  %v7491_v58 = vpop.f32.mrb[20].mxu1  ;;  %v5842_v45 = vld [vmem:[#allocation3 + $0x40] sm:$0xff] }
 0x58a   : > { %vm5739_vm15 = vcmp.ge.f32.partialorder %v5711_v40, 0.0  ;;  %v5767_v8 = vmul.f32 0.01, %v5711_v40  ;;  %5822 = vst.msk [vmem:[#allocation3 + $0x80] sm:$0xff] %vm3213_vm4, %v5794_v24  ;;  %v5688_v54 = vadd.f32 %v7491_v58, %v9513_v4  ;;  %v5600_v39 = vpop.f32.mrb[21].mxu1  ;;  %v9619_v22 = vmax.f32 %v5888_v48, %v9612_v33  ;;  %v9642_v14 = vld [vmem:[#allocation3 + $0x42] sm:$0xff] }
 0x58b   : > { %v5797_v27 = vsel %vm5741_vm14, %v5713_v15, %v5769_v19  ;;  %v7498_v7 = vpack.c.bf16 %v6093_v31, %v6092_v44  ;;  %v5686_v50 = vadd.f32 %v9513_v4, %v5600_v39  ;;  %v7492_v34 = vpop.f32.mrb[22].mxu1  ;;  %v5937_v21 = vmax.f32 %v5889_v30, %v9616_v23  ;;  %v9644_v19 = vld [vmem:[#allocation3 + $0x4a] sm:$0xff] }
 0x58c   : > { %5825 = vst.msk [vmem:[#allocation3 + $0x98] sm:$0xff] %vm3213_vm4, %v5797_v27  ;;  %v5795_v18 = vsel %vm5739_vm15, %v5711_v40, %v5767_v8  ;;  %v5961_v28 = vmax.f32 %v9575_v32, %v5840_v2  ;;  %v5716_v12 = vadd.f32 %v5688_v54, %v9790_v25  ;;  %v5689_v17 = vadd.f32 %v7492_v34, %v9513_v4  ;;  %v5603_v37 = vpop.f32.mrb[23].mxu1  ;;  %v9656_v34 = vld [vmem:[#allocation3 + $0x51] sm:$0xff] }
 0x58d   : > { %5823 = vst.msk [vmem:[#allocation3 + $0x88] sm:$0xff] %vm3213_vm4, %v5795_v18  ;;  %7499 = vmatpush1.bf16.msra.mxu0 %v7498_v7  ;;  %v5962_v9 = vmax.f32 %v9579_v53, %v5841_v36  ;;  %v6040_v51 = vmax.f32 %v6013_v3, %v5840_v2  ;;  %v5714_v26 = vadd.f32 %v5686_v50, %v9791_v52  ;;  %v5844_v52 = vld [vmem:[#allocation3 + $0x50] sm:$0xff] }
 0x58e   : > { %7500 = vmatprep.subr.bf16.mxu0 %v8173_v20  ;;  %v5687_v29 = vadd.f32 %v9513_v4, %v5603_v37  ;;  %v5988_v35 = vmax.f32 %v5961_v28, %v9588_v60  ;;  %v6041_v32 = vmax.f32 %v6014_v6, %v5841_v36  ;;  %vm5744_vm1 = vcmp.ge.f32.partialorder %v5716_v12, 0.0 }
 0x58f   : > { %v5772_v13 = vmul.f32 0.01, %v5716_v12  ;;  %v5717_v59 = vadd.f32 %v8104_v10, %v5689_v17  ;;  %v5989_v1 = vmax.f32 %v5962_v9, %v9605_v62  ;;  %vm5742_vm2 = vcmp.ge.f32.partialorder %v5714_v26, 0.0  ;;  %v8106_v17 = vld [vmem:[#allocation2 + $0xd1] sm:$0xff] }
 0x590   : > { %v5770_v63 = vmul.f32 0.01, %v5714_v26  ;;  %v5715_v53 = vadd.f32 %v8105_v57, %v5687_v29  ;;  %v6015_v3 = vmax.f32 %v5988_v35, %v9612_v33  ;;  %v6067_v48 = vmax.f32 %v6040_v51, %v9588_v60  ;;  %v5917_v57 = vld [vmem:[#allocation3 + $0x5a] sm:$0xff] }
 0x591   : > { %v5800_v2 = vsel %vm5744_vm1, %v5716_v12, %v5772_v13  ;;  %vm5745_vm3 = vcmp.ge.f32.partialorder %v5717_v59, 0.0  ;;  %v5773_v41 = vmul.f32 0.01, %v5717_v59  ;;  %v6016_v6 = vmax.f32 %v5989_v1, %v9616_v23  ;;  %v7495_v16 = vpop.f32.mrb[24].mxu1 }
 0x592   : > { %5828 = vst.msk [vmem:[#allocation3 + $0xb0] sm:$0xff] %vm3213_vm4, %v5800_v2  ;;  %v5798_v47 = vsel %vm5742_vm2, %v5714_v26, %v5770_v63  ;;  %vm5743_vm5 = vcmp.ge.f32.partialorder %v5715_v53, 0.0  ;;  %v5771_v55 = vmul.f32 0.01, %v5715_v53  ;;  %v6068_v15 = vmax.f32 %v6041_v32, %v9605_v62  ;;  %v5616_v61 = vpop.f32.mrb[25].mxu1  ;;  %v5869_v26 = vld [vmem:[#allocation3 + $0x59] sm:$0xff] }
 0x593   : > { %5826 = vst.msk [vmem:[#allocation3 + $0xa0] sm:$0xff] %vm3213_vm4, %v5798_v47  ;;  %v5801_v42 = vsel %vm5745_vm3, %v5717_v59, %v5773_v41  ;;  %v5890_v38 = vmax.f32 %v5842_v45, %v5866_v56  ;;  %v5891_v11 = vmax.f32 %v5843_v0, %v5867_v5  ;;  %v6094_v44 = vmax.f32 %v6067_v48, %v9612_v33  ;;  %v7496_v36 = vpop.f32.mrb[26].mxu1  ;;  %v5845_v32 = vld [vmem:[#allocation3 + $0x58] sm:$0xff]  ;;  %v5846_v2 = vld [vmem:[#allocation3 + $0x60] sm:$0xff]  ;;  %v5847_v41 = vld [vmem:[#allocation3 + $0x68] sm:$0xff] }
 0x594   : > { %5829 = vst.msk [vmem:[#allocation3 + $0xb8] sm:$0xff] %vm3213_vm4, %v5801_v42  ;;  %v5799_v40 = vsel %vm5743_vm5, %v5715_v53, %v5771_v55  ;;  %v5963_v60 = vmax.f32 %v9619_v22, %v5842_v45  ;;  %v5964_v31 = vmax.f32 %v5937_v21, %v5843_v0  ;;  %v6095_v62 = vmax.f32 %v6068_v15, %v9616_v23  ;;  %v5619_v30 = vpop.f32.mrb[27].mxu1  ;;  %v5916_v63 = vld [vmem:[#allocation3 + $0x52] sm:$0xff]  ;;  %v9668_v53 = vld [vmem:[#allocation3 + $0x61] sm:$0xff] }
 0x595   : > { %5827 = vst.msk [vmem:[#allocation3 + $0xa8] sm:$0xff] %vm3213_vm4, %v5799_v40  ;;  %v5938_v24 = vmax.f32 %v5890_v38, %v9642_v14  ;;  %v9651_v8 = vmax.f32 %v5891_v11, %v9644_v19  ;;  %v6042_v58 = vmax.f32 %v6015_v3, %v5842_v45  ;;  %v6043_v7 = vmax.f32 %v6016_v6, %v5843_v0  ;;  %v5871_v6 = vld [vmem:[#allocation3 + $0x69] sm:$0xff] }
 0x596   : > { %v5990_v33 = vmax.f32 %v5963_v60, %v5866_v56  ;;  %v5991_v27 = vmax.f32 %v5964_v31, %v5867_v5  ;;  %v5692_v54 = vadd.f32 %v7495_v16, %v9513_v4  ;;  %v7501_v39 = vpack.c.bf16 %v6095_v62, %v6094_v44  ;;  %v5872_v44 = vld [vmem:[#allocation3 + $0x71] sm:$0xff]  ;;  %v5873_v62 = vld [vmem:[#allocation3 + $0x79] sm:$0xff] }
 0x597   : > { %v6069_v22 = vmax.f32 %v6042_v58, %v5866_v56  ;;  %v5690_v18 = vadd.f32 %v9513_v4, %v5616_v61  ;;  %v5693_v50 = vadd.f32 %v7496_v36, %v9513_v4  ;;  %v6070_v28 = vmax.f32 %v6043_v7, %v5867_v5  ;;  %v5918_v61 = vld [vmem:[#allocation3 + $0x62] sm:$0xff]  ;;  %v5919_v31 = vld [vmem:[#allocation3 + $0x6a] sm:$0xff] }
 0x598   : > { %v6017_v23 = vmax.f32 %v5990_v33, %v9642_v14  ;;  %v6018_v21 = vmax.f32 %v5991_v27, %v9644_v19  ;;  %v5720_v25 = vadd.f32 %v5692_v54, %v9374_v46  ;;  %7502 = vmatpush1.bf16.msra.mxu0 %v7501_v39  ;;  %v5691_v51 = vadd.f32 %v9513_v4, %v5619_v30  ;;  %v5848_v33 = vld [vmem:[#allocation3 + $0x70] sm:$0xff]  ;;  %v5849_v39 = vld [vmem:[#allocation3 + $0x78] sm:$0xff] }
 0x599   : > { %v6096_v12 = vmax.f32 %v6069_v22, %v9642_v14  ;;  %v5718_v37 = vadd.f32 %v8106_v17, %v5690_v18  ;;  %v5721_v9 = vadd.f32 %v5693_v50, %v9372_v43  ;;  %7503 = vmatprep.subr.bf16.mxu0 %v8173_v20  ;;  %v6097_v29 = vmax.f32 %v6070_v28, %v9644_v19  ;;  %v9680_v28 = vld [vmem:[#allocation3 + $0x81] sm:$0xff] }
 0x59a   : > { %vm5748_vm8 = vcmp.ge.f32.partialorder %v5720_v25, 0.0  ;;  %v5776_v35 = vmul.f32 0.01, %v5720_v25  ;;  %v5892_v46 = vmax.f32 %v5844_v52, %v9656_v34  ;;  %v5719_v43 = vadd.f32 %v5691_v51, %v9362_v49  ;;  %v5921_v17 = vld [vmem:[#allocation3 + $0x7a] sm:$0xff]  ;;  %v5851_v51 = vld [vmem:[#allocation3 + $0x88] sm:$0xff] }
 0x59b   : > { %vm5746_vm9 = vcmp.ge.f32.partialorder %v5718_v37, 0.0  ;;  %v5774_v13 = vmul.f32 0.01, %v5718_v37  ;;  %vm5749_vm10 = vcmp.ge.f32.partialorder %v5721_v9, 0.0  ;;  %v5777_v10 = vmul.f32 0.01, %v5721_v9 }
 0x59c   : > { %v7504_v59 = vpack.c.bf16 %v6097_v29, %v6096_v12  ;;  %v5804_v1 = vsel %vm5748_vm8, %v5720_v25, %v5776_v35  ;;  %v5893_v4 = vmax.f32 %v5845_v32, %v5869_v26  ;;  %v5940_v56 = vmax.f32 %v5892_v46, %v5916_v63  ;;  %v5850_v46 = vld [vmem:[#allocation3 + $0x80] sm:$0xff] }
 0x59d   : > { %5832 = vst.msk [vmem:[#allocation3 + $0xd0] sm:$0xff] %vm3213_vm4, %v5804_v1  ;;  %v5802_v3 = vsel %vm5746_vm9, %v5718_v37, %v5774_v13  ;;  %v5805_v0 = vsel %vm5749_vm10, %v5721_v9, %v5777_v10  ;;  %v5965_v5 = vmax.f32 %v5938_v24, %v5844_v52  ;;  %vm5747_vm11 = vcmp.ge.f32.partialorder %v5719_v43, 0.0 }
 0x59e   : > { %7505 = vmatpush1.bf16.msra.mxu0 %v7504_v59  ;;  %5830 = vst.msk [vmem:[#allocation3 + $0xc0] sm:$0xff] %vm3213_vm4, %v5802_v3  ;;  %v5775_v49 = vmul.f32 0.01, %v5719_v43  ;;  %v5941_v45 = vmax.f32 %v5893_v4, %v5917_v57  ;;  %v5966_v47 = vmax.f32 %v9651_v8, %v5845_v32  ;;  %v6044_v48 = vmax.f32 %v6017_v23, %v5844_v52  ;;  %v5875_v52 = vld [vmem:[#allocation3 + $0x89] sm:$0xff] }
 0x59f   : > { %5833 = vst.msk [vmem:[#allocation3 + $0xd8] sm:$0x3f] %vm3248_vm6, %v5805_v0  ;;  %7506 = vmatprep.subr.bf16.mxu0 %v8173_v20  ;;  %v5992_v55 = vmax.f32 %v5965_v5, %v9656_v34  ;;  %v6045_v16 = vmax.f32 %v6018_v21, %v5845_v32  ;;  %v5894_v42 = vmax.f32 %v5846_v2, %v9668_v53  ;;  %vm8174_vm6 = vmmov 1  }
 0x5a0   : > { %v5803_v15 = vsel %vm5747_vm11, %v5719_v43, %v5775_v49  ;;  %v5993_v38 = vmax.f32 %v5966_v47, %v5869_v26  ;;  %v5895_v11 = vmax.f32 %v5847_v41, %v5871_v6  ;;  %v5967_v40 = vmax.f32 %v5940_v56, %v5846_v2  ;;  %v5923_v56 = vld [vmem:[#allocation3 + $0x8a] sm:$0xff]  ;;  %vm7532_vm12 = vmpackc.low %vm563_vm0, %vm8174_vm6 }
 0x5a1   : > { %5831 = vst.msk [vmem:[#allocation3 + $0xc8] sm:$0xff] %vm3213_vm4, %v5803_v15  ;;  %v6019_v14 = vmax.f32 %v5992_v55, %v5916_v63  ;;  %v6071_v19 = vmax.f32 %v6044_v48, %v9656_v34  ;;  %v6072_v60 = vmax.f32 %v6045_v16, %v5869_v26  ;;  %v5942_v36 = vmax.f32 %v5894_v42, %v5918_v61  ;;  %v5920_v34 = vld [vmem:[#allocation3 + $0x72] sm:$0xff] }
 0x5a2   : > { %v6020_v24 = vmax.f32 %v5993_v38, %v5917_v57  ;;  %v5943_v8 = vmax.f32 %v5895_v11, %v5919_v31  ;;  %v5968_v58 = vmax.f32 %v5941_v45, %v5847_v41  ;;  %v5994_v30 = vmax.f32 %v5967_v40, %v9668_v53  ;;  %v5852_v38 = vld [vmem:[#allocation3 + $0x90] sm:$0xff]  ;;  %v5853_v11 = vld [vmem:[#allocation3 + $0x98] sm:$0xff] }
 0x5a3   : > { %v6098_v27 = vmax.f32 %v6071_v19, %v5916_v63  ;;  %v6099_v7 = vmax.f32 %v6072_v60, %v5917_v57  ;;  %v6046_v54 = vmax.f32 %v6019_v14, %v5846_v2  ;;  %v5896_v22 = vmax.f32 %v5848_v33, %v5872_v44  ;;  %v5924_v19 = vld [vmem:[#allocation3 + $0x92] sm:$0xff]  ;;  %v5925_v60 = vld [vmem:[#allocation3 + $0x9a] sm:$0xff] }
 0x5a4   : > { %v5995_v18 = vmax.f32 %v5968_v58, %v5871_v6  ;;  %v6021_v50 = vmax.f32 %v5994_v30, %v5918_v61  ;;  %v6047_v23 = vmax.f32 %v6020_v24, %v5847_v41  ;;  %v5897_v21 = vmax.f32 %v5849_v39, %v5873_v62  ;;  %v5876_v41 = vld [vmem:[#allocation3 + $0x91] sm:$0xff]  ;;  %v5878_v58 = vld [vmem:[#allocation3 + $0xa1] sm:$0xff]  ;;  %v9691_v30 = vld [vmem:[#allocation3 + $0xa9] sm:$0xff] }
 0x5a5   : > { %v7507_v25 = vpack.c.bf16 %v6099_v7, %v6098_v27  ;;  %v6073_v12 = vmax.f32 %v6046_v54, %v9668_v53  ;;  %v5944_v37 = vmax.f32 %v5896_v22, %v5920_v34  ;;  %v5969_v9 = vmax.f32 %v5942_v36, %v5848_v33  ;;  %v5922_v53 = vld [vmem:[#allocation3 + $0x82] sm:$0xff] }
 0x5a6   : > { %v6022_v26 = vmax.f32 %v5995_v18, %v5919_v31  ;;  %v6074_v29 = vmax.f32 %v6047_v23, %v5871_v6  ;;  %v5945_v35 = vmax.f32 %v5897_v21, %v5921_v17  ;;  %v5970_v32 = vmax.f32 %v5943_v8, %v5849_v39  ;;  %v9685_v6 = vld [vmem:[#allocation3 + $0x99] sm:$0xff]  ;;  %v5855_v8 = vld [vmem:[#allocation3 + $0xa8] sm:$0xff] }
 0x5a7   : > { %7508 = vmatpush1.bf16.msra.mxu0 %v7507_v25  ;;  %v6100_v13 = vmax.f32 %v6073_v12, %v5918_v61  ;;  %v5996_v10 = vmax.f32 %v5969_v9, %v5872_v44  ;;  %v6048_v59 = vmax.f32 %v6021_v50, %v5848_v33  ;;  %v5898_v1 = vmax.f32 %v5850_v46, %v9680_v28  ;;  %v5926_v9 = vld [vmem:[#allocation3 + $0xa2] sm:$0xff] }
 0x5a8   : > { %7509 = vmatprep.subr.bf16.mxu0 %v8173_v20  ;;  %v6101_v43 = vmax.f32 %v6074_v29, %v5919_v31  ;;  %v5997_v4 = vmax.f32 %v5970_v32, %v5873_v62  ;;  %v6049_v63 = vmax.f32 %v6022_v26, %v5849_v39  ;;  %v5899_v57 = vmax.f32 %v5851_v51, %v5875_v52  ;;  %v5854_v39 = vld [vmem:[#allocation3 + $0xa0] sm:$0xff]  ;;  %v5880_v26 = vld [vmem:[#allocation3 + $0xb1] sm:$0xff] }
 0x5a9   : > { %v6023_v3 = vmax.f32 %v5996_v10, %v5920_v34  ;;  %v6075_v0 = vmax.f32 %v6048_v59, %v5872_v44  ;;  %v5946_v5 = vmax.f32 %v5898_v1, %v5922_v53  ;;  %v5971_v2 = vmax.f32 %v5944_v37, %v5850_v46 }
 0x5aa   : > { %v7510_v49 = vpack.c.bf16 %v6101_v43, %v6100_v13  ;;  %v6024_v45 = vmax.f32 %v5997_v4, %v5921_v17  ;;  %v6076_v47 = vmax.f32 %v6049_v63, %v5873_v62  ;;  %v5947_v55 = vmax.f32 %v5899_v57, %v5923_v56  ;;  %v5856_v43 = vld [vmem:[#allocation3 + $0xb0] sm:$0xff] }
 0x5ab   : > { %v6102_v48 = vmax.f32 %v6075_v0, %v5920_v34  ;;  %v5972_v16 = vmax.f32 %v5945_v35, %v5851_v51  ;;  %v5998_v42 = vmax.f32 %v5971_v2, %v9680_v28  ;;  %v6050_v15 = vmax.f32 %v6023_v3, %v5850_v46 }
 0x5ac   : > { %7511 = vmatpush1.bf16.msra.mxu0 %v7510_v49  ;;  %v6103_v61 = vmax.f32 %v6076_v47, %v5921_v17  ;;  %v6051_v40 = vmax.f32 %v6024_v45, %v5851_v51  ;;  %v5900_v44 = vmax.f32 %v5852_v38, %v5876_v41  ;;  %v5901_v14 = vmax.f32 %v5853_v11, %v9685_v6  ;;  %v5927_v51 = vld [vmem:[#allocation3 + $0xaa] sm:$0xff]  ;;  %v5981_v49 = vld [vmem:[#allocation3 + $0xb9] sm:$0xff] }
 0x5ad   : > { %7512 = vmatprep.subr.bf16.mxu0 %v8173_v20  ;;  %v5999_v31 = vmax.f32 %v5972_v16, %v5875_v52  ;;  %v6025_v36 = vmax.f32 %v5998_v42, %v5922_v53  ;;  %v6077_v62 = vmax.f32 %v6050_v15, %v9680_v28  ;;  %v5973_v24 = vmax.f32 %v5946_v5, %v5852_v38  ;;  %v5955_v45 = vld [vmem:[#allocation3 + $0xc0] sm:$0xff]  ;;  %v5857_v16 = vld [vmem:[#allocation3 + $0xb8] sm:$0xf] }
 0x5ae   : > { %v7513_v33 = vpack.c.bf16 %v6103_v61, %v6102_v48  ;;  %v6078_v27 = vmax.f32 %v6051_v40, %v5875_v52  ;;  %v5948_v7 = vmax.f32 %v5900_v44, %v5924_v19  ;;  %v5949_v54 = vmax.f32 %v5901_v14, %v5925_v60  ;;  %v5881_v42 = vld [vmem:[#allocation3 + $0xb9] sm:$0xf]  ;;  %v5982_v40 = vld [vmem:[#allocation3 + $0xc1] sm:$0xff] }
 0x5af   : > { %v6026_v22 = vmax.f32 %v5999_v31, %v5923_v56  ;;  %v6104_v18 = vmax.f32 %v6077_v62, %v5922_v53  ;;  %v5974_v50 = vmax.f32 %v5947_v55, %v5853_v11  ;;  %v6000_v23 = vmax.f32 %v5973_v24, %v5876_v41  ;;  %v5928_v53 = vld [vmem:[#allocation3 + $0xb2] sm:$0xff] }
 0x5b0   : > { %7514 = vmatpush1.bf16.msra.mxu0 %v7513_v33  ;;  %v6105_v21 = vmax.f32 %v6078_v27, %v5923_v56  ;;  %v6052_v34 = vmax.f32 %v6025_v36, %v5852_v38  ;;  %v5902_v25 = vmax.f32 %v5854_v39, %v5878_v58  ;;  %v5903_v28 = vmax.f32 %v5855_v8, %v9691_v30  ;;  %v6008_v36 = vld [vmem:[#allocation3 + $0xba] sm:$0xff] }
 0x5b1   : > { %7515 = vmatprep.subr.bf16.mxu0 %v8173_v20  ;;  %v6001_v12 = vmax.f32 %v5974_v50, %v9685_v6  ;;  %v6027_v17 = vmax.f32 %v6000_v23, %v5924_v19  ;;  %v6053_v37 = vmax.f32 %v6026_v22, %v5853_v11  ;;  %v5975_v52 = vmax.f32 %v5948_v7, %v5854_v39  ;;  %v5929_v7 = vld [vmem:[#allocation3 + $0xba] sm:$0xf]  ;;  %v6009_v22 = vld [vmem:[#allocation3 + $0xc2] sm:$0xff] }
 0x5b2   : > { %v7516_v29 = vpack.c.bf16 %v6105_v21, %v6104_v18  ;;  %v6079_v35 = vmax.f32 %v6052_v34, %v5876_v41  ;;  %v5950_v32 = vmax.f32 %v5902_v25, %v5926_v9  ;;  %v5951_v46 = vmax.f32 %v5903_v28, %v5927_v51  ;;  %v5954_v41 = vld [vmem:[#allocation3 + $0xb8] sm:$0xff]  ;;  %v6035_v18 = vld [vmem:[#allocation3 + $0xc8] sm:$0xff] }
 0x5b3   : > { %v6028_v13 = vmax.f32 %v6001_v12, %v5925_v60  ;;  %v6080_v10 = vmax.f32 %v6053_v37, %v9685_v6  ;;  %v5976_v59 = vmax.f32 %v5949_v54, %v5855_v8  ;;  %v6002_v1 = vmax.f32 %v5975_v52, %v5878_v58  ;;  %v5956_v54 = vld [vmem:[#allocation3 + $0xc8] sm:$0xf]  ;;  %v6036_v37 = vld [vmem:[#allocation3 + $0xd0] sm:$0xff] }
 0x5b4   : > { %7517 = vmatpush1.bf16.msra.mxu0 %v7516_v29  ;;  %v6106_v4 = vmax.f32 %v6079_v35, %v5924_v19  ;;  %v6054_v63 = vmax.f32 %v6027_v17, %v5854_v39  ;;  %v5904_v57 = vmax.f32 %v5856_v43, %v5880_v26  ;;  %v5977_v3 = vmax.f32 %v5950_v32, %v5856_v43  ;;  %v6062_v12 = vld [vmem:[#allocation3 + $0xc9] sm:$0xff] }
 0x5b5   : > { %7518 = vmatprep.subr.bf16.mxu0 %v8173_v20  ;;  %v6107_v0 = vmax.f32 %v6080_v10, %v5925_v60  ;;  %v6003_v56 = vmax.f32 %v5976_v59, %v9691_v30  ;;  %v6029_v5 = vmax.f32 %v6002_v1, %v5926_v9  ;;  %v6055_v2 = vmax.f32 %v6028_v13, %v5855_v8  ;;  %v6089_v29 = vld [vmem:[#allocation3 + $0xca] sm:$0xff]  ;;  %v6037_v1 = vld [vmem:[#allocation3 + $0xd8] sm:$0xf] }
 0x5b6   : > { %v6081_v6 = vmax.f32 %v6054_v63, %v5878_v58  ;;  %v5952_v47 = vmax.f32 %v5904_v57, %v5928_v53  ;;  %v5978_v55 = vmax.f32 %v5951_v46, %v5954_v41  ;;  %v6004_v48 = vmax.f32 %v5977_v3, %v5880_v26  ;;  %v6010_v13 = vld [vmem:[#allocation3 + $0xca] sm:$0xf]  ;;  %v6063_v59 = vld [vmem:[#allocation3 + $0xd1] sm:$0xff]  ;;  %v6064_v57 = vld [vmem:[#allocation3 + $0xd9] sm:$0xf] }
 0x5b7   : > { %v7519_v15 = vpack.c.bf16 %v6107_v0, %v6106_v4  ;;  %v6030_v38 = vmax.f32 %v6003_v56, %v5927_v51  ;;  %v6082_v11 = vmax.f32 %v6055_v2, %v9691_v30  ;;  %v6056_v61 = vmax.f32 %v6029_v5, %v5856_v43  ;;  %v6090_v3 = vld [vmem:[#allocation3 + $0xd2] sm:$0xff]  ;;  %v6091_v0 = vld [vmem:[#allocation3 + $0xda] sm:$0xf] }
 0x5b8   : > { %v6108_v44 = vmax.f32 %v6081_v6, %v5926_v9  ;;  %v6005_v14 = vmax.f32 %v5978_v55, %v5981_v49  ;;  %v6031_v19 = vmax.f32 %v6004_v48, %v5928_v53  ;;  %v5979_v60 = vmax.f32 %v5952_v47, %v5955_v45 }
 0x5b9   : > { %7520 = vmatpush1.bf16.msra.mxu0 %v7519_v15  ;;  %v6109_v31 = vmax.f32 %v6082_v11, %v5927_v51  ;;  %v6057_v62 = vmax.f32 %v6030_v38, %v5954_v41  ;;  %v6083_v24 = vmax.f32 %v6056_v61, %v5880_v26  ;;  %v5905_v8 = vmax.f32 %v5857_v16, %v5881_v42  ;;  %v5983_v51 = vld [vmem:[#allocation3 + $0xc9] sm:$0xf]  ;;  %v6116_v41 = vld [vmem:[%s9773_s6] sm:$0xff] }
 0x5ba   : > { %7521 = vmatprep.subr.bf16.mxu0 %v8173_v20  ;;  %v6032_v58 = vmax.f32 %v6005_v14, %v6008_v36  ;;  %v6006_v33 = vmax.f32 %v5979_v60, %v5982_v40  ;;  %v6058_v27 = vmax.f32 %v6031_v19, %v5955_v45 }
 0x5bb   : > { %v7522_v30 = vpack.c.bf16 %v6109_v31, %v6108_v44  ;;  %v6084_v39 = vmax.f32 %v6057_v62, %v5981_v49  ;;  %v5953_v50 = vmax.f32 %v5905_v8, %v5929_v7  ;;  %v6110_v25 = vmax.f32 %v6083_v24, %v5928_v53  ;;  %v6119_v49 = vld [vmem:[%s9773_s6 + $0x18] sm:$0xff] }
 0x5bc   : > { %v6033_v23 = vmax.f32 %v6006_v33, %v6009_v22  ;;  %v6059_v21 = vmax.f32 %v6032_v58, %v6035_v18  ;;  %v6085_v34 = vmax.f32 %v6058_v27, %v5982_v40 }
 0x5bd   : > { %7523 = vmatpush1.bf16.msra.mxu0 %v7522_v30  ;;  %v6111_v28 = vmax.f32 %v6084_v39, %v6008_v36  ;;  %v5980_v17 = vmax.f32 %v5953_v50, %v5956_v54 }
 0x5be   : > { %7524 = vmatprep.subr.bf16.mxu0 %v8173_v20  ;;  %v6086_v9 = vmax.f32 %v6059_v21, %v6062_v12  ;;  %v6060_v26 = vmax.f32 %v6033_v23, %v6036_v37  ;;  %v6112_v35 = vmax.f32 %v6085_v34, %v6009_v22 }
 0x5bf   : > { %v7525_v52 = vpack.c.bf16 %v6111_v28, %v6110_v25  ;;  %v6007_v32 = vmax.f32 %v5980_v17, %v5983_v51 }
 0x5c0   : > { %v6113_v46 = vmax.f32 %v6086_v9, %v6089_v29  ;;  %v6087_v43 = vmax.f32 %v6060_v26, %v6063_v59 }
 0x5c1   : > { %7526 = vmatpush1.bf16.msra.mxu0 %v7525_v52  ;;  %v6034_v10 = vmax.f32 %v6007_v32, %v6010_v13 }
 0x5c2   : > { %7527 = vmatprep.subr.bf16.mxu0 %v8173_v20  ;;  %v7528_v4 = vpack.c.bf16 %v6113_v46, %v6112_v35  ;;  %v6114_v56 = vmax.f32 %v6087_v43, %v6090_v3 }
 0x5c3   : > { %v6061_v63 = vmax.f32 %v6034_v10, %v6037_v1 }
 0x5c5   : > { %7529 = vmatpush1.bf16.msra.mxu0 %v7528_v4  ;;  %v6088_v53 = vmax.f32 %v6061_v63, %v6064_v57 }
 0x5c6   : > { %7530 = vmatprep.subr.bf16.mxu0 %v8173_v20  ;;  %v6118_v20 = vld [vmem:[%s9773_s6 + $0x10] sm:$0xff] }
 0x5c7   : > { %v6115_v5 = vmax.f32 %v6088_v53, %v6091_v0 }
 0x5c9   : > { %v7531_v2 = vpack.c.bf16 %v6115_v5, %v6114_v56 }
 0x5cb   : > { %7533 = vmatpush1.bf16.msk.msra.mxu0 %vm7532_vm12, %v7531_v2 }
 0x5ce   : > { %6195 = vmatmul.mubr.f32.vlgmr.msra.gmra.mrb[28].mxu0 %v6116_v41 }
 0x5cf   : > { %6652 = vmatprep.mubr.msk.f32.mxu0 %vm6120_vm7, %v6119_v49 }
 0x5d2   : > { %6200 = vmatmul.mubr.f32.gmra.mrb[30].mxu0 %v6118_v20 }
 0x6a1   : > { %v6196_v45 = vpop.f32.mrb[28].mxu0 }
 0x6a2   : > { %6205 = vst.msk [vmem:[%s271_s20] sm:$0xff] %vm3213_vm4, %v6196_v45  ;;  %v6198_v6 = vpop.f32.mrb[29].mxu0 }
 0x6a5   : > { %v6201_v47 = vpop.f32.mrb[30].mxu0 }
 0x6a6   : > { %6206 = vst.msk [vmem:[%s271_s20 + $0x8] sm:$0xff] %vm3213_vm4, %v6201_v47  ;;  %v6203_v55 = vpop.f32.mrb[31].mxu0 }
 0x6a7   : > { %8120 = shalt.err (!%p8117_p3)
}
 0x6a8   : > { %s8121_s16 = scalar_lea.hbm %s9723_s9, 256  ;;  %s8125_s19 = scalar_lea.hbm %s9774_s7, 512 }
 0x6a9   : > { %p8122_p4 = scmp.ne.s32.totalorder %s9723_s9, %s8121_s16  ;;  %p8126_p9 = scmp.lt.u32.totalorder %s9723_s9, %s9774_s7 }
 0x6aa   : > { %p8127_p10 = scmp.lt.u32.totalorder %s8125_s19, %s8121_s16  ;;  %p8129_p12 = scmp.lt.u32.totalorder %s8121_s16, %s9723_s9 }
 0x6ab   : > { %p8123_p7 = pnand %p8122_p4, %p8256_p5 }
 0x6ac   : > { %p8128_p11 = por %p8127_p10, %p8126_p9 }
 0x6ad   : > { %p8124_p8 = pneg %p8123_p7 }
 0x6ae   : > { %p8130_p13 = por %p8129_p12, %p8128_p11 }
 0x6b0   : > { %p8131_p0 = pnand %p8130_p13, %p8124_p8 }
 0x6b2   : > { %8134 = shalt.err (!%p8131_p0)
}
 0x6b3   : > { %s8176_s29 = smov 128   ;;  %s8177_s8 = smov 8  }
 0x6b4   : > { %7991 = dma.vmem_to_hbm [thread:$0]  (%p8256_p5), %s9718_s22, 256, %s9723_s9, %s9726_s21, %s8176_s29, %s8176_s29, %s8177_s8  }
 0x6b5 PF: > { %p7997_p1 = scmp.ge.s32.totalorder %s8169_s27, 2  ;;  %s6236_s28 = sand.u32 1, %s8157_s24  }
 0x6b6   : > { %s6237_s13 = scalar_lea.sflag [#allocation5], %s6236_s28 }
 0x6b7   : > { %p7994_p2 = pnand %p7997_p1, %p8260_p6 }
 0x6b9   : > { %8152 = dma.done.wait (!%p7994_p2), %s6237_s13, 256  }
 0x6ba   : > { %8154 = vsyncadd (!%p7994_p2), %s6237_s13, 4294967040  ;;  %p17_p3 = scmp.ge.s32.totalorder %s8243_s30, 4   ;;  %s9792_s24 = smov %s8161_s25 }
 0x6bb   : > { %s9793_s25 = smov %s8165_s26  ;;  %s9794_s26 = smov %s8254_s10 }
 0x6bc   : > { %s9795_s27 = smov %s8243_s30  ;;  %19 = sbr.rel (!%p17_p3) target bundleno = 3 (0x3), region = 99 }
 0x6c3   :  { %6242 = vsyncpa [#allocation5], 1 }
 0x6c4   :  { %6244 = vsyncpa [#allocation5 + $0x1], 1 }

</bundles_post_ra>
